<compile_context>
chip_gen: v7x
topology: tpu7x:2x2x1
jax: 0.10.0
libtpu: 0.0.40
codegen_flags: <defaults>
</compile_context>

<pallas_src>
import jax
import jax.numpy as jnp
from jax.experimental import pallas as pl
from jax.experimental.pallas import tpu as pltpu


def _layernorm(x, gamma, beta, eps=1e-5):
    # PyTorch nn.LayerNorm over the last dim: biased variance, eps=1e-5. f32 math.
    mean = jnp.mean(x, axis=-1, keepdims=True)
    xc = x - mean
    var = jnp.mean(xc * xc, axis=-1, keepdims=True)
    inv = jax.lax.rsqrt(var + eps)
    return xc * inv * gamma + beta


def _generator_kernel(z_ref, y_ref, w1z_ref, w1y_ref, w2_ref, w3_ref,
                      aux_ref, b3_ref, o_ref):
    # z_ref: (tm, Lz) f32; y_ref: (tm, Ly) f32; w*: bf16;
    # aux: (6, H) f32 = [b1, g1, beta1, b2, g2, beta2]; b3: (1, F) f32; o: (tm, F) f32.
    aux = aux_ref[...]
    b1, g1, be1 = aux[0:1, :], aux[1:2, :], aux[2:3, :]
    b2, g2, be2 = aux[3:4, :], aux[4:5, :], aux[5:6, :]

    z = z_ref[...].astype(jnp.bfloat16)
    y = y_ref[...].astype(jnp.bfloat16)

    # Layer 1: split-K linear (fuses torch.cat(z, y) @ w1) -> LayerNorm -> ReLU.
    h = (jnp.dot(z, w1z_ref[...], preferred_element_type=jnp.float32)
         + jnp.dot(y, w1y_ref[...], preferred_element_type=jnp.float32)
         + b1)
    h = _layernorm(h, g1, be1)
    h = jnp.maximum(h, 0.0)

    # Layer 2: Linear -> LayerNorm -> ReLU.
    h = jnp.dot(h.astype(jnp.bfloat16), w2_ref[...],
                preferred_element_type=jnp.float32) + b2
    h = _layernorm(h, g2, be2)
    h = jnp.maximum(h, 0.0)

    # Output head: (tm, F) f32, unpadded (F == full last dim of the output array).
    out = jnp.dot(h.astype(jnp.bfloat16), w3_ref[...],
                  preferred_element_type=jnp.float32) + b3_ref[...]
    o_ref[...] = out.astype(o_ref.dtype)


def prepare_params(params, latent_dim_z):
    """One-time parameter preprocessing; keep the result and reuse it across calls."""
    w1 = params["w1"].astype(jnp.bfloat16)
    return {
        "w1_z": w1[:latent_dim_z],                       # (Lz, H) bf16
        "w1_y": w1[latent_dim_z:],                       # (Ly, H) bf16
        "w2": params["w2"].astype(jnp.bfloat16),         # (H, H)  bf16
        "w3": params["w3"].astype(jnp.bfloat16),         # (H, F)  bf16
        "aux": jnp.concatenate(
            [params["b1"], params["g1"], params["beta1"],
             params["b2"], params["g2"], params["beta2"]],
            axis=0).astype(jnp.float32),                 # (6, H)  f32
        "b3": params["b3"].astype(jnp.float32),          # (1, F)  f32
    }


def _num_tensorcores():
    """Best-effort count of TensorCores addressable by one grid (for megacore sharding)."""
    try:
        kind = jax.devices()[0].device_kind.lower()
        if ("v7" in kind) or ("7x" in kind) or ("v4" in kind) or ("v5p" in kind):
            return 2  # dual-TC / megacore chips
    except Exception:
        pass
    return 1  # v5e / v6e: one TensorCore, grid is a serial loop


def _pick_batch_tile(B, n_cores, requested=None, cap=4096):
    if requested is not None:
        return max(1, min(requested, B))
    if n_cores >= 2 and B >= 16:
        tile = ((pl.cdiv(B, n_cores) + 7) // 8) * 8   # >=2 parallel steps, 8-row aligned
        tile = min(tile, B)
    else:
        tile = B                                       # single-TC: one grid step
    return min(tile, cap)                              # VMEM guardrail for huge B


def generator_forward(z, y, prepared, *, batch_tile=None):
    """z: (B, latent_dim_z) f32, y: (B, num_classes) f32, prepared = prepare_params(...).
    Returns (B, feature_dim) float32."""
    B, Lz = z.shape
    _, Ly = y.shape
    H = prepared["w2"].shape[0]
    F = prepared["w3"].shape[1]

    tile = _pick_batch_tile(B, _num_tensorcores(), batch_tile)
    grid = (pl.cdiv(B, tile),)

    def full(shape):
        # Weights / packed params: same (whole-array) block for every batch tile.
        return pl.BlockSpec(shape, lambda i: (0, 0))

    in_specs = [
        pl.BlockSpec((tile, Lz), lambda i: (i, 0)),   # z tile (f32, cast in kernel)
        pl.BlockSpec((tile, Ly), lambda i: (i, 0)),   # y tile
        full((Lz, H)),                                # w1_z (bf16)
        full((Ly, H)),                                # w1_y (bf16)
        full((H, H)),                                 # w2   (bf16)
        full((H, F)),                                 # w3   (bf16)
        full((6, H)),                                 # packed b/gamma/beta (f32)
        full((1, F)),                                 # b3   (f32)
    ]
    out_spec = pl.BlockSpec((tile, F), lambda i: (i, 0))

    fn = pl.pallas_call(
        _generator_kernel,
        out_shape=jax.ShapeDtypeStruct((B, F), jnp.float32),
        grid_spec=pltpu.PrefetchScalarGridSpec(
            num_scalar_prefetch=0,
            grid=grid,
            in_specs=in_specs,
            out_specs=out_spec,
        ),
        compiler_params=pltpu.CompilerParams(
            dimension_semantics=("parallel",)),
    )
    return fn(z, y, prepared["w1_z"], prepared["w1_y"], prepared["w2"],
              prepared["w3"], prepared["aux"], prepared["b3"])


def init_params(key, latent_dim, hidden_dim, feature_dim):
    """Deterministic synthetic init (mimics weight_init-style small normals)."""
    ks = jax.random.split(key, 3)
    scale = 0.02
    return {
        "w1": scale * jax.random.normal(ks[0], (latent_dim, hidden_dim), jnp.float32),
        "b1": jnp.zeros((1, hidden_dim), jnp.float32),
        "g1": jnp.ones((1, hidden_dim), jnp.float32),
        "beta1": jnp.zeros((1, hidden_dim), jnp.float32),
        "w2": scale * jax.random.normal(ks[1], (hidden_dim, hidden_dim), jnp.float32),
        "b2": jnp.zeros((1, hidden_dim), jnp.float32),
        "g2": jnp.ones((1, hidden_dim), jnp.float32),
        "beta2": jnp.zeros((1, hidden_dim), jnp.float32),
        "w3": scale * jax.random.normal(ks[2], (hidden_dim, feature_dim), jnp.float32),
        "b3": jnp.zeros((1, feature_dim), jnp.float32),
    }


def _reference_forward(z, y, p):
    """Pure-JAX reference with the same bf16-matmul / f32-LayerNorm precision policy."""
    x = jnp.concatenate([z, y], axis=1)

    def mm(a, w):
        return jnp.dot(a.astype(jnp.bfloat16), w.astype(jnp.bfloat16),
                       preferred_element_type=jnp.float32)

    def ln(h, g, b, eps=1e-5):
        m = h.mean(-1, keepdims=True)
        v = ((h - m) ** 2).mean(-1, keepdims=True)
        return (h - m) * jax.lax.rsqrt(v + eps) * g + b

    h = mm(x, p["w1"]) + p["b1"]
    h = jnp.maximum(ln(h, p["g1"], p["beta1"]), 0.0)
    h = mm(h, p["w2"]) + p["b2"]
    h = jnp.maximum(ln(h, p["g2"], p["beta2"]), 0.0)
    return mm(h, p["w3"]) + p["b3"]


if __name__ == "__main__":
    # Shapes consistent with the module's config:
    #   generative_latent_dim=24, generative_num_classes=8 -> latent_dim=32
    #   generative_hidden_dim=64, generative_feature_dim=32
    batch = 512
    latent_z = 24
    num_classes = 8
    latent_dim = latent_z + num_classes
    hidden_dim = 64
    feature_dim = 32

    key = jax.random.PRNGKey(0)
    kz, ky, kp = jax.random.split(key, 3)

    z = jax.random.normal(kz, (batch, latent_z), jnp.float32)
    labels = jax.random.randint(ky, (batch,), 0, num_classes)
    y = jax.nn.one_hot(labels, num_classes, dtype=jnp.float32)

    params = init_params(kp, latent_dim, hidden_dim, feature_dim)
    prepared = prepare_params(params, latent_z)   # one-time; reuse across calls

    out = generator_forward(z, y, prepared)
    out = jax.block_until_ready(out)

    ref = _reference_forward(z, y, params)
    assert out.shape == (batch, feature_dim)
    assert bool(jnp.allclose(out, ref, atol=2e-3, rtol=2e-3)), "mismatch vs reference"

    print("KERNEL_OK")
</pallas_src>

<mosaic_0001>
module attributes {stable_mosaic.version = 11 : i64} {
  func.func @_generator_kernel(%arg0: i32, %arg1: memref<512x24xf32, #tpu.memory_space<vmem>>, %arg2: memref<512x8xf32, #tpu.memory_space<vmem>>, %arg3: memref<24x64xbf16, #tpu.memory_space<vmem>>, %arg4: memref<8x64xbf16, #tpu.memory_space<vmem>>, %arg5: memref<64x64xbf16, #tpu.memory_space<vmem>>, %arg6: memref<64x32xbf16, #tpu.memory_space<vmem>>, %arg7: memref<6x64xf32, #tpu.memory_space<vmem>>, %arg8: memref<1x32xf32, #tpu.memory_space<vmem>>, %arg9: memref<512x32xf32, #tpu.memory_space<vmem>>) attributes {dimension_semantics = [#tpu.dimension_semantics<parallel>], iteration_bounds = array<i64: 1>, scalar_prefetch = 0 : i64, scratch_operands = 0 : i64, tpu.core_type = #tpu.core_type<tc>, window_params = [{transform_indices = @transform_0, window_bounds = array<i64: 512, 24>}, {transform_indices = @transform_1, window_bounds = array<i64: 512, 8>}, {pipeline_mode = #tpu.pipeline_mode<synchronous>, transform_indices = @transform_2, window_bounds = array<i64: 24, 64>}, {pipeline_mode = #tpu.pipeline_mode<synchronous>, transform_indices = @transform_3, window_bounds = array<i64: 8, 64>}, {pipeline_mode = #tpu.pipeline_mode<synchronous>, transform_indices = @transform_4, window_bounds = array<i64: 64, 64>}, {pipeline_mode = #tpu.pipeline_mode<synchronous>, transform_indices = @transform_5, window_bounds = array<i64: 64, 32>}, {pipeline_mode = #tpu.pipeline_mode<synchronous>, transform_indices = @transform_6, window_bounds = array<i64: 6, 64>}, {pipeline_mode = #tpu.pipeline_mode<synchronous>, transform_indices = @transform_7, window_bounds = array<i64: 1, 32>}, {transform_indices = @transform_8, window_bounds = array<i64: 512, 32>}]} {
    %c0 = arith.constant 0 : index
    %c0_0 = arith.constant 0 : index
    %0 = vector.load %arg7[%c0, %c0_0] : memref<6x64xf32, #tpu.memory_space<vmem>>, vector<6x64xf32>
    %1 = vector.extract_strided_slice %0 {offsets = [0, 0], sizes = [1, 64], strides = [1, 1]} : vector<6x64xf32> to vector<1x64xf32>
    %2 = vector.extract_strided_slice %0 {offsets = [1, 0], sizes = [1, 64], strides = [1, 1]} : vector<6x64xf32> to vector<1x64xf32>
    %3 = vector.extract_strided_slice %0 {offsets = [2, 0], sizes = [1, 64], strides = [1, 1]} : vector<6x64xf32> to vector<1x64xf32>
    %4 = vector.extract_strided_slice %0 {offsets = [3, 0], sizes = [1, 64], strides = [1, 1]} : vector<6x64xf32> to vector<1x64xf32>
    %5 = vector.extract_strided_slice %0 {offsets = [4, 0], sizes = [1, 64], strides = [1, 1]} : vector<6x64xf32> to vector<1x64xf32>
    %6 = vector.extract_strided_slice %0 {offsets = [5, 0], sizes = [1, 64], strides = [1, 1]} : vector<6x64xf32> to vector<1x64xf32>
    %c0_1 = arith.constant 0 : index
    %c0_2 = arith.constant 0 : index
    %7 = vector.load %arg1[%c0_1, %c0_2] : memref<512x24xf32, #tpu.memory_space<vmem>>, vector<512x24xf32>
    %8 = arith.truncf %7 : vector<512x24xf32> to vector<512x24xbf16>
    %c0_3 = arith.constant 0 : index
    %c0_4 = arith.constant 0 : index
    %9 = vector.load %arg2[%c0_3, %c0_4] : memref<512x8xf32, #tpu.memory_space<vmem>>, vector<512x8xf32>
    %10 = arith.truncf %9 : vector<512x8xf32> to vector<512x8xbf16>
    %c0_5 = arith.constant 0 : index
    %c0_6 = arith.constant 0 : index
    %11 = vector.load %arg3[%c0_5, %c0_6] : memref<24x64xbf16, #tpu.memory_space<vmem>>, vector<24x64xbf16>
    %cst = arith.constant dense<0.000000e+00> : vector<512x64xf32>
    %12 = tpu.matmul %8, %11, %cst {dimension_numbers = #tpu.dot_dimension_numbers<[1], [0], [0], [1], [0, 0, 1, 1], [], []>} : vector<512x24xbf16>, vector<24x64xbf16>, vector<512x64xf32> -> vector<512x64xf32>
    %c0_7 = arith.constant 0 : index
    %c0_8 = arith.constant 0 : index
    %13 = vector.load %arg4[%c0_7, %c0_8] : memref<8x64xbf16, #tpu.memory_space<vmem>>, vector<8x64xbf16>
    %cst_9 = arith.constant dense<0.000000e+00> : vector<512x64xf32>
    %14 = tpu.matmul %10, %13, %cst_9 {dimension_numbers = #tpu.dot_dimension_numbers<[1], [0], [0], [1], [0, 0, 1, 1], [], []>} : vector<512x8xbf16>, vector<8x64xbf16>, vector<512x64xf32> -> vector<512x64xf32>
    %15 = arith.addf %12, %14 : vector<512x64xf32>
    %16 = vector.broadcast %1 : vector<1x64xf32> to vector<512x64xf32>
    %17 = arith.addf %15, %16 : vector<512x64xf32>
    %cst_10 = arith.constant dense<0.000000e+00> : vector<512xf32>
    %18 = vector.multi_reduction <add>, %17, %cst_10 [1] : vector<512x64xf32> to vector<512xf32>
    %19 = vector.shape_cast %18 : vector<512xf32> to vector<512x1xf32>
    %cst_11 = arith.constant 6.400000e+01 : f32
    %20 = vector.broadcast %cst_11 : f32 to vector<512x1xf32>
    %21 = arith.divf %19, %20 : vector<512x1xf32>
    %22 = vector.broadcast %21 : vector<512x1xf32> to vector<512x64xf32>
    %23 = arith.subf %17, %22 : vector<512x64xf32>
    %24 = arith.mulf %23, %23 : vector<512x64xf32>
    %cst_12 = arith.constant dense<0.000000e+00> : vector<512xf32>
    %25 = vector.multi_reduction <add>, %24, %cst_12 [1] : vector<512x64xf32> to vector<512xf32>
    %26 = vector.shape_cast %25 : vector<512xf32> to vector<512x1xf32>
    %cst_13 = arith.constant 6.400000e+01 : f32
    %27 = vector.broadcast %cst_13 : f32 to vector<512x1xf32>
    %28 = arith.divf %26, %27 : vector<512x1xf32>
    %cst_14 = arith.constant 9.99999974E-6 : f32
    %29 = vector.broadcast %cst_14 : f32 to vector<512x1xf32>
    %30 = arith.addf %28, %29 : vector<512x1xf32>
    %31 = math.rsqrt %30 : vector<512x1xf32>
    %32 = vector.broadcast %31 : vector<512x1xf32> to vector<512x64xf32>
    %33 = arith.mulf %23, %32 : vector<512x64xf32>
    %34 = vector.broadcast %2 : vector<1x64xf32> to vector<512x64xf32>
    %35 = arith.mulf %33, %34 : vector<512x64xf32>
    %36 = vector.broadcast %3 : vector<1x64xf32> to vector<512x64xf32>
    %37 = arith.addf %35, %36 : vector<512x64xf32>
    %cst_15 = arith.constant 0.000000e+00 : f32
    %38 = vector.broadcast %cst_15 : f32 to vector<512x64xf32>
    %39 = arith.maximumf %37, %38 : vector<512x64xf32>
    %40 = arith.truncf %39 : vector<512x64xf32> to vector<512x64xbf16>
    %c0_16 = arith.constant 0 : index
    %c0_17 = arith.constant 0 : index
    %41 = vector.load %arg5[%c0_16, %c0_17] : memref<64x64xbf16, #tpu.memory_space<vmem>>, vector<64x64xbf16>
    %cst_18 = arith.constant dense<0.000000e+00> : vector<512x64xf32>
    %42 = tpu.matmul %40, %41, %cst_18 {dimension_numbers = #tpu.dot_dimension_numbers<[1], [0], [0], [1], [0, 0, 1, 1], [], []>} : vector<512x64xbf16>, vector<64x64xbf16>, vector<512x64xf32> -> vector<512x64xf32>
    %43 = vector.broadcast %4 : vector<1x64xf32> to vector<512x64xf32>
    %44 = arith.addf %42, %43 : vector<512x64xf32>
    %cst_19 = arith.constant dense<0.000000e+00> : vector<512xf32>
    %45 = vector.multi_reduction <add>, %44, %cst_19 [1] : vector<512x64xf32> to vector<512xf32>
    %46 = vector.shape_cast %45 : vector<512xf32> to vector<512x1xf32>
    %cst_20 = arith.constant 6.400000e+01 : f32
    %47 = vector.broadcast %cst_20 : f32 to vector<512x1xf32>
    %48 = arith.divf %46, %47 : vector<512x1xf32>
    %49 = vector.broadcast %48 : vector<512x1xf32> to vector<512x64xf32>
    %50 = arith.subf %44, %49 : vector<512x64xf32>
    %51 = arith.mulf %50, %50 : vector<512x64xf32>
    %cst_21 = arith.constant dense<0.000000e+00> : vector<512xf32>
    %52 = vector.multi_reduction <add>, %51, %cst_21 [1] : vector<512x64xf32> to vector<512xf32>
    %53 = vector.shape_cast %52 : vector<512xf32> to vector<512x1xf32>
    %cst_22 = arith.constant 6.400000e+01 : f32
    %54 = vector.broadcast %cst_22 : f32 to vector<512x1xf32>
    %55 = arith.divf %53, %54 : vector<512x1xf32>
    %cst_23 = arith.constant 9.99999974E-6 : f32
    %56 = vector.broadcast %cst_23 : f32 to vector<512x1xf32>
    %57 = arith.addf %55, %56 : vector<512x1xf32>
    %58 = math.rsqrt %57 : vector<512x1xf32>
    %59 = vector.broadcast %58 : vector<512x1xf32> to vector<512x64xf32>
    %60 = arith.mulf %50, %59 : vector<512x64xf32>
    %61 = vector.broadcast %5 : vector<1x64xf32> to vector<512x64xf32>
    %62 = arith.mulf %60, %61 : vector<512x64xf32>
    %63 = vector.broadcast %6 : vector<1x64xf32> to vector<512x64xf32>
    %64 = arith.addf %62, %63 : vector<512x64xf32>
    %cst_24 = arith.constant 0.000000e+00 : f32
    %65 = vector.broadcast %cst_24 : f32 to vector<512x64xf32>
    %66 = arith.maximumf %64, %65 : vector<512x64xf32>
    %67 = arith.truncf %66 : vector<512x64xf32> to vector<512x64xbf16>
    %c0_25 = arith.constant 0 : index
    %c0_26 = arith.constant 0 : index
    %68 = vector.load %arg6[%c0_25, %c0_26] : memref<64x32xbf16, #tpu.memory_space<vmem>>, vector<64x32xbf16>
    %cst_27 = arith.constant dense<0.000000e+00> : vector<512x32xf32>
    %69 = tpu.matmul %67, %68, %cst_27 {dimension_numbers = #tpu.dot_dimension_numbers<[1], [0], [0], [1], [0, 0, 1, 1], [], []>} : vector<512x64xbf16>, vector<64x32xbf16>, vector<512x32xf32> -> vector<512x32xf32>
    %c0_28 = arith.constant 0 : index
    %c0_29 = arith.constant 0 : index
    %70 = vector.load %arg8[%c0_28, %c0_29] : memref<1x32xf32, #tpu.memory_space<vmem>>, vector<1x32xf32>
    %71 = vector.broadcast %70 : vector<1x32xf32> to vector<512x32xf32>
    %72 = arith.addf %69, %71 : vector<512x32xf32>
    %c0_30 = arith.constant 0 : index
    %c0_31 = arith.constant 0 : index
    %73 = vector.load %arg9[%c0_30, %c0_31] : memref<512x32xf32, #tpu.memory_space<vmem>>, vector<512x32xf32>
    tpu.vector_store %arg9[%c0_30, %c0_31], %72 {strides = array<i32>} : memref<512x32xf32, #tpu.memory_space<vmem>>, vector<512x32xf32>,
    return
  }
  func.func @transform_0(%arg0: i32) -> (i32, i32) {
    %c0_i32 = arith.constant 0 : i32
    %c0_i32_0 = arith.constant 0 : i32
    return %arg0, %c0_i32 : i32, i32
  }
  func.func @transform_1(%arg0: i32) -> (i32, i32) {
    %c0_i32 = arith.constant 0 : i32
    %c0_i32_0 = arith.constant 0 : i32
    return %arg0, %c0_i32 : i32, i32
  }
  func.func @transform_2(%arg0: i32) -> (i32, i32) {
    %c0_i32 = arith.constant 0 : i32
    %c0_i32_0 = arith.constant 0 : i32
    %c0_i32_1 = arith.constant 0 : i32
    return %c0_i32, %c0_i32_0 : i32, i32
  }
  func.func @transform_3(%arg0: i32) -> (i32, i32) {
    %c0_i32 = arith.constant 0 : i32
    %c0_i32_0 = arith.constant 0 : i32
    %c0_i32_1 = arith.constant 0 : i32
    return %c0_i32, %c0_i32_0 : i32, i32
  }
  func.func @transform_4(%arg0: i32) -> (i32, i32) {
    %c0_i32 = arith.constant 0 : i32
    %c0_i32_0 = arith.constant 0 : i32
    %c0_i32_1 = arith.constant 0 : i32
    return %c0_i32, %c0_i32_0 : i32, i32
  }
  func.func @transform_5(%arg0: i32) -> (i32, i32) {
    %c0_i32 = arith.constant 0 : i32
    %c0_i32_0 = arith.constant 0 : i32
    %c0_i32_1 = arith.constant 0 : i32
    return %c0_i32, %c0_i32_0 : i32, i32
  }
  func.func @transform_6(%arg0: i32) -> (i32, i32) {
    %c0_i32 = arith.constant 0 : i32
    %c0_i32_0 = arith.constant 0 : i32
    %c0_i32_1 = arith.constant 0 : i32
    return %c0_i32, %c0_i32_0 : i32, i32
  }
  func.func @transform_7(%arg0: i32) -> (i32, i32) {
    %c0_i32 = arith.constant 0 : i32
    %c0_i32_0 = arith.constant 0 : i32
    %c0_i32_1 = arith.constant 0 : i32
    return %c0_i32, %c0_i32_0 : i32, i32
  }
  func.func @transform_8(%arg0: i32) -> (i32, i32) {
    %c0_i32 = arith.constant 0 : i32
    %c0_i32_0 = arith.constant 0 : i32
    return %arg0, %c0_i32 : i32, i32
  }
}

</mosaic_0001>

<bundles_post_ra>
// kernel: tpu_custom_call.1
= control target key start
LH: loop header
LB: loop body
LE: loop exit
PB: predicated region body
PF: predicated region fallthrough
CT: control target
= control target key end

     0   :  { %vm324_vm0 = vcmask 1043456   ;;  %vm227_vm1 = vcmask 64512   ;;  %vm626_vm2 = vcmask 195584   ;;  %vm1083_vm3 = vcmask 523264   ;;  %s7875_s3 = inlined_call_operand.vmem [shape: bf16[8,64], index: 3, kind: input, shape index: {}]   ;;  %s7876_s1 = inlined_call_operand.vmem [shape: f32[512,8], index: 1, kind: input, shape index: {}]   ;;  %s7877_s2 = inlined_call_operand.vmem [shape: bf16[24,64], index: 2, kind: input, shape index: {}]   ;;  %s7878_s0 = inlined_call_operand.vmem [shape: f32[512,24], index: 0, kind: input, shape index: {}]   ;;  %s7879_s6 = inlined_call_operand.vmem [shape: f32[6,64], index: 6, kind: input, shape index: {}]   ;;  %s7880_s4 = inlined_call_operand.vmem [shape: bf16[64,64], index: 4, kind: input, shape index: {}]   ;;  %s7881_s5 = inlined_call_operand.vmem [shape: bf16[64,32], index: 5, kind: input, shape index: {}]   ;;  %s7882_s7 = inlined_call_operand.vmem [shape: f32[1,32], index: 7, kind: input, shape index: {}]   ;;  %s7883_s8 = inlined_call_operand.vmem [shape: f32[512,32], index: 8, kind: output, shape index: {}]  }
   0x1   :  { %v226_v0 = vld [vmem:[%s7875_s3] sm:$0xf]  ;;  %v128_v2 = vld [vmem:[%s7876_s1 + $0x8] sm:$0xff]  ;;  %v129_v5 = vld [vmem:[%s7876_s1 + $0x10] sm:$0xff]  ;;  %vm4058_vm4 = vcmask 261120  }
   0x2   :  { %v127_v1 = vld [vmem:[%s7876_s1] sm:$0xff]  ;;  %4747 = vmatprep.subr.msk.bf16.mxu0 %vm324_vm0, %v226_v0  ;;  %v326_v3 = vsel %vm324_vm0, %v226_v0, 0  ;;  %v130_v6 = vld [vmem:[%s7876_s1 + $0x18] sm:$0xff]  ;;  %v132_v10 = vld [vmem:[%s7876_s1 + $0x28] sm:$0xff] }
   0x3   :  { %v191_v4 = vpack.c.bf16 %v128_v2, %v127_v1  ;;  %4406 = vmatpush3.bf16.msra.mxu0 %v326_v3  ;;  %v192_v7 = vpack.c.bf16 %v130_v6, %v129_v5  ;;  %v4749_v8 = vld [vmem:[%s7877_s2] sm:$0xff]   ;;  %v133_v12 = vld [vmem:[%s7876_s1 + $0x30] sm:$0xff]  ;;  %v134_v13 = vld [vmem:[%s7876_s1 + $0x38] sm:$0xff] }
   0x4   :  { %v131_v9 = vld [vmem:[%s7876_s1 + $0x20] sm:$0xff]  ;;  %4471 = vmatprep.subr.bf16.mxu0 %v4749_v8  ;;  %v136_v15 = vld [vmem:[%s7876_s1 + $0x48] sm:$0xff]  ;;  %v194_v16 = vpack.c.bf16 %v134_v13, %v133_v12  ;;  %v137_v19 = vld [vmem:[%s7876_s1 + $0x50] sm:$0xff] }
   0x5   :  { %4407 = vmatprep.mubr.msk.bf16.mxu0 %vm227_vm1, %v191_v4  ;;  %v193_v11 = vpack.c.bf16 %v132_v10, %v131_v9  ;;  %v135_v14 = vld [vmem:[%s7876_s1 + $0x40] sm:$0xff]  ;;  %v4750_v18 = vld [vmem:[%s7877_s2 + $0x8] ss:$0 sps:$4 sm:$0xff]   ;;  %v138_v20 = vld [vmem:[%s7876_s1 + $0x58] sm:$0xff] }
   0x6   :  { %4408 = vmatmul.mubr.msk.bf16.vlgmr.msra.gmra.mrb[0].mxu0 %vm227_vm1, %v192_v7  ;;  %v195_v17 = vpack.c.bf16 %v136_v15, %v135_v14  ;;  %v139_v21 = vld [vmem:[%s7876_s1 + $0x60] sm:$0xff]  ;;  %v140_v22 = vld [vmem:[%s7876_s1 + $0x68] sm:$0xff]  ;;  %v724_v23 = vsel %vm324_vm0, %v4750_v18, 0  ;;  %v196_v24 = vpack.c.bf16 %v138_v20, %v137_v19  ;;  %v141_v26 = vld [vmem:[%s7876_s1 + $0x70] sm:$0xff] }
   0x7   :  { %4472 = vmatpush3.bf16.msra.mxu0 %v4749_v8  ;;  %4411 = vmatprep.mubr.msk.bf16.mxu0 %vm227_vm1, %v193_v11  ;;  %v197_v25 = vpack.c.bf16 %v140_v22, %v139_v21  ;;  %v142_v27 = vld [vmem:[%s7876_s1 + $0x78] sm:$0xff]  ;;  %v143_v28 = vld [vmem:[%s7876_s1 + $0x80] sm:$0xff]  ;;  %v144_v29 = vld [vmem:[%s7876_s1 + $0x88] sm:$0xff] }
   0x8   :  { %4748 = vmatprep.subr.msk.bf16.mxu0 %vm324_vm0, %v4750_v18  ;;  %v198_v30 = vpack.c.bf16 %v142_v27, %v141_v26  ;;  %v199_v31 = vpack.c.bf16 %v144_v29, %v143_v28  ;;  %v145_v32 = vld [vmem:[%s7876_s1 + $0x90] sm:$0xff]  ;;  %v146_v33 = vld [vmem:[%s7876_s1 + $0x98] sm:$0xff]  ;;  %v147_v34 = vld [vmem:[%s7876_s1 + $0xa0] sm:$0xff] }
   0x9   :  { %v148_v35 = vld [vmem:[%s7876_s1 + $0xa8] sm:$0xff]  ;;  %v200_v36 = vpack.c.bf16 %v146_v33, %v145_v32  ;;  %v149_v38 = vld [vmem:[%s7876_s1 + $0xb0] sm:$0xff]  ;;  %v150_v39 = vld [vmem:[%s7876_s1 + $0xb8] sm:$0xff] }
   0xa   :  { %v201_v37 = vpack.c.bf16 %v148_v35, %v147_v34  ;;  %v151_v40 = vld [vmem:[%s7876_s1 + $0xc0] sm:$0xff]  ;;  %v152_v41 = vld [vmem:[%s7876_s1 + $0xc8] sm:$0xff]  ;;  %v202_v42 = vpack.c.bf16 %v150_v39, %v149_v38  ;;  %v153_v44 = vld [vmem:[%s7876_s1 + $0xd0] sm:$0xff] }
   0xb   :  { %4474 = vmatpush3.bf16.msra.mxu0 %v724_v23  ;;  %v203_v43 = vpack.c.bf16 %v152_v41, %v151_v40  ;;  %v154_v45 = vld [vmem:[%s7876_s1 + $0xd8] sm:$0xff]  ;;  %v155_v46 = vld [vmem:[%s7876_s1 + $0xe0] sm:$0xff]  ;;  %v156_v47 = vld [vmem:[%s7876_s1 + $0xe8] sm:$0xff] }
   0xc   :  { %v204_v48 = vpack.c.bf16 %v154_v45, %v153_v44  ;;  %v205_v49 = vpack.c.bf16 %v156_v47, %v155_v46  ;;  %v157_v50 = vld [vmem:[%s7876_s1 + $0xf0] sm:$0xff]  ;;  %v158_v51 = vld [vmem:[%s7876_s1 + $0xf8] sm:$0xff]  ;;  %v159_v52 = vld [vmem:[%s7876_s1 + $0x100] sm:$0xff] }
   0xd   :  { %v160_v53 = vld [vmem:[%s7876_s1 + $0x108] sm:$0xff]  ;;  %v206_v54 = vpack.c.bf16 %v158_v51, %v157_v50  ;;  %v161_v56 = vld [vmem:[%s7876_s1 + $0x110] sm:$0xff]  ;;  %v162_v57 = vld [vmem:[%s7876_s1 + $0x118] sm:$0xff] }
   0xe   :  { %4412 = vmatmul.mubr.msk.bf16.gmra.mrb[4].mxu0 %vm227_vm1, %v194_v16  ;;  %v207_v55 = vpack.c.bf16 %v160_v53, %v159_v52  ;;  %v163_v58 = vld [vmem:[%s7876_s1 + $0x120] sm:$0xff]  ;;  %v164_v59 = vld [vmem:[%s7876_s1 + $0x128] sm:$0xff]  ;;  %v208_v60 = vpack.c.bf16 %v162_v57, %v161_v56  ;;  %v165_v62 = vld [vmem:[%s7876_s1 + $0x130] sm:$0xff] }
   0xf   :  { %4415 = vmatprep.mubr.msk.bf16.mxu0 %vm227_vm1, %v195_v17  ;;  %v209_v61 = vpack.c.bf16 %v164_v59, %v163_v58  ;;  %v166_v63 = vld [vmem:[%s7876_s1 + $0x138] sm:$0xff]  ;;  %v167_v0 = vld [vmem:[%s7876_s1 + $0x140] sm:$0xff]  ;;  %v168_v1 = vld [vmem:[%s7876_s1 + $0x148] sm:$0xff] }
  0x10   :  { %v210_v2 = vpack.c.bf16 %v166_v63, %v165_v62  ;;  %v211_v3 = vpack.c.bf16 %v168_v1, %v167_v0  ;;  %v169_v4 = vld [vmem:[%s7876_s1 + $0x150] sm:$0xff]  ;;  %v170_v5 = vld [vmem:[%s7876_s1 + $0x158] sm:$0xff]  ;;  %v171_v6 = vld [vmem:[%s7876_s1 + $0x160] sm:$0xff] }
  0x11   :  { %v172_v7 = vld [vmem:[%s7876_s1 + $0x168] sm:$0xff]  ;;  %v212_v8 = vpack.c.bf16 %v170_v5, %v169_v4  ;;  %v173_v10 = vld [vmem:[%s7876_s1 + $0x170] sm:$0xff]  ;;  %v174_v11 = vld [vmem:[%s7876_s1 + $0x178] sm:$0xff] }
  0x12   :  { %v213_v9 = vpack.c.bf16 %v172_v7, %v171_v6  ;;  %v175_v12 = vld [vmem:[%s7876_s1 + $0x180] sm:$0xff]  ;;  %v176_v13 = vld [vmem:[%s7876_s1 + $0x188] sm:$0xff]  ;;  %v214_v14 = vpack.c.bf16 %v174_v11, %v173_v10  ;;  %v177_v16 = vld [vmem:[%s7876_s1 + $0x190] sm:$0xff] }
  0x13   :  { %v215_v15 = vpack.c.bf16 %v176_v13, %v175_v12  ;;  %v178_v17 = vld [vmem:[%s7876_s1 + $0x198] sm:$0xff]  ;;  %v179_v18 = vld [vmem:[%s7876_s1 + $0x1a0] sm:$0xff]  ;;  %v180_v19 = vld [vmem:[%s7876_s1 + $0x1a8] sm:$0xff] }
  0x14   :  { %v216_v20 = vpack.c.bf16 %v178_v17, %v177_v16  ;;  %v217_v21 = vpack.c.bf16 %v180_v19, %v179_v18  ;;  %v181_v22 = vld [vmem:[%s7876_s1 + $0x1b0] sm:$0xff]  ;;  %v182_v23 = vld [vmem:[%s7876_s1 + $0x1b8] sm:$0xff] }
  0x15   :  { %v218_v26 = vpack.c.bf16 %v182_v23, %v181_v22  ;;  %v185_v28 = vld [vmem:[%s7876_s1 + $0x1d0] sm:$0xff]  ;;  %v186_v29 = vld [vmem:[%s7876_s1 + $0x1d8] sm:$0xff] }
  0x16   :  { %4416 = vmatmul.mubr.msk.bf16.gmra.mrb[8].mxu0 %vm227_vm1, %v196_v24  ;;  %v183_v24 = vld [vmem:[%s7876_s1 + $0x1c0] sm:$0xff]  ;;  %v220_v32 = vpack.c.bf16 %v186_v29, %v185_v28  ;;  %v189_v34 = vld [vmem:[%s7876_s1 + $0x1f0] sm:$0xff]  ;;  %v190_v35 = vld [vmem:[%s7876_s1 + $0x1f8] sm:$0xff] }
  0x17   :  { %4419 = vmatprep.mubr.msk.bf16.mxu0 %vm227_vm1, %v197_v25  ;;  %v184_v25 = vld [vmem:[%s7876_s1 + $0x1c8] sm:$0xff]  ;;  %v222_v38 = vpack.c.bf16 %v190_v35, %v189_v34  ;;  %v33_v40 = vld [vmem:[%s7878_s0 + $0x10] sm:$0xff]  ;;  %v34_v41 = vld [vmem:[%s7878_s0 + $0x18] sm:$0xff] }
  0x18   :  { %v219_v27 = vpack.c.bf16 %v184_v25, %v183_v24  ;;  %v96_v44 = vpack.c.bf16 %v34_v41, %v33_v40  ;;  %v37_v46 = vld [vmem:[%s7878_s0 + $0x30] sm:$0xff]  ;;  %v38_v47 = vld [vmem:[%s7878_s0 + $0x38] sm:$0xff] }
  0x19   :  { %v98_v50 = vpack.c.bf16 %v38_v47, %v37_v46  ;;  %v41_v52 = vld [vmem:[%s7878_s0 + $0x50] sm:$0xff]  ;;  %v42_v53 = vld [vmem:[%s7878_s0 + $0x58] sm:$0xff] }
  0x1a   :  { %v100_v56 = vpack.c.bf16 %v42_v53, %v41_v52  ;;  %v45_v58 = vld [vmem:[%s7878_s0 + $0x70] sm:$0xff]  ;;  %v46_v59 = vld [vmem:[%s7878_s0 + $0x78] sm:$0xff] }
  0x1b   :  { %v102_v62 = vpack.c.bf16 %v46_v59, %v45_v58  ;;  %v49_v0 = vld [vmem:[%s7878_s0 + $0x90] sm:$0xff]  ;;  %v50_v1 = vld [vmem:[%s7878_s0 + $0x98] sm:$0xff] }
  0x1c   :  { %v104_v4 = vpack.c.bf16 %v50_v1, %v49_v0  ;;  %v53_v6 = vld [vmem:[%s7878_s0 + $0xb0] sm:$0xff]  ;;  %v54_v7 = vld [vmem:[%s7878_s0 + $0xb8] sm:$0xff] }
  0x1d   :  { %v106_v10 = vpack.c.bf16 %v54_v7, %v53_v6  ;;  %v57_v12 = vld [vmem:[%s7878_s0 + $0xd0] sm:$0xff]  ;;  %v58_v13 = vld [vmem:[%s7878_s0 + $0xd8] sm:$0xff] }
  0x1e   :  { %4420 = vmatmul.mubr.msk.bf16.gmra.mrb[12].mxu0 %vm227_vm1, %v198_v30  ;;  %v187_v30 = vld [vmem:[%s7876_s1 + $0x1e0] sm:$0xff]  ;;  %v108_v16 = vpack.c.bf16 %v58_v13, %v57_v12  ;;  %v61_v18 = vld [vmem:[%s7878_s0 + $0xf0] sm:$0xff]  ;;  %v62_v19 = vld [vmem:[%s7878_s0 + $0xf8] sm:$0xff] }
  0x1f   :  { %4423 = vmatprep.mubr.msk.bf16.mxu0 %vm227_vm1, %v199_v31  ;;  %v188_v31 = vld [vmem:[%s7876_s1 + $0x1e8] sm:$0xff]  ;;  %v110_v22 = vpack.c.bf16 %v62_v19, %v61_v18  ;;  %v65_v24 = vld [vmem:[%s7878_s0 + $0x110] sm:$0xff]  ;;  %v66_v25 = vld [vmem:[%s7878_s0 + $0x118] sm:$0xff] }
  0x20   :  { %v221_v33 = vpack.c.bf16 %v188_v31, %v187_v30  ;;  %v112_v28 = vpack.c.bf16 %v66_v25, %v65_v24  ;;  %v69_v30 = vld [vmem:[%s7878_s0 + $0x130] sm:$0xff]  ;;  %v70_v31 = vld [vmem:[%s7878_s0 + $0x138] sm:$0xff] }
  0x21   :  { %v114_v34 = vpack.c.bf16 %v70_v31, %v69_v30 }
  0x26   :  { %4424 = vmatmul.mubr.msk.bf16.gmra.mrb[16].mxu0 %vm227_vm1, %v200_v36  ;;  %v31_v36 = vld [vmem:[%s7878_s0] sm:$0xff] }
  0x27   :  { %4427 = vmatprep.mubr.msk.bf16.mxu0 %vm227_vm1, %v201_v37  ;;  %v32_v37 = vld [vmem:[%s7878_s0 + $0x8] sm:$0xff] }
  0x28   :  { %v95_v39 = vpack.c.bf16 %v32_v37, %v31_v36  ;;  %v73_v36 = vld [vmem:[%s7878_s0 + $0x150] sm:$0xff]  ;;  %v74_v37 = vld [vmem:[%s7878_s0 + $0x158] sm:$0xff] }
  0x29   :  { %v116_v40 = vpack.c.bf16 %v74_v37, %v73_v36 }
  0x2e   :  { %4428 = vmatmul.mubr.msk.bf16.gmra.mrb[20].mxu0 %vm227_vm1, %v202_v42  ;;  %v35_v42 = vld [vmem:[%s7878_s0 + $0x20] sm:$0xff] }
  0x2f   :  { %4431 = vmatprep.mubr.msk.bf16.mxu0 %vm227_vm1, %v203_v43  ;;  %v36_v43 = vld [vmem:[%s7878_s0 + $0x28] sm:$0xff] }
  0x30   :  { %v97_v45 = vpack.c.bf16 %v36_v43, %v35_v42  ;;  %v77_v42 = vld [vmem:[%s7878_s0 + $0x170] sm:$0xff]  ;;  %v78_v43 = vld [vmem:[%s7878_s0 + $0x178] sm:$0xff] }
  0x31   :  { %v118_v46 = vpack.c.bf16 %v78_v43, %v77_v42 }
  0x36   :  { %4432 = vmatmul.mubr.msk.bf16.gmra.mrb[24].mxu0 %vm227_vm1, %v204_v48  ;;  %v39_v48 = vld [vmem:[%s7878_s0 + $0x40] sm:$0xff] }
  0x37   :  { %4435 = vmatprep.mubr.msk.bf16.mxu0 %vm227_vm1, %v205_v49  ;;  %v40_v49 = vld [vmem:[%s7878_s0 + $0x48] sm:$0xff] }
  0x38   :  { %v99_v51 = vpack.c.bf16 %v40_v49, %v39_v48  ;;  %v81_v48 = vld [vmem:[%s7878_s0 + $0x190] sm:$0xff]  ;;  %v82_v49 = vld [vmem:[%s7878_s0 + $0x198] sm:$0xff] }
  0x39   :  { %v120_v52 = vpack.c.bf16 %v82_v49, %v81_v48 }
  0x3e   :  { %4436 = vmatmul.mubr.msk.bf16.gmra.mrb[28].mxu0 %vm227_vm1, %v206_v54  ;;  %v43_v54 = vld [vmem:[%s7878_s0 + $0x60] sm:$0xff] }
  0x3f   :  { %4439 = vmatprep.mubr.msk.bf16.mxu0 %vm227_vm1, %v207_v55  ;;  %v44_v55 = vld [vmem:[%s7878_s0 + $0x68] sm:$0xff] }
  0x40   :  { %v101_v57 = vpack.c.bf16 %v44_v55, %v43_v54  ;;  %v85_v54 = vld [vmem:[%s7878_s0 + $0x1b0] sm:$0xff]  ;;  %v86_v55 = vld [vmem:[%s7878_s0 + $0x1b8] sm:$0xff] }
  0x41   :  { %v122_v58 = vpack.c.bf16 %v86_v55, %v85_v54 }
  0x46   :  { %4440 = vmatmul.mubr.msk.bf16.gmra.mrb[32].mxu0 %vm227_vm1, %v208_v60  ;;  %v47_v60 = vld [vmem:[%s7878_s0 + $0x80] sm:$0xff] }
  0x47   :  { %4443 = vmatprep.mubr.msk.bf16.mxu0 %vm227_vm1, %v209_v61  ;;  %v48_v61 = vld [vmem:[%s7878_s0 + $0x88] sm:$0xff] }
  0x48   :  { %v103_v63 = vpack.c.bf16 %v48_v61, %v47_v60  ;;  %v89_v60 = vld [vmem:[%s7878_s0 + $0x1d0] sm:$0xff]  ;;  %v90_v61 = vld [vmem:[%s7878_s0 + $0x1d8] sm:$0xff] }
  0x49   :  { %v124_v0 = vpack.c.bf16 %v90_v61, %v89_v60 }
  0x4e   :  { %4444 = vmatmul.mubr.msk.bf16.gmra.mrb[36].mxu0 %vm227_vm1, %v210_v2  ;;  %v51_v2 = vld [vmem:[%s7878_s0 + $0xa0] sm:$0xff] }
  0x4f   :  { %4447 = vmatprep.mubr.msk.bf16.mxu0 %vm227_vm1, %v211_v3  ;;  %v52_v3 = vld [vmem:[%s7878_s0 + $0xa8] sm:$0xff] }
  0x50   :  { %v105_v5 = vpack.c.bf16 %v52_v3, %v51_v2  ;;  %v93_v2 = vld [vmem:[%s7878_s0 + $0x1f0] sm:$0xff]  ;;  %v94_v3 = vld [vmem:[%s7878_s0 + $0x1f8] sm:$0xff] }
  0x56   :  { %4448 = vmatmul.mubr.msk.bf16.gmra.mrb[40].mxu0 %vm227_vm1, %v212_v8  ;;  %v55_v8 = vld [vmem:[%s7878_s0 + $0xc0] sm:$0xff] }
  0x57   :  { %4451 = vmatprep.mubr.msk.bf16.mxu0 %vm227_vm1, %v213_v9  ;;  %v56_v9 = vld [vmem:[%s7878_s0 + $0xc8] sm:$0xff] }
  0x58   :  { %v107_v11 = vpack.c.bf16 %v56_v9, %v55_v8  ;;  %v30_v8 = vld [vmem:[%s7879_s6] sm:$0x3f] }
  0x5e   :  { %4452 = vmatmul.mubr.msk.bf16.gmra.mrb[44].mxu0 %vm227_vm1, %v214_v14  ;;  %v59_v14 = vld [vmem:[%s7878_s0 + $0xe0] sm:$0xff] }
  0x5f   :  { %4455 = vmatprep.mubr.msk.bf16.mxu0 %vm227_vm1, %v215_v15  ;;  %v60_v15 = vld [vmem:[%s7878_s0 + $0xe8] sm:$0xff] }
  0x60   :  { %v109_v17 = vpack.c.bf16 %v60_v15, %v59_v14 }
  0x66   :  { %4456 = vmatmul.mubr.msk.bf16.gmra.mrb[48].mxu0 %vm227_vm1, %v216_v20  ;;  %v63_v20 = vld [vmem:[%s7878_s0 + $0x100] sm:$0xff] }
  0x67   :  { %4459 = vmatprep.mubr.msk.bf16.mxu0 %vm227_vm1, %v217_v21  ;;  %v64_v21 = vld [vmem:[%s7878_s0 + $0x108] sm:$0xff] }
  0x68   :  { %v111_v23 = vpack.c.bf16 %v64_v21, %v63_v20 }
  0x6e   :  { %4460 = vmatmul.mubr.msk.bf16.gmra.mrb[52].mxu0 %vm227_vm1, %v218_v26  ;;  %v67_v26 = vld [vmem:[%s7878_s0 + $0x120] sm:$0xff] }
  0x6f   :  { %4463 = vmatprep.mubr.msk.bf16.mxu0 %vm227_vm1, %v219_v27  ;;  %v68_v27 = vld [vmem:[%s7878_s0 + $0x128] sm:$0xff] }
  0x70   :  { %v113_v29 = vpack.c.bf16 %v68_v27, %v67_v26 }
  0x76   :  { %4464 = vmatmul.mubr.msk.bf16.gmra.mrb[56].mxu0 %vm227_vm1, %v220_v32  ;;  %v71_v32 = vld [vmem:[%s7878_s0 + $0x140] sm:$0xff] }
  0x77   :  { %4467 = vmatprep.mubr.msk.bf16.mxu0 %vm227_vm1, %v221_v33  ;;  %v72_v33 = vld [vmem:[%s7878_s0 + $0x148] sm:$0xff] }
  0x78   :  { %v115_v35 = vpack.c.bf16 %v72_v33, %v71_v32 }
  0x7e   :  { %4468 = vmatmul.mubr.msk.bf16.gmra.mrb[60].mxu0 %vm227_vm1, %v222_v38  ;;  %v75_v38 = vld [vmem:[%s7878_s0 + $0x160] sm:$0xff] }
  0x7f   :  { %4475 = vmatprep.mubr.msk.bf16.mxu0 %vm626_vm2, %v95_v39  ;;  %v76_v39 = vld [vmem:[%s7878_s0 + $0x168] sm:$0xff] }
  0x80   :  { %v117_v41 = vpack.c.bf16 %v76_v39, %v75_v38 }
  0x86   :  { %4476 = vmatmul.mubr.msk.bf16.vlgmr.msra.gmra.mrb[0].mxu0 %vm626_vm2, %v96_v44  ;;  %v79_v44 = vld [vmem:[%s7878_s0 + $0x180] sm:$0xff] }
  0x87   :  { %4479 = vmatprep.mubr.msk.bf16.mxu0 %vm626_vm2, %v97_v45  ;;  %v80_v45 = vld [vmem:[%s7878_s0 + $0x188] sm:$0xff] }
  0x88   :  { %v119_v47 = vpack.c.bf16 %v80_v45, %v79_v44 }
  0x8e   :  { %4480 = vmatmul.mubr.msk.bf16.gmra.mrb[4].mxu0 %vm626_vm2, %v98_v50  ;;  %v83_v50 = vld [vmem:[%s7878_s0 + $0x1a0] sm:$0xff] }
  0x8f   :  { %4483 = vmatprep.mubr.msk.bf16.mxu0 %vm626_vm2, %v99_v51  ;;  %v84_v51 = vld [vmem:[%s7878_s0 + $0x1a8] sm:$0xff] }
  0x90   :  { %v121_v53 = vpack.c.bf16 %v84_v51, %v83_v50 }
  0x96   :  { %4484 = vmatmul.mubr.msk.bf16.gmra.mrb[8].mxu0 %vm626_vm2, %v100_v56  ;;  %v87_v56 = vld [vmem:[%s7878_s0 + $0x1c0] sm:$0xff] }
  0x97   :  { %4487 = vmatprep.mubr.msk.bf16.mxu0 %vm626_vm2, %v101_v57  ;;  %v88_v57 = vld [vmem:[%s7878_s0 + $0x1c8] sm:$0xff] }
  0x98   :  { %v123_v59 = vpack.c.bf16 %v88_v57, %v87_v56 }
  0x9e   :  { %4488 = vmatmul.mubr.msk.bf16.gmra.mrb[12].mxu0 %vm626_vm2, %v102_v62  ;;  %v91_v62 = vld [vmem:[%s7878_s0 + $0x1e0] sm:$0xff] }
  0x9f   :  { %4491 = vmatprep.mubr.msk.bf16.mxu0 %vm626_vm2, %v103_v63  ;;  %v92_v63 = vld [vmem:[%s7878_s0 + $0x1e8] sm:$0xff] }
  0xa0   :  { %v125_v1 = vpack.c.bf16 %v92_v63, %v91_v62 }
  0xa6   :  { %4492 = vmatmul.mubr.msk.bf16.gmra.mrb[16].mxu0 %vm626_vm2, %v104_v4  ;;  %v126_v4 = vpack.c.bf16 %v94_v3, %v93_v2 }
  0xa7   :  { %4495 = vmatprep.mubr.msk.bf16.mxu0 %vm626_vm2, %v105_v5  ;;  %v1015_v5 = vlaneseq }
  0xa9   :  { %v5524_v6 = vshrl.u32 %v1015_v5, 7 }
  0xab   :  { %7976 = vst [vmem:[#allocation2_spill] sm:$0xff] %v5524_v6  ;;  %v1017_v7 = vsub.s32 0, %v5524_v6 }
  0xad   :  { %v5530_v9 = vrot.slane %v30_v8, %v1017_v7 }
  0xae   :  { %4496 = vmatmul.mubr.msk.bf16.gmra.mrb[20].mxu0 %vm626_vm2, %v106_v10 }
  0xaf   :  { %4499 = vmatprep.mubr.msk.bf16.mxu0 %vm626_vm2, %v107_v11 }
  0xb6   :  { %4500 = vmatmul.mubr.msk.bf16.gmra.mrb[24].mxu0 %vm626_vm2, %v108_v16 }
  0xb7   :  { %4503 = vmatprep.mubr.msk.bf16.mxu0 %vm626_vm2, %v109_v17 }
  0xbe   :  { %4504 = vmatmul.mubr.msk.bf16.gmra.mrb[28].mxu0 %vm626_vm2, %v110_v22 }
  0xbf   :  { %4507 = vmatprep.mubr.msk.bf16.mxu0 %vm626_vm2, %v111_v23 }
  0xc6   :  { %4508 = vmatmul.mubr.msk.bf16.gmra.mrb[32].mxu0 %vm626_vm2, %v112_v28 }
  0xc7   :  { %4511 = vmatprep.mubr.msk.bf16.mxu0 %vm626_vm2, %v113_v29 }
  0xce   :  { %4512 = vmatmul.mubr.msk.bf16.gmra.mrb[36].mxu0 %vm626_vm2, %v114_v34 }
  0xcf   :  { %4515 = vmatprep.mubr.msk.bf16.mxu0 %vm626_vm2, %v115_v35 }
  0xd6   :  { %4516 = vmatmul.mubr.msk.bf16.gmra.mrb[40].mxu0 %vm626_vm2, %v116_v40 }
  0xd7   :  { %4519 = vmatprep.mubr.msk.bf16.mxu0 %vm626_vm2, %v117_v41 }
  0xde   :  { %4520 = vmatmul.mubr.msk.bf16.gmra.mrb[44].mxu0 %vm626_vm2, %v118_v46 }
  0xdf   :  { %4523 = vmatprep.mubr.msk.bf16.mxu0 %vm626_vm2, %v119_v47 }
  0xe6   :  { %4524 = vmatmul.mubr.msk.bf16.gmra.mrb[48].mxu0 %vm626_vm2, %v120_v52 }
  0xe7   :  { %4527 = vmatprep.mubr.msk.bf16.mxu0 %vm626_vm2, %v121_v53 }
  0xee   :  { %4528 = vmatmul.mubr.msk.bf16.gmra.mrb[52].mxu0 %vm626_vm2, %v122_v58 }
  0xef   :  { %4531 = vmatprep.mubr.msk.bf16.mxu0 %vm626_vm2, %v123_v59 }
  0xf6   :  { %4532 = vmatmul.mubr.msk.bf16.gmra.mrb[56].mxu0 %vm626_vm2, %v124_v0 }
  0xf7   :  { %4535 = vmatprep.mubr.msk.bf16.mxu0 %vm626_vm2, %v125_v1 }
  0xfe   :  { %4536 = vmatmul.mubr.msk.bf16.gmra.mrb[60].mxu0 %vm626_vm2, %v126_v4 }
 0x159   :  { %v4477_v10 = vpop.f32.mrb[0].mxu0 }
 0x15a   :  { %v5533_v11 = vadd.f32 %v4477_v10, %v5530_v9  ;;  %v760_v12 = vpop.f32.mrb[1].mxu0 }
 0x15b   :  { %v5536_v13 = vadd.f32 %v5530_v9, %v760_v12  ;;  %v4478_v14 = vpop.f32.mrb[2].mxu0 }
 0x15c   :  { %v5539_v15 = vadd.f32 %v4478_v14, %v5530_v9  ;;  %v763_v16 = vpop.f32.mrb[3].mxu0  ;;  %v1090_v17 = vsel %vm1083_vm3, %v5533_v11, 0.0 }
 0x15d   :  { %v5544_v18 = vadd.f32 %v5530_v9, %v763_v16  ;;  %1091 = vadd.xlane.f32.xlu1 %v1090_v17  ;;  %v1084_v19 = vsel %vm1083_vm3, %v5536_v13, 0.0 }
 0x15e   :  { %1085 = vadd.xlane.f32.xlu0 %v1084_v19  ;;  %v1093_v20 = vsel %vm1083_vm3, %v5539_v15, 0.0 }
 0x15f   :  { %v1087_v22 = vsel %vm1083_vm3, %v5544_v18, 0.0 }
 0x161   :  { %1094 = vadd.xlane.f32.xlu1 %v1093_v20  ;;  %v4481_v21 = vpop.f32.mrb[4].mxu0 }
 0x162   :  { %v5553_v23 = vadd.f32 %v4481_v21, %v5530_v9  ;;  %1088 = vadd.xlane.f32.xlu0 %v1087_v22  ;;  %v776_v24 = vpop.f32.mrb[5].mxu0 }
 0x163   :  { %v4482_v25 = vpop.f32.mrb[6].mxu0  ;;  %v5561_v29 = vadd.f32 %v5530_v9, %v776_v24 }
 0x164   :  { %v5556_v26 = vadd.f32 %v4482_v25, %v5530_v9  ;;  %v779_v27 = vpop.f32.mrb[7].mxu0  ;;  %v1102_v28 = vsel %vm1083_vm3, %v5553_v23, 0.0 }
 0x165   :  { %v5564_v30 = vadd.f32 %v5530_v9, %v779_v27  ;;  %v1096_v33 = vsel %vm1083_vm3, %v5561_v29, 0.0 }
 0x166   :  { %1103 = vadd.xlane.f32.xlu0 %v1102_v28  ;;  %v1105_v31 = vsel %vm1083_vm3, %v5556_v26, 0.0 }
 0x167   :  { %1106 = vadd.xlane.f32.xlu1 %v1105_v31  ;;  %v1099_v36 = vsel %vm1083_vm3, %v5564_v30, 0.0 }
 0x169   :  { %v4485_v32 = vpop.f32.mrb[8].mxu0 }
 0x16a   :  { %v5571_v34 = vadd.f32 %v4485_v32, %v5530_v9  ;;  %1097 = vadd.xlane.f32.xlu0 %v1096_v33  ;;  %v792_v35 = vpop.f32.mrb[9].mxu0 }
 0x16b   :  { %1100 = vadd.xlane.f32.xlu1 %v1099_v36  ;;  %v4486_v37 = vpop.f32.mrb[10].mxu0  ;;  %v5581_v41 = vadd.f32 %v5530_v9, %v792_v35 }
 0x16c   :  { %v5576_v38 = vadd.f32 %v4486_v37, %v5530_v9  ;;  %v795_v39 = vpop.f32.mrb[11].mxu0  ;;  %v1114_v40 = vsel %vm1083_vm3, %v5571_v34, 0.0 }
 0x16d   :  { %v5584_v42 = vadd.f32 %v5530_v9, %v795_v39  ;;  %v1108_v45 = vsel %vm1083_vm3, %v5581_v41, 0.0 }
 0x16e   :  { %1115 = vadd.xlane.f32.xlu0 %v1114_v40  ;;  %v1117_v43 = vsel %vm1083_vm3, %v5576_v38, 0.0 }
 0x16f   :  { %1118 = vadd.xlane.f32.xlu1 %v1117_v43  ;;  %v1111_v48 = vsel %vm1083_vm3, %v5584_v42, 0.0 }
 0x171   :  { %v4489_v44 = vpop.f32.mrb[12].mxu0 }
 0x172   :  { %v5591_v46 = vadd.f32 %v4489_v44, %v5530_v9  ;;  %1109 = vadd.xlane.f32.xlu0 %v1108_v45  ;;  %v808_v47 = vpop.f32.mrb[13].mxu0 }
 0x173   :  { %1112 = vadd.xlane.f32.xlu1 %v1111_v48  ;;  %v4490_v49 = vpop.f32.mrb[14].mxu0  ;;  %v5601_v53 = vadd.f32 %v5530_v9, %v808_v47 }
 0x174   :  { %v5596_v50 = vadd.f32 %v4490_v49, %v5530_v9  ;;  %v811_v51 = vpop.f32.mrb[15].mxu0  ;;  %v1126_v52 = vsel %vm1083_vm3, %v5591_v46, 0.0 }
 0x175   :  { %v5604_v54 = vadd.f32 %v5530_v9, %v811_v51  ;;  %v1120_v57 = vsel %vm1083_vm3, %v5601_v53, 0.0 }
 0x176   :  { %1127 = vadd.xlane.f32.xlu0 %v1126_v52  ;;  %v1129_v55 = vsel %vm1083_vm3, %v5596_v50, 0.0 }
 0x177   :  { %1130 = vadd.xlane.f32.xlu1 %v1129_v55  ;;  %v1123_v60 = vsel %vm1083_vm3, %v5604_v54, 0.0 }
 0x179   :  { %v4493_v56 = vpop.f32.mrb[16].mxu0 }
 0x17a   :  { %v5611_v58 = vadd.f32 %v4493_v56, %v5530_v9  ;;  %1121 = vadd.xlane.f32.xlu0 %v1120_v57  ;;  %v824_v59 = vpop.f32.mrb[17].mxu0 }
 0x17b   :  { %1124 = vadd.xlane.f32.xlu1 %v1123_v60  ;;  %v4494_v61 = vpop.f32.mrb[18].mxu0  ;;  %v5621_v1 = vadd.f32 %v5530_v9, %v824_v59 }
 0x17c   :  { %v5616_v62 = vadd.f32 %v4494_v61, %v5530_v9  ;;  %v827_v63 = vpop.f32.mrb[19].mxu0  ;;  %v1138_v0 = vsel %vm1083_vm3, %v5611_v58, 0.0 }
 0x17d   :  { %v5624_v2 = vadd.f32 %v5530_v9, %v827_v63  ;;  %v1132_v5 = vsel %vm1083_vm3, %v5621_v1, 0.0 }
 0x17e   :  { %1139 = vadd.xlane.f32.xlu0 %v1138_v0  ;;  %v1141_v3 = vsel %vm1083_vm3, %v5616_v62, 0.0 }
 0x17f   :  { %1142 = vadd.xlane.f32.xlu1 %v1141_v3  ;;  %v1135_v10 = vsel %vm1083_vm3, %v5624_v2, 0.0 }
 0x181   :  { %v4497_v4 = vpop.f32.mrb[20].mxu0 }
 0x182   :  { %v5631_v7 = vadd.f32 %v4497_v4, %v5530_v9  ;;  %1133 = vadd.xlane.f32.xlu0 %v1132_v5  ;;  %v840_v8 = vpop.f32.mrb[21].mxu0 }
 0x183   :  { %1136 = vadd.xlane.f32.xlu1 %v1135_v10  ;;  %v4498_v12 = vpop.f32.mrb[22].mxu0  ;;  %v5641_v19 = vadd.f32 %v5530_v9, %v840_v8 }
 0x184   :  { %v5636_v14 = vadd.f32 %v4498_v12, %v5530_v9  ;;  %v843_v16 = vpop.f32.mrb[23].mxu0  ;;  %v1150_v17 = vsel %vm1083_vm3, %v5631_v7, 0.0 }
 0x185   :  { %v5644_v20 = vadd.f32 %v5530_v9, %v843_v16  ;;  %v1144_v24 = vsel %vm1083_vm3, %v5641_v19, 0.0 }
 0x186   :  { %1151 = vadd.xlane.f32.xlu0 %v1150_v17  ;;  %v1153_v21 = vsel %vm1083_vm3, %v5636_v14, 0.0 }
 0x187   :  { %1154 = vadd.xlane.f32.xlu1 %v1153_v21  ;;  %v1147_v28 = vsel %vm1083_vm3, %v5644_v20, 0.0 }
 0x189   :  { %v4501_v22 = vpop.f32.mrb[24].mxu0 }
 0x18a   :  { %v5651_v25 = vadd.f32 %v4501_v22, %v5530_v9  ;;  %1145 = vadd.xlane.f32.xlu0 %v1144_v24  ;;  %v856_v27 = vpop.f32.mrb[25].mxu0 }
 0x18b   :  { %1148 = vadd.xlane.f32.xlu1 %v1147_v28  ;;  %v4502_v31 = vpop.f32.mrb[26].mxu0  ;;  %v5661_v36 = vadd.f32 %v5530_v9, %v856_v27 }
 0x18c   :  { %v5656_v32 = vadd.f32 %v4502_v31, %v5530_v9  ;;  %v859_v33 = vpop.f32.mrb[27].mxu0  ;;  %v1162_v35 = vsel %vm1083_vm3, %v5651_v25, 0.0 }
 0x18d   :  { %v5664_v37 = vadd.f32 %v5530_v9, %v859_v33  ;;  %v1156_v43 = vsel %vm1083_vm3, %v5661_v36, 0.0 }
 0x18e   :  { %1163 = vadd.xlane.f32.xlu0 %v1162_v35  ;;  %v1165_v39 = vsel %vm1083_vm3, %v5656_v32, 0.0 }
 0x18f   :  { %1166 = vadd.xlane.f32.xlu1 %v1165_v39  ;;  %v1159_v47 = vsel %vm1083_vm3, %v5664_v37, 0.0 }
 0x191   :  { %v4505_v40 = vpop.f32.mrb[28].mxu0 }
 0x192   :  { %v5671_v44 = vadd.f32 %v4505_v40, %v5530_v9  ;;  %1157 = vadd.xlane.f32.xlu0 %v1156_v43  ;;  %v872_v45 = vpop.f32.mrb[29].mxu0 }
 0x193   :  { %1160 = vadd.xlane.f32.xlu1 %v1159_v47  ;;  %v4506_v48 = vpop.f32.mrb[30].mxu0  ;;  %v5681_v55 = vadd.f32 %v5530_v9, %v872_v45 }
 0x194   :  { %v5676_v49 = vadd.f32 %v4506_v48, %v5530_v9  ;;  %v875_v51 = vpop.f32.mrb[31].mxu0  ;;  %v1174_v52 = vsel %vm1083_vm3, %v5671_v44, 0.0 }
 0x195   :  { %v5684_v56 = vadd.f32 %v5530_v9, %v875_v51  ;;  %v1168_v60 = vsel %vm1083_vm3, %v5681_v55, 0.0 }
 0x196   :  { %1175 = vadd.xlane.f32.xlu0 %v1174_v52  ;;  %v1177_v57 = vsel %vm1083_vm3, %v5676_v49, 0.0 }
 0x197   :  { %1178 = vadd.xlane.f32.xlu1 %v1177_v57  ;;  %v1171_v0 = vsel %vm1083_vm3, %v5684_v56, 0.0 }
 0x199   :  { %v4509_v59 = vpop.f32.mrb[32].mxu0 }
 0x19a   :  { %v5691_v61 = vadd.f32 %v4509_v59, %v5530_v9  ;;  %1169 = vadd.xlane.f32.xlu0 %v1168_v60  ;;  %v888_v63 = vpop.f32.mrb[33].mxu0 }
 0x19b   :  { %1172 = vadd.xlane.f32.xlu1 %v1171_v0  ;;  %v4510_v3 = vpop.f32.mrb[34].mxu0  ;;  %v5701_v10 = vadd.f32 %v5530_v9, %v888_v63 }
 0x19c   :  { %v5696_v4 = vadd.f32 %v4510_v3, %v5530_v9  ;;  %v891_v5 = vpop.f32.mrb[35].mxu0  ;;  %v1186_v8 = vsel %vm1083_vm3, %v5691_v61, 0.0 }
 0x19d   :  { %v5704_v12 = vadd.f32 %v5530_v9, %v891_v5  ;;  %v1180_v21 = vsel %vm1083_vm3, %v5701_v10, 0.0 }
 0x19e   :  { %1187 = vadd.xlane.f32.xlu0 %v1186_v8  ;;  %v1189_v16 = vsel %vm1083_vm3, %v5696_v4, 0.0 }
 0x19f   :  { %1190 = vadd.xlane.f32.xlu1 %v1189_v16  ;;  %v1183_v27 = vsel %vm1083_vm3, %v5704_v12, 0.0 }
 0x1a1   :  { %v4513_v17 = vpop.f32.mrb[36].mxu0 }
 0x1a2   :  { %v5711_v22 = vadd.f32 %v4513_v17, %v5530_v9  ;;  %1181 = vadd.xlane.f32.xlu0 %v1180_v21  ;;  %v904_v24 = vpop.f32.mrb[37].mxu0 }
 0x1a3   :  { %1184 = vadd.xlane.f32.xlu1 %v1183_v27  ;;  %v4514_v28 = vpop.f32.mrb[38].mxu0  ;;  %v5721_v39 = vadd.f32 %v5530_v9, %v904_v24 }
 0x1a4   :  { %v5716_v31 = vadd.f32 %v4514_v28, %v5530_v9  ;;  %v907_v33 = vpop.f32.mrb[39].mxu0  ;;  %v1198_v35 = vsel %vm1083_vm3, %v5711_v22, 0.0 }
 0x1a5   :  { %v5724_v40 = vadd.f32 %v5530_v9, %v907_v33  ;;  %v1192_v47 = vsel %vm1083_vm3, %v5721_v39, 0.0 }
 0x1a6   :  { %1199 = vadd.xlane.f32.xlu0 %v1198_v35  ;;  %v1201_v43 = vsel %vm1083_vm3, %v5716_v31, 0.0 }
 0x1a7   :  { %1202 = vadd.xlane.f32.xlu1 %v1201_v43  ;;  %v1195_v52 = vsel %vm1083_vm3, %v5724_v40, 0.0 }
 0x1a9   :  { %v4517_v45 = vpop.f32.mrb[40].mxu0 }
 0x1aa   :  { %v5731_v48 = vadd.f32 %v4517_v45, %v5530_v9  ;;  %1193 = vadd.xlane.f32.xlu0 %v1192_v47  ;;  %v920_v51 = vpop.f32.mrb[41].mxu0 }
 0x1ab   :  { %1196 = vadd.xlane.f32.xlu1 %v1195_v52  ;;  %v4518_v57 = vpop.f32.mrb[42].mxu0  ;;  %v5741_v0 = vadd.f32 %v5530_v9, %v920_v51 }
 0x1ac   :  { %v5736_v59 = vadd.f32 %v4518_v57, %v5530_v9  ;;  %v923_v60 = vpop.f32.mrb[43].mxu0  ;;  %v1210_v63 = vsel %vm1083_vm3, %v5731_v48, 0.0 }
 0x1ad   :  { %v5744_v3 = vadd.f32 %v5530_v9, %v923_v60  ;;  %v1204_v16 = vsel %vm1083_vm3, %v5741_v0, 0.0 }
 0x1ae   :  { %1211 = vadd.xlane.f32.xlu0 %v1210_v63  ;;  %v1213_v5 = vsel %vm1083_vm3, %v5736_v59, 0.0 }
 0x1af   :  { %1214 = vadd.xlane.f32.xlu1 %v1213_v5  ;;  %v1207_v24 = vsel %vm1083_vm3, %v5744_v3, 0.0 }
 0x1b1   :  { %v4521_v8 = vpop.f32.mrb[44].mxu0 }
 0x1b2   :  { %v5751_v17 = vadd.f32 %v4521_v8, %v5530_v9  ;;  %1205 = vadd.xlane.f32.xlu0 %v1204_v16  ;;  %v936_v21 = vpop.f32.mrb[45].mxu0 }
 0x1b3   :  { %1208 = vadd.xlane.f32.xlu1 %v1207_v24  ;;  %v4522_v27 = vpop.f32.mrb[46].mxu0  ;;  %v5761_v43 = vadd.f32 %v5530_v9, %v936_v21 }
 0x1b4   :  { %v5756_v28 = vadd.f32 %v4522_v27, %v5530_v9  ;;  %v939_v33 = vpop.f32.mrb[47].mxu0  ;;  %v1222_v35 = vsel %vm1083_vm3, %v5751_v17, 0.0 }
 0x1b5   :  { %v5764_v45 = vadd.f32 %v5530_v9, %v939_v33  ;;  %v1216_v52 = vsel %vm1083_vm3, %v5761_v43, 0.0 }
 0x1b6   :  { %1223 = vadd.xlane.f32.xlu0 %v1222_v35  ;;  %v1225_v47 = vsel %vm1083_vm3, %v5756_v28, 0.0 }
 0x1b7   :  { %1226 = vadd.xlane.f32.xlu1 %v1225_v47  ;;  %v1219_v63 = vsel %vm1083_vm3, %v5764_v45, 0.0 }
 0x1b9   :  { %v4525_v51 = vpop.f32.mrb[48].mxu0 }
 0x1ba   :  { %v5771_v57 = vadd.f32 %v4525_v51, %v5530_v9  ;;  %1217 = vadd.xlane.f32.xlu0 %v1216_v52  ;;  %v952_v60 = vpop.f32.mrb[49].mxu0 }
 0x1bb   :  { %1220 = vadd.xlane.f32.xlu1 %v1219_v63  ;;  %v4526_v5 = vpop.f32.mrb[50].mxu0  ;;  %v5781_v24 = vadd.f32 %v5530_v9, %v952_v60 }
 0x1bc   :  { %7977 = vst [vmem:[#allocation3_spill] sm:$0xff] %v5771_v57  ;;  %v5776_v8 = vadd.f32 %v4526_v5, %v5530_v9  ;;  %v955_v16 = vpop.f32.mrb[51].mxu0  ;;  %v1234_v21 = vsel %vm1083_vm3, %v5771_v57, 0.0 }
 0x1bd   :  { %7979 = vst [vmem:[#allocation5_spill] sm:$0xff] %v5781_v24  ;;  %v5784_v27 = vadd.f32 %v5530_v9, %v955_v16  ;;  %v1228_v47 = vsel %vm1083_vm3, %v5781_v24, 0.0 }
 0x1be   :  { %7978 = vst [vmem:[#allocation4_spill] sm:$0xff] %v5776_v8  ;;  %1235 = vadd.xlane.f32.xlu0 %v1234_v21  ;;  %v1237_v33 = vsel %vm1083_vm3, %v5776_v8, 0.0 }
 0x1bf   :  { %7980 = vst [vmem:[#allocation6_spill] sm:$0xff] %v5784_v27  ;;  %1238 = vadd.xlane.f32.xlu1 %v1237_v33  ;;  %v1231_v60 = vsel %vm1083_vm3, %v5784_v27, 0.0 }
 0x1c1   :  { %v4529_v35 = vpop.f32.mrb[52].mxu0 }
 0x1c2   :  { %v5791_v51 = vadd.f32 %v4529_v35, %v5530_v9  ;;  %1229 = vadd.xlane.f32.xlu0 %v1228_v47  ;;  %v968_v52 = vpop.f32.mrb[53].mxu0 }
 0x1c3   :  { %1232 = vadd.xlane.f32.xlu1 %v1231_v60  ;;  %v4530_v63 = vpop.f32.mrb[54].mxu0  ;;  %v5801_v33 = vadd.f32 %v5530_v9, %v968_v52 }
 0x1c4   :  { %7981 = vst [vmem:[#allocation7_spill] sm:$0xff] %v5791_v51  ;;  %v5796_v5 = vadd.f32 %v4530_v63, %v5530_v9  ;;  %v971_v16 = vpop.f32.mrb[55].mxu0  ;;  %v1246_v21 = vsel %vm1083_vm3, %v5791_v51, 0.0 }
 0x1c5   :  { %7983 = vst [vmem:[#allocation9_spill] sm:$0xff] %v5801_v33  ;;  %v5804_v35 = vadd.f32 %v5530_v9, %v971_v16  ;;  %v1240_v63 = vsel %vm1083_vm3, %v5801_v33, 0.0 }
 0x1c6   :  { %7982 = vst [vmem:[#allocation8_spill] sm:$0xff] %v5796_v5  ;;  %1247 = vadd.xlane.f32.xlu0 %v1246_v21  ;;  %v1249_v47 = vsel %vm1083_vm3, %v5796_v5, 0.0 }
 0x1c7   :  { %7984 = vst [vmem:[#allocation10_spill] sm:$0xff] %v5804_v35  ;;  %1250 = vadd.xlane.f32.xlu1 %v1249_v47  ;;  %v1243_v52 = vsel %vm1083_vm3, %v5804_v35, 0.0 }
 0x1c9   :  { %v4533_v60 = vpop.f32.mrb[56].mxu0 }
 0x1ca   :  { %v5811_v6 = vadd.f32 %v4533_v60, %v5530_v9  ;;  %1241 = vadd.xlane.f32.xlu0 %v1240_v63  ;;  %v984_v51 = vpop.f32.mrb[57].mxu0 }
 0x1cb   :  { %1244 = vadd.xlane.f32.xlu1 %v1243_v52  ;;  %v4534_v16 = vpop.f32.mrb[58].mxu0  ;;  %v5821_v5 = vadd.f32 %v5530_v9, %v984_v51 }
 0x1cc   :  { %7985 = vst [vmem:[#allocation11_spill] sm:$0xff] %v5811_v6  ;;  %v5816_v21 = vadd.f32 %v4534_v16, %v5530_v9  ;;  %v987_v8 = vpop.f32.mrb[59].mxu0  ;;  %v1258_v47 = vsel %vm1083_vm3, %v5811_v6, 0.0 }
 0x1cd   :  { %7987 = vst [vmem:[#allocation13_spill] sm:$0xff] %v5821_v5  ;;  %v5824_v60 = vadd.f32 %v5530_v9, %v987_v8  ;;  %v1252_v16 = vsel %vm1083_vm3, %v5821_v5, 0.0 }
 0x1ce   :  { %7986 = vst [vmem:[#allocation12_spill] sm:$0xff] %v5816_v21  ;;  %1259 = vadd.xlane.f32.xlu0 %v1258_v47  ;;  %v1261_v63 = vsel %vm1083_vm3, %v5816_v21, 0.0 }
 0x1cf   :  { %7988 = vst [vmem:[#allocation14_spill] sm:$0xff] %v5824_v60  ;;  %1262 = vadd.xlane.f32.xlu1 %v1261_v63  ;;  %v1255_v6 = vsel %vm1083_vm3, %v5824_v60, 0.0 }
 0x1d1   :  { %v5828_v52 = vpop.f32.mrb[60].mxu0 }
 0x1d2   :  { %1253 = vadd.xlane.f32.xlu0 %v1252_v16  ;;  %v1000_v35 = vpop.f32.mrb[61].mxu0 }
 0x1d3   :  { %v5835_v51 = vadd.f32 %v5530_v9, %v1000_v35  ;;  %1256 = vadd.xlane.f32.xlu1 %v1255_v6  ;;  %v5837_v8 = vpop.f32.mrb[62].mxu0 }
 0x1d4   :  { %v1003_v47 = vpop.f32.mrb[63].mxu0 }
 0x1d5   :  { %7989 = vst [vmem:[#allocation15_spill] sm:$0xff] %v5835_v51  ;;  %v5840_v21 = vadd.f32 %v5530_v9, %v1003_v47  ;;  %v1264_v63 = vsel %vm1083_vm3, %v5835_v51, 0.0 }
 0x1d6   :  { %1265 = vadd.xlane.f32.xlu0 %v1264_v63 }
 0x1d7   :  { %7990 = vst [vmem:[#allocation16_spill] sm:$0xff] %v5840_v21  ;;  %v1267_v16 = vsel %vm1083_vm3, %v5840_v21, 0.0 }
 0x1d8   :  { %1268 = vadd.xlane.f32.xlu1 %v1267_v16 }
 0x1ea   :  { %v1092_v5 = vpop.xlane.xlu1 %1091 }
 0x1eb   :  { %v1279_v60 = vmul.f32 0.015625, %v1092_v5  ;;  %v1086_v33 = vpop.xlane.xlu0 %1085 }
 0x1ec   :  { %v1277_v35 = vmul.f32 0.015625, %v1086_v33 }
 0x1ed   :  { %v5847_v6 = vsub.f32 %v5533_v11, %v1279_v60 }
 0x1ee   :  { %v5850_v27 = vsub.f32 %v5536_v13, %v1277_v35  ;;  %v1095_v47 = vpop.xlane.xlu1 %1094 }
 0x1ef   :  { %v1280_v24 = vmul.f32 0.015625, %v1095_v47  ;;  %v1089_v57 = vpop.xlane.xlu0 %1088  ;;  %v1407_v63 = vmul.f32 %v5847_v6, %v5847_v6 }
 0x1f0   :  { %v1278_v51 = vmul.f32 0.015625, %v1089_v57  ;;  %v1405_v33 = vmul.f32 %v5850_v27, %v5850_v27 }
 0x1f1   :  { %v5855_v21 = vsub.f32 %v5539_v15, %v1280_v24  ;;  %v1475_v5 = vsel %vm1083_vm3, %v1407_v63, 0.0 }
 0x1f2   :  { %v5861_v11 = vsub.f32 %v5544_v18, %v1278_v51  ;;  %1476 = vadd.xlane.f32.xlu0 %v1475_v5  ;;  %v1469_v57 = vsel %vm1083_vm3, %v1405_v33, 0.0 }
 0x1f3   :  { %v1104_v13 = vpop.xlane.xlu0 %1103  ;;  %v1408_v60 = vmul.f32 %v5855_v21, %v5855_v21 }
 0x1f4   :  { %7991 = vst [vmem:[#allocation17_spill] sm:$0xff] %v5861_v11  ;;  %v1283_v16 = vmul.f32 0.015625, %v1104_v13  ;;  %v1107_v35 = vpop.xlane.xlu1 %1106  ;;  %v1406_v24 = vmul.f32 %v5861_v11, %v5861_v11 }
 0x1f5   :  { %v1284_v47 = vmul.f32 0.015625, %v1107_v35  ;;  %v1478_v15 = vsel %vm1083_vm3, %v1408_v60, 0.0 }
 0x1f6   :  { %v5870_v63 = vsub.f32 %v5553_v23, %v1283_v16  ;;  %1470 = vadd.xlane.f32.xlu0 %v1469_v57  ;;  %1479 = vadd.xlane.f32.xlu1 %v1478_v15  ;;  %v1472_v60 = vsel %vm1083_vm3, %v1406_v24, 0.0 }
 0x1f7   :  { %v5873_v18 = vsub.f32 %v5556_v26, %v1284_v47  ;;  %v1098_v51 = vpop.xlane.xlu0 %1097 }
 0x1f8   :  { %v1281_v5 = vmul.f32 0.015625, %v1098_v51  ;;  %v1101_v13 = vpop.xlane.xlu1 %1100  ;;  %v1411_v35 = vmul.f32 %v5870_v63, %v5870_v63 }
 0x1f9   :  { %v1282_v33 = vmul.f32 0.015625, %v1101_v13  ;;  %v1412_v11 = vmul.f32 %v5873_v18, %v5873_v18 }
 0x1fa   :  { %v5881_v23 = vsub.f32 %v5561_v29, %v1281_v5  ;;  %1473 = vadd.xlane.f32.xlu1 %v1472_v60  ;;  %v1487_v16 = vsel %vm1083_vm3, %v1411_v35, 0.0 }
 0x1fb   :  { %v5885_v26 = vsub.f32 %v5564_v30, %v1282_v33  ;;  %v1116_v47 = vpop.xlane.xlu0 %1115  ;;  %1488 = vadd.xlane.f32.xlu0 %v1487_v16  ;;  %v1490_v13 = vsel %vm1083_vm3, %v1412_v11, 0.0 }
 0x1fc   :  { %v1287_v57 = vmul.f32 0.015625, %v1116_v47  ;;  %v1119_v15 = vpop.xlane.xlu1 %1118  ;;  %v1409_v51 = vmul.f32 %v5881_v23, %v5881_v23 }
 0x1fd   :  { %v1288_v24 = vmul.f32 0.015625, %v1119_v15  ;;  %v1410_v29 = vmul.f32 %v5885_v26, %v5885_v26 }
 0x1fe   :  { %v5893_v5 = vsub.f32 %v5571_v34, %v1287_v57  ;;  %1491 = vadd.xlane.f32.xlu1 %v1490_v13  ;;  %v1481_v30 = vsel %vm1083_vm3, %v1409_v51, 0.0 }
 0x1ff   :  { %v5897_v35 = vsub.f32 %v5576_v38, %v1288_v24  ;;  %v1110_v33 = vpop.xlane.xlu0 %1109  ;;  %1482 = vadd.xlane.f32.xlu0 %v1481_v30  ;;  %v1484_v15 = vsel %vm1083_vm3, %v1410_v29, 0.0 }
 0x200   :  { %v1285_v60 = vmul.f32 0.015625, %v1110_v33  ;;  %v1113_v16 = vpop.xlane.xlu1 %1112  ;;  %v1415_v47 = vmul.f32 %v5893_v5, %v5893_v5 }
 0x201   :  { %v1286_v11 = vmul.f32 0.015625, %v1113_v16  ;;  %v1416_v34 = vmul.f32 %v5897_v35, %v5897_v35 }
 0x202   :  { %v5905_v57 = vsub.f32 %v5581_v41, %v1285_v60  ;;  %1485 = vadd.xlane.f32.xlu1 %v1484_v15  ;;  %v1499_v38 = vsel %vm1083_vm3, %v1415_v47, 0.0 }
 0x203   :  { %v5909_v51 = vsub.f32 %v5584_v42, %v1286_v11  ;;  %v1128_v24 = vpop.xlane.xlu0 %1127  ;;  %1500 = vadd.xlane.f32.xlu0 %v1499_v38  ;;  %v1502_v16 = vsel %vm1083_vm3, %v1416_v34, 0.0 }
 0x204   :  { %v1291_v13 = vmul.f32 0.015625, %v1128_v24  ;;  %v1131_v30 = vpop.xlane.xlu1 %1130  ;;  %v1413_v33 = vmul.f32 %v5905_v57, %v5905_v57 }
 0x205   :  { %v1292_v29 = vmul.f32 0.015625, %v1131_v30  ;;  %v1414_v41 = vmul.f32 %v5909_v51, %v5909_v51 }
 0x206   :  { %v5917_v60 = vsub.f32 %v5591_v46, %v1291_v13  ;;  %1503 = vadd.xlane.f32.xlu1 %v1502_v16  ;;  %v1493_v42 = vsel %vm1083_vm3, %v1413_v33, 0.0 }
 0x207   :  { %v5921_v47 = vsub.f32 %v5596_v50, %v1292_v29  ;;  %v1122_v11 = vpop.xlane.xlu0 %1121  ;;  %1494 = vadd.xlane.f32.xlu0 %v1493_v42  ;;  %v1496_v30 = vsel %vm1083_vm3, %v1414_v41, 0.0 }
 0x208   :  { %v1289_v15 = vmul.f32 0.015625, %v1122_v11  ;;  %v1125_v38 = vpop.xlane.xlu1 %1124  ;;  %v1419_v24 = vmul.f32 %v5917_v60, %v5917_v60 }
 0x209   :  { %v1290_v34 = vmul.f32 0.015625, %v1125_v38  ;;  %v1420_v46 = vmul.f32 %v5921_v47, %v5921_v47 }
 0x20a   :  { %v5929_v13 = vsub.f32 %v5601_v53, %v1289_v15  ;;  %1497 = vadd.xlane.f32.xlu1 %v1496_v30  ;;  %v1511_v50 = vsel %vm1083_vm3, %v1419_v24, 0.0 }
 0x20b   :  { %v5933_v33 = vsub.f32 %v5604_v54, %v1290_v34  ;;  %v1140_v29 = vpop.xlane.xlu0 %1139  ;;  %1512 = vadd.xlane.f32.xlu0 %v1511_v50  ;;  %v1514_v38 = vsel %vm1083_vm3, %v1420_v46, 0.0 }
 0x20c   :  { %v1295_v16 = vmul.f32 0.015625, %v1140_v29  ;;  %v1143_v42 = vpop.xlane.xlu1 %1142  ;;  %v1417_v11 = vmul.f32 %v5929_v13, %v5929_v13 }
 0x20d   :  { %v1296_v41 = vmul.f32 0.015625, %v1143_v42  ;;  %v1418_v53 = vmul.f32 %v5933_v33, %v5933_v33 }
 0x20e   :  { %v5941_v15 = vsub.f32 %v5611_v58, %v1295_v16  ;;  %1515 = vadd.xlane.f32.xlu1 %v1514_v38  ;;  %v1505_v54 = vsel %vm1083_vm3, %v1417_v11, 0.0  ;;  %v4751_v16 = vld [vmem:[%s7880_s4] sm:$0xff]  }
 0x20f   :  { %v5945_v24 = vsub.f32 %v5616_v62, %v1296_v41  ;;  %v1134_v34 = vpop.xlane.xlu0 %1133  ;;  %1506 = vadd.xlane.f32.xlu0 %v1505_v54  ;;  %v1508_v29 = vsel %vm1083_vm3, %v1418_v53, 0.0  ;;  %4539 = vmatprep.subr.bf16.mxu1 %v4751_v16 }
 0x210   :  { %v1293_v30 = vmul.f32 0.015625, %v1134_v34  ;;  %v1137_v50 = vpop.xlane.xlu1 %1136  ;;  %v1423_v46 = vmul.f32 %v5941_v15, %v5941_v15  ;;  %4540 = vmatpush3.bf16.msra.mxu1 %v4751_v16 }
 0x211   :  { %7992 = vst [vmem:[#allocation18_spill] sm:$0xff] %v5945_v24  ;;  %v1294_v42 = vmul.f32 0.015625, %v1137_v50  ;;  %v1424_v58 = vmul.f32 %v5945_v24, %v5945_v24 }
 0x212   :  { %v5956_v62 = vsub.f32 %v5621_v1, %v1293_v30  ;;  %1509 = vadd.xlane.f32.xlu1 %v1508_v29  ;;  %v1523_v11 = vsel %vm1083_vm3, %v1423_v46, 0.0 }
 0x213   :  { %v5960_v41 = vsub.f32 %v5624_v2, %v1294_v42  ;;  %v1152_v38 = vpop.xlane.xlu0 %1151  ;;  %1524 = vadd.xlane.f32.xlu0 %v1523_v11  ;;  %v1526_v24 = vsel %vm1083_vm3, %v1424_v58, 0.0  ;;  %v4752_v2 = vld [vmem:[%s7880_s4 + $0x8] sm:$0xff]  }
 0x214   :  { %v1299_v53 = vmul.f32 0.015625, %v1152_v38  ;;  %v1155_v54 = vpop.xlane.xlu1 %1154  ;;  %v1421_v34 = vmul.f32 %v5956_v62, %v5956_v62  ;;  %4541 = vmatprep.subr.bf16.mxu1 %v4752_v2 }
 0x215   :  { %v1300_v50 = vmul.f32 0.015625, %v1155_v54  ;;  %v1422_v1 = vmul.f32 %v5960_v41, %v5960_v41  ;;  %4542 = vmatpush3.bf16.msra.mxu1 %v4752_v2 }
 0x216   :  { %v5971_v30 = vsub.f32 %v5631_v7, %v1299_v53  ;;  %1527 = vadd.xlane.f32.xlu1 %v1526_v24  ;;  %v1517_v29 = vsel %vm1083_vm3, %v1421_v34, 0.0 }
 0x217   :  { %v5975_v46 = vsub.f32 %v5636_v14, %v1300_v50  ;;  %v1146_v42 = vpop.xlane.xlu0 %1145  ;;  %1518 = vadd.xlane.f32.xlu0 %v1517_v29  ;;  %v1520_v54 = vsel %vm1083_vm3, %v1422_v1, 0.0  ;;  %v4753_v14 = vld [vmem:[%s7880_s4 + $0x10] sm:$0xff]  }
 0x218   :  { %v1297_v58 = vmul.f32 0.015625, %v1146_v42  ;;  %v1149_v16 = vpop.xlane.xlu1 %1148  ;;  %v1427_v11 = vmul.f32 %v5971_v30, %v5971_v30  ;;  %4543 = vmatprep.subr.bf16.mxu1 %v4753_v14  ;;  %v4754_v42 = vld [vmem:[%s7880_s4 + $0x18] sm:$0xff]  }
 0x219   :  { %v1298_v38 = vmul.f32 0.015625, %v1149_v16  ;;  %v1428_v7 = vmul.f32 %v5975_v46, %v5975_v46  ;;  %4544 = vmatpush3.bf16.msra.mxu1 %v4753_v14 }
 0x21a   :  { %v5986_v24 = vsub.f32 %v5641_v19, %v1297_v58  ;;  %1521 = vadd.xlane.f32.xlu1 %v1520_v54  ;;  %v1535_v53 = vsel %vm1083_vm3, %v1427_v11, 0.0  ;;  %4545 = vmatprep.subr.bf16.mxu1 %v4754_v42 }
 0x21b   :  { %v5990_v34 = vsub.f32 %v5644_v20, %v1298_v38  ;;  %v1164_v50 = vpop.xlane.xlu0 %1163  ;;  %1536 = vadd.xlane.f32.xlu0 %v1535_v53  ;;  %v1538_v29 = vsel %vm1083_vm3, %v1428_v7, 0.0  ;;  %v6002_v20 = vadd.f32 %v5828_v52, %v5530_v9  ;;  %v6007_v7 = vadd.f32 %v5837_v8, %v5530_v9 }
 0x21c   :  { %v1167_v1 = vpop.xlane.xlu1 %1166  ;;  %v1425_v2 = vmul.f32 %v5986_v24, %v5986_v24  ;;  %v1303_v58 = vmul.f32 0.015625, %v1164_v50 }
 0x21d   :  { %7993 = vst [vmem:[#allocation19_spill] sm:$0xff] %v5990_v34  ;;  %v1426_v19 = vmul.f32 %v5990_v34, %v5990_v34  ;;  %4546 = vmatpush3.bf16.msra.mxu1 %v4754_v42  ;;  %v1304_v14 = vmul.f32 0.015625, %v1167_v1 }
 0x21e   :  { %1539 = vadd.xlane.f32.xlu1 %v1538_v29  ;;  %v1529_v16 = vsel %vm1083_vm3, %v1425_v2, 0.0  ;;  %v6011_v52 = vsub.f32 %v5651_v25, %v1303_v58  ;;  %v1270_v2 = vsel %vm1083_vm3, %v6002_v20, 0.0  ;;  %v1273_v25 = vsel %vm1083_vm3, %v6007_v7, 0.0 }
 0x21f   :  { %v1158_v11 = vpop.xlane.xlu0 %1157  ;;  %1530 = vadd.xlane.f32.xlu0 %v1529_v16  ;;  %v1532_v34 = vsel %vm1083_vm3, %v1426_v19, 0.0  ;;  %v6024_v1 = vsub.f32 %v5656_v32, %v1304_v14 }
 0x220   :  { %v1301_v38 = vmul.f32 0.015625, %v1158_v11  ;;  %v1161_v54 = vpop.xlane.xlu1 %1160  ;;  %v1431_v19 = vmul.f32 %v6011_v52, %v6011_v52 }
 0x221   :  { %v1302_v53 = vmul.f32 0.015625, %v1161_v54  ;;  %v1432_v14 = vmul.f32 %v6024_v1, %v6024_v1 }
 0x222   :  { %v6014_v50 = vsub.f32 %v5661_v36, %v1301_v38  ;;  %1533 = vadd.xlane.f32.xlu1 %v1532_v34 }
 0x223   :  { %v6019_v29 = vsub.f32 %v5664_v37, %v1302_v53  ;;  %v1176_v42 = vpop.xlane.xlu0 %1175  ;;  %1271 = vadd.xlane.f32.xlu0 %v1270_v2 }
 0x224   :  { %v1179_v9 = vpop.xlane.xlu1 %1178  ;;  %v1429_v8 = vmul.f32 %v6014_v50, %v6014_v50  ;;  %v1307_v34 = vmul.f32 0.015625, %v1176_v42  ;;  %v1547_v42 = vsel %vm1083_vm3, %v1431_v19, 0.0 }
 0x225   :  { %v1430_v36 = vmul.f32 %v6019_v29, %v6019_v29  ;;  %v1308_v38 = vmul.f32 0.015625, %v1179_v9 }
 0x226   :  { %1274 = vadd.xlane.f32.xlu1 %v1273_v25  ;;  %v1541_v37 = vsel %vm1083_vm3, %v1429_v8, 0.0  ;;  %v6037_v53 = vsub.f32 %v5671_v44, %v1307_v34  ;;  %v1550_v44 = vsel %vm1083_vm3, %v1432_v14, 0.0 }
 0x227   :  { %v1170_v58 = vpop.xlane.xlu0 %1169  ;;  %1542 = vadd.xlane.f32.xlu0 %v1541_v37  ;;  %v1544_v54 = vsel %vm1083_vm3, %v1430_v36, 0.0  ;;  %v6049_v37 = vsub.f32 %v5676_v49, %v1308_v38 }
 0x228   :  { %v1305_v16 = vmul.f32 0.015625, %v1170_v58  ;;  %v1173_v11 = vpop.xlane.xlu1 %1172 }
 0x229   :  { %v1306_v32 = vmul.f32 0.015625, %v1173_v11  ;;  %v1436_v38 = vmul.f32 %v6049_v37, %v6049_v37 }
 0x22a   :  { %v6040_v2 = vsub.f32 %v5681_v55, %v1305_v16  ;;  %1545 = vadd.xlane.f32.xlu1 %v1544_v54 }
 0x22b   :  { %v6044_v8 = vsub.f32 %v5684_v56, %v1306_v32  ;;  %v1188_v25 = vpop.xlane.xlu0 %1187  ;;  %1548 = vadd.xlane.f32.xlu0 %v1547_v42  ;;  %v1435_v56 = vmul.f32 %v6037_v53, %v6037_v53 }
 0x22c   :  { %v1191_v9 = vpop.xlane.xlu1 %1190  ;;  %v1433_v36 = vmul.f32 %v6040_v2, %v6040_v2  ;;  %v1311_v34 = vmul.f32 0.015625, %v1188_v25 }
 0x22d   :  { %v1434_v55 = vmul.f32 %v6044_v8, %v6044_v8  ;;  %v1312_v32 = vmul.f32 0.015625, %v1191_v9  ;;  %v1559_v25 = vsel %vm1083_vm3, %v1435_v56, 0.0 }
 0x22e   :  { %1551 = vadd.xlane.f32.xlu1 %v1550_v44  ;;  %v1553_v19 = vsel %vm1083_vm3, %v1433_v36, 0.0  ;;  %v6061_v14 = vsub.f32 %v5691_v61, %v1311_v34  ;;  %v1562_v61 = vsel %vm1083_vm3, %v1436_v38, 0.0 }
 0x22f   :  { %v1182_v58 = vpop.xlane.xlu0 %1181  ;;  %1554 = vadd.xlane.f32.xlu0 %v1553_v19  ;;  %v1556_v49 = vsel %vm1083_vm3, %v1434_v55, 0.0  ;;  %v6073_v19 = vsub.f32 %v5696_v4, %v1312_v32 }
 0x230   :  { %v1309_v16 = vmul.f32 0.015625, %v1182_v58  ;;  %v1185_v11 = vpop.xlane.xlu1 %1184 }
 0x231   :  { %v1310_v54 = vmul.f32 0.015625, %v1185_v11  ;;  %v1440_v32 = vmul.f32 %v6073_v19, %v6073_v19 }
 0x232   :  { %v6064_v42 = vsub.f32 %v5701_v10, %v1309_v16  ;;  %1557 = vadd.xlane.f32.xlu1 %v1556_v49 }
 0x233   :  { %v6068_v36 = vsub.f32 %v5704_v12, %v1310_v54  ;;  %v1200_v44 = vpop.xlane.xlu0 %1199  ;;  %1560 = vadd.xlane.f32.xlu0 %v1559_v25  ;;  %v1439_v12 = vmul.f32 %v6061_v14, %v6061_v14 }
 0x234   :  { %v1203_v9 = vpop.xlane.xlu1 %1202  ;;  %v1437_v55 = vmul.f32 %v6064_v42, %v6064_v42  ;;  %v1315_v34 = vmul.f32 0.015625, %v1200_v44 }
 0x235   :  { %v1438_v10 = vmul.f32 %v6068_v36, %v6068_v36  ;;  %v1316_v54 = vmul.f32 0.015625, %v1203_v9  ;;  %v1571_v44 = vsel %vm1083_vm3, %v1439_v12, 0.0 }
 0x236   :  { %1563 = vadd.xlane.f32.xlu1 %v1562_v61  ;;  %v1565_v56 = vsel %vm1083_vm3, %v1437_v55, 0.0  ;;  %v6085_v38 = vsub.f32 %v5711_v22, %v1315_v34  ;;  %v1574_v22 = vsel %vm1083_vm3, %v1440_v32, 0.0 }
 0x237   :  { %v1194_v58 = vpop.xlane.xlu0 %1193  ;;  %1566 = vadd.xlane.f32.xlu0 %v1565_v56  ;;  %v1568_v4 = vsel %vm1083_vm3, %v1438_v10, 0.0  ;;  %v6097_v56 = vsub.f32 %v5716_v31, %v1316_v54 }
 0x238   :  { %v1313_v16 = vmul.f32 0.015625, %v1194_v58  ;;  %v1197_v11 = vpop.xlane.xlu1 %1196 }
 0x239   :  { %v1314_v49 = vmul.f32 0.015625, %v1197_v11  ;;  %v1444_v54 = vmul.f32 %v6097_v56, %v6097_v56 }
 0x23a   :  { %v6088_v25 = vsub.f32 %v5721_v39, %v1313_v16  ;;  %1569 = vadd.xlane.f32.xlu1 %v1568_v4 }
 0x23b   :  { %v6092_v55 = vsub.f32 %v5724_v40, %v1314_v49  ;;  %v1212_v61 = vpop.xlane.xlu0 %1211  ;;  %1572 = vadd.xlane.f32.xlu0 %v1571_v44  ;;  %v1443_v40 = vmul.f32 %v6085_v38, %v6085_v38 }
 0x23c   :  { %v1215_v9 = vpop.xlane.xlu1 %1214  ;;  %v1441_v10 = vmul.f32 %v6088_v25, %v6088_v25  ;;  %v1319_v34 = vmul.f32 0.015625, %v1212_v61 }
 0x23d   :  { %v1442_v39 = vmul.f32 %v6092_v55, %v6092_v55  ;;  %v1320_v49 = vmul.f32 0.015625, %v1215_v9  ;;  %v1583_v61 = vsel %vm1083_vm3, %v1443_v40, 0.0 }
 0x23e   :  { %1575 = vadd.xlane.f32.xlu1 %v1574_v22  ;;  %v1577_v12 = vsel %vm1083_vm3, %v1441_v10, 0.0  ;;  %v6109_v32 = vsub.f32 %v5731_v48, %v1319_v34  ;;  %v1586_v48 = vsel %vm1083_vm3, %v1444_v54, 0.0 }
 0x23f   :  { %v1206_v58 = vpop.xlane.xlu0 %1205  ;;  %1578 = vadd.xlane.f32.xlu0 %v1577_v12  ;;  %v1580_v31 = vsel %vm1083_vm3, %v1442_v39, 0.0  ;;  %v6121_v12 = vsub.f32 %v5736_v59, %v1320_v49 }
 0x240   :  { %v1317_v16 = vmul.f32 0.015625, %v1206_v58  ;;  %v1209_v11 = vpop.xlane.xlu1 %1208 }
 0x241   :  { %v1318_v4 = vmul.f32 0.015625, %v1209_v11  ;;  %7994 = vst [vmem:[#allocation20_spill] sm:$0xff] %v6121_v12  ;;  %v1448_v49 = vmul.f32 %v6121_v12, %v6121_v12 }
 0x242   :  { %v6112_v44 = vsub.f32 %v5741_v0, %v1317_v16  ;;  %1581 = vadd.xlane.f32.xlu1 %v1580_v31 }
 0x243   :  { %v6116_v10 = vsub.f32 %v5744_v3, %v1318_v4  ;;  %v1224_v22 = vpop.xlane.xlu0 %1223  ;;  %1584 = vadd.xlane.f32.xlu0 %v1583_v61  ;;  %v1447_v3 = vmul.f32 %v6109_v32, %v6109_v32 }
 0x244   :  { %v1227_v9 = vpop.xlane.xlu1 %1226  ;;  %v1445_v39 = vmul.f32 %v6112_v44, %v6112_v44  ;;  %v1323_v34 = vmul.f32 0.015625, %v1224_v22 }
 0x245   :  { %v1446_v0 = vmul.f32 %v6116_v10, %v6116_v10  ;;  %v1324_v4 = vmul.f32 0.015625, %v1227_v9  ;;  %v1595_v22 = vsel %vm1083_vm3, %v1447_v3, 0.0 }
 0x246   :  { %1587 = vadd.xlane.f32.xlu1 %v1586_v48  ;;  %v1589_v40 = vsel %vm1083_vm3, %v1445_v39, 0.0  ;;  %v6133_v54 = vsub.f32 %v5751_v17, %v1323_v34  ;;  %v1598_v17 = vsel %vm1083_vm3, %v1448_v49, 0.0  ;;  %v7999_v49 = vld [vmem:[#allocation3_spill] sm:$0xff] }
 0x247   :  { %v1218_v58 = vpop.xlane.xlu0 %1217  ;;  %1590 = vadd.xlane.f32.xlu0 %v1589_v40  ;;  %v1592_v59 = vsel %vm1083_vm3, %v1446_v0, 0.0  ;;  %v6145_v40 = vsub.f32 %v5756_v28, %v1324_v4 }
 0x248   :  { %v1321_v16 = vmul.f32 0.015625, %v1218_v58  ;;  %v1221_v11 = vpop.xlane.xlu1 %1220  ;;  %7995 = vst [vmem:[#allocation21_spill] sm:$0xff] %v6133_v54 }
 0x249   :  { %v1322_v31 = vmul.f32 0.015625, %v1221_v11  ;;  %7998 = vst [vmem:[#allocation24_spill] sm:$0xff] %v6145_v40  ;;  %v1452_v4 = vmul.f32 %v6145_v40, %v6145_v40 }
 0x24a   :  { %v6136_v61 = vsub.f32 %v5761_v43, %v1321_v16  ;;  %1593 = vadd.xlane.f32.xlu1 %v1592_v59 }
 0x24b   :  { %v6140_v39 = vsub.f32 %v5764_v45, %v1322_v31  ;;  %v1236_v48 = vpop.xlane.xlu0 %1235  ;;  %1596 = vadd.xlane.f32.xlu0 %v1595_v22  ;;  %v1451_v45 = vmul.f32 %v6133_v54, %v6133_v54  ;;  %v8003_v54 = vld [vmem:[#allocation6_spill] sm:$0xff] }
 0x24c   :  { %7996 = vst [vmem:[#allocation22_spill] sm:$0xff] %v6136_v61  ;;  %v1239_v9 = vpop.xlane.xlu1 %1238  ;;  %v1449_v0 = vmul.f32 %v6136_v61, %v6136_v61  ;;  %v1327_v34 = vmul.f32 0.015625, %v1236_v48  ;;  %v8001_v48 = vld [vmem:[#allocation5_spill] sm:$0xff] }
 0x24d   :  { %7997 = vst [vmem:[#allocation23_spill] sm:$0xff] %v6140_v39  ;;  %v1450_v43 = vmul.f32 %v6140_v39, %v6140_v39  ;;  %v1328_v31 = vmul.f32 0.015625, %v1239_v9 }
 0x24e   :  { %1599 = vadd.xlane.f32.xlu1 %v1598_v17  ;;  %v1601_v3 = vsel %vm1083_vm3, %v1449_v0, 0.0  ;;  %v6157_v22 = vsub.f32 %v7999_v49, %v1327_v34  ;;  %v1607_v0 = vsel %vm1083_vm3, %v1451_v45, 0.0  ;;  %v1610_v34 = vsel %vm1083_vm3, %v1452_v4, 0.0 }
 0x24f   :  { %v1230_v58 = vpop.xlane.xlu0 %1229  ;;  %1602 = vadd.xlane.f32.xlu0 %v1601_v3  ;;  %v1604_v28 = vsel %vm1083_vm3, %v1450_v43, 0.0 }
 0x250   :  { %v1325_v16 = vmul.f32 0.015625, %v1230_v58  ;;  %v1233_v11 = vpop.xlane.xlu1 %1232  ;;  %8000 = vst [vmem:[#allocation3_spill] sm:$0xff] %v6157_v22 }
 0x251   :  { %v1326_v59 = vmul.f32 0.015625, %v1233_v11  ;;  %v8005_v11 = vld [vmem:[#allocation4_spill] sm:$0xff] }
 0x252   :  { %v6160_v17 = vsub.f32 %v8001_v48, %v1325_v16  ;;  %1605 = vadd.xlane.f32.xlu1 %v1604_v28  ;;  %v6169_v40 = vsub.f32 %v8005_v11, %v1328_v31  ;;  %v8007_v11 = vld [vmem:[#allocation7_spill] sm:$0xff] }
 0x253   :  { %v6164_v3 = vsub.f32 %v8003_v54, %v1326_v59  ;;  %v1248_v58 = vpop.xlane.xlu0 %1247  ;;  %1608 = vadd.xlane.f32.xlu0 %v1607_v0  ;;  %v1455_v54 = vmul.f32 %v6157_v22, %v6157_v22  ;;  %v8011_v22 = vld [vmem:[#allocation10_spill] sm:$0xff] }
 0x254   :  { %8002 = vst [vmem:[#allocation5_spill] sm:$0xff] %v6160_v17  ;;  %v1251_v9 = vpop.xlane.xlu1 %1250  ;;  %v1453_v43 = vmul.f32 %v6160_v17, %v6160_v17  ;;  %8006 = vst [vmem:[#allocation4_spill] sm:$0xff] %v6169_v40  ;;  %v1331_v28 = vmul.f32 0.015625, %v1248_v58  ;;  %v1456_v4 = vmul.f32 %v6169_v40, %v6169_v40  ;;  %v8009_v58 = vld [vmem:[#allocation9_spill] sm:$0xff] }
 0x255   :  { %8004 = vst [vmem:[#allocation6_spill] sm:$0xff] %v6164_v3  ;;  %v1454_v16 = vmul.f32 %v6164_v3, %v6164_v3  ;;  %v1332_v0 = vmul.f32 0.015625, %v1251_v9 }
 0x256   :  { %1611 = vadd.xlane.f32.xlu1 %v1610_v34  ;;  %v1613_v45 = vsel %vm1083_vm3, %v1453_v43, 0.0  ;;  %v6181_v3 = vsub.f32 %v8007_v11, %v1331_v28  ;;  %v1619_v43 = vsel %vm1083_vm3, %v1455_v54, 0.0  ;;  %v1622_v28 = vsel %vm1083_vm3, %v1456_v4, 0.0 }
 0x257   :  { %v1242_v59 = vpop.xlane.xlu0 %1241  ;;  %1614 = vadd.xlane.f32.xlu0 %v1613_v45  ;;  %v1616_v31 = vsel %vm1083_vm3, %v1454_v16, 0.0 }
 0x258   :  { %v1329_v49 = vmul.f32 0.015625, %v1242_v59  ;;  %v1245_v48 = vpop.xlane.xlu1 %1244  ;;  %8008 = vst [vmem:[#allocation7_spill] sm:$0xff] %v6181_v3 }
 0x259   :  { %v1330_v17 = vmul.f32 0.015625, %v1245_v48  ;;  %v8013_v48 = vld [vmem:[#allocation8_spill] sm:$0xff] }
 0x25a   :  { %v6184_v34 = vsub.f32 %v8009_v58, %v1329_v49  ;;  %1617 = vadd.xlane.f32.xlu1 %v1616_v31  ;;  %v6193_v40 = vsub.f32 %v8013_v48, %v1332_v0  ;;  %v8015_v48 = vld [vmem:[#allocation11_spill] sm:$0xff] }
 0x25b   :  { %v6188_v45 = vsub.f32 %v8011_v22, %v1330_v17  ;;  %v1260_v59 = vpop.xlane.xlu0 %1259  ;;  %1620 = vadd.xlane.f32.xlu0 %v1619_v43  ;;  %v1459_v22 = vmul.f32 %v6181_v3, %v6181_v3  ;;  %v8019_v3 = vld [vmem:[#allocation14_spill] sm:$0xff] }
 0x25c   :  { %8010 = vst [vmem:[#allocation9_spill] sm:$0xff] %v6184_v34  ;;  %v1263_v9 = vpop.xlane.xlu1 %1262  ;;  %v1457_v16 = vmul.f32 %v6184_v34, %v6184_v34  ;;  %8014 = vst [vmem:[#allocation8_spill] sm:$0xff] %v6193_v40  ;;  %v1335_v31 = vmul.f32 0.015625, %v1260_v59  ;;  %v1460_v4 = vmul.f32 %v6193_v40, %v6193_v40  ;;  %v8017_v59 = vld [vmem:[#allocation13_spill] sm:$0xff] }
 0x25d   :  { %8012 = vst [vmem:[#allocation10_spill] sm:$0xff] %v6188_v45  ;;  %v1458_v49 = vmul.f32 %v6188_v45, %v6188_v45  ;;  %v1336_v43 = vmul.f32 0.015625, %v1263_v9 }
 0x25e   :  { %1623 = vadd.xlane.f32.xlu1 %v1622_v28  ;;  %v1625_v54 = vsel %vm1083_vm3, %v1457_v16, 0.0  ;;  %v6205_v45 = vsub.f32 %v8015_v48, %v1335_v31  ;;  %v1631_v16 = vsel %vm1083_vm3, %v1459_v22, 0.0  ;;  %v1634_v48 = vsel %vm1083_vm3, %v1460_v4, 0.0 }
 0x25f   :  { %v1254_v17 = vpop.xlane.xlu0 %1253  ;;  %1626 = vadd.xlane.f32.xlu0 %v1625_v54  ;;  %v1628_v0 = vsel %vm1083_vm3, %v1458_v49, 0.0 }
 0x260   :  { %v1333_v11 = vmul.f32 0.015625, %v1254_v17  ;;  %v1257_v58 = vpop.xlane.xlu1 %1256  ;;  %8016 = vst [vmem:[#allocation11_spill] sm:$0xff] %v6205_v45 }
 0x261   :  { %v1334_v34 = vmul.f32 0.015625, %v1257_v58  ;;  %v8021_v58 = vld [vmem:[#allocation12_spill] sm:$0xff] }
 0x262   :  { %v6208_v28 = vsub.f32 %v8017_v59, %v1333_v11  ;;  %1629 = vadd.xlane.f32.xlu1 %v1628_v0  ;;  %v6217_v40 = vsub.f32 %v8021_v58, %v1336_v43  ;;  %v8023_v0 = vld [vmem:[#allocation15_spill] sm:$0xff]  ;;  %v1463_v59 = vmul.f32 %v6205_v45, %v6205_v45 }
 0x263   :  { %v6212_v54 = vsub.f32 %v8019_v3, %v1334_v34  ;;  %1632 = vadd.xlane.f32.xlu0 %v1631_v16  ;;  %v1266_v9 = vpop.xlane.xlu0 %1265  ;;  %v8025_v16 = vld [vmem:[#allocation16_spill] sm:$0xff] }
 0x264   :  { %8018 = vst [vmem:[#allocation13_spill] sm:$0xff] %v6208_v28  ;;  %v1337_v17 = vmul.f32 0.015625, %v1266_v9  ;;  %v1461_v49 = vmul.f32 %v6208_v28, %v6208_v28  ;;  %8022 = vst [vmem:[#allocation12_spill] sm:$0xff] %v6217_v40  ;;  %v1464_v4 = vmul.f32 %v6217_v40, %v6217_v40 }
 0x265   :  { %8020 = vst [vmem:[#allocation14_spill] sm:$0xff] %v6212_v54  ;;  %v1269_v31 = vpop.xlane.xlu1 %1268  ;;  %v1462_v11 = vmul.f32 %v6212_v54, %v6212_v54 }
 0x266   :  { %v6223_v22 = vsub.f32 %v8023_v0, %v1337_v17  ;;  %v1338_v3 = vmul.f32 0.015625, %v1269_v31  ;;  %1635 = vadd.xlane.f32.xlu1 %v1634_v48  ;;  %v1637_v34 = vsel %vm1083_vm3, %v1461_v49, 0.0  ;;  %v1643_v17 = vsel %vm1083_vm3, %v1463_v59, 0.0 }
 0x267   :  { %1638 = vadd.xlane.f32.xlu0 %v1637_v34  ;;  %v1640_v9 = vsel %vm1083_vm3, %v1462_v11, 0.0  ;;  %v1646_v49 = vsel %vm1083_vm3, %v1464_v4, 0.0 }
 0x268   :  { %8024 = vst [vmem:[#allocation15_spill] sm:$0xff] %v6223_v22  ;;  %v6229_v43 = vsub.f32 %v8025_v16, %v1338_v3  ;;  %v1465_v58 = vmul.f32 %v6223_v22, %v6223_v22 }
 0x26a   :  { %8026 = vst [vmem:[#allocation16_spill] sm:$0xff] %v6229_v43  ;;  %1641 = vadd.xlane.f32.xlu1 %v1640_v9  ;;  %v1466_v31 = vmul.f32 %v6229_v43, %v6229_v43  ;;  %v1649_v48 = vsel %vm1083_vm3, %v1465_v58, 0.0 }
 0x26b   :  { %1644 = vadd.xlane.f32.xlu0 %v1643_v17 }
 0x26c   :  { %v1652_v11 = vsel %vm1083_vm3, %v1466_v31, 0.0 }
 0x26e   :  { %1647 = vadd.xlane.f32.xlu1 %v1646_v49 }
 0x26f   :  { %1650 = vadd.xlane.f32.xlu0 %v1649_v48 }
 0x272   :  { %1653 = vadd.xlane.f32.xlu1 %v1652_v11  ;;  %v8027_v11 = vld [vmem:[#allocation2_spill] sm:$0xff] }
 0x273   :  { %v1919_v54 = vsub.s32 1, %v8027_v11 }
 0x27f   :  { %v1477_v0 = vpop.xlane.xlu0 %1476 }
 0x280   :  { %v1663_v3 = vmul.f32 0.015625, %v1477_v0 }
 0x282   :  { %v1727_v34 = vadd.f32 1e-05, %v1663_v3 }
 0x283   :  { %v1471_v59 = vpop.xlane.xlu0 %1470  ;;  %v1480_v16 = vpop.xlane.xlu1 %1479 }
 0x284   :  { %4759 = vrsqrt.f32 %v1727_v34  ;;  %v1661_v9 = vmul.f32 0.015625, %v1471_v59  ;;  %v1664_v17 = vmul.f32 0.015625, %v1480_v16 }
 0x286   :  { %v1725_v22 = vadd.f32 1e-05, %v1661_v9  ;;  %v1728_v4 = vadd.f32 1e-05, %v1664_v17 }
 0x287   :  { %v1474_v40 = vpop.xlane.xlu1 %1473 }
 0x288   :  { %4761 = vrsqrt.f32 %v1725_v22  ;;  %v1662_v43 = vmul.f32 0.015625, %v1474_v40  ;;  %v1489_v49 = vpop.xlane.xlu0 %1488  ;;  %v5015_v40 = vld [vmem:[%s7879_s6] sm:$0x3f] }
 0x289   :  { %4763 = vrsqrt.f32 %v1728_v4  ;;  %v1667_v58 = vmul.f32 0.015625, %v1489_v49  ;;  %v1987_v4 = vsub.s32 2, %v8027_v11 }
 0x28a   :  { %v1726_v48 = vadd.f32 1e-05, %v1662_v43  ;;  %v6247_v43 = vrot.slane %v5015_v40, %v1919_v54 }
 0x28b   :  { %v1731_v45 = vadd.f32 1e-05, %v1667_v58  ;;  %v1492_v31 = vpop.xlane.xlu1 %1491 }
 0x28c   :  { %4765 = vrsqrt.f32 %v1726_v48  ;;  %v1668_v0 = vmul.f32 0.015625, %v1492_v31  ;;  %v1483_v3 = vpop.xlane.xlu0 %1482 }
 0x28d   :  { %4767 = vrsqrt.f32 %v1731_v45  ;;  %v1665_v34 = vmul.f32 0.015625, %v1483_v3 }
 0x28e   :  { %v4760_v59 = vpop.eup %4759  ;;  %v1732_v16 = vadd.f32 1e-05, %v1668_v0 }
 0x28f   :  { %v1855_v9 = vmul.f32 %v4760_v59, %v5847_v6  ;;  %v1729_v17 = vadd.f32 1e-05, %v1665_v34  ;;  %v1486_v22 = vpop.xlane.xlu1 %1485  ;;  %v6251_v59 = vrot.slane %v5015_v40, %v1987_v4  ;;  %v8028_v40 = vld [vmem:[#allocation17_spill] sm:$0xff] }
 0x290   :  { %4769 = vrsqrt.f32 %v1732_v16  ;;  %v1666_v49 = vmul.f32 0.015625, %v1486_v22  ;;  %v1501_v58 = vpop.xlane.xlu0 %1500 }
 0x291   :  { %4771 = vrsqrt.f32 %v1729_v17  ;;  %v1671_v45 = vmul.f32 0.015625, %v1501_v58  ;;  %v1923_v28 = vmul.f32 %v6247_v43, %v1855_v9 }
 0x292   :  { %v4762_v48 = vpop.eup %4761  ;;  %v1730_v31 = vadd.f32 1e-05, %v1666_v49 }
 0x293   :  { %v4764_v0 = vpop.eup %4763  ;;  %v1735_v3 = vadd.f32 1e-05, %v1671_v45  ;;  %v1504_v6 = vpop.xlane.xlu1 %1503  ;;  %v1853_v34 = vmul.f32 %v4762_v48, %v5850_v27 }
 0x294   :  { %v1856_v54 = vmul.f32 %v4764_v0, %v5855_v21  ;;  %4773 = vrsqrt.f32 %v1730_v31  ;;  %v1672_v11 = vmul.f32 0.015625, %v1504_v6  ;;  %v1495_v16 = vpop.xlane.xlu0 %1494  ;;  %v1991_v21 = vadd.f32 %v6251_v59, %v1923_v28 }
 0x295   :  { %4775 = vrsqrt.f32 %v1735_v3  ;;  %v1669_v22 = vmul.f32 0.015625, %v1495_v16  ;;  %v1921_v17 = vmul.f32 %v6247_v43, %v1853_v34 }
 0x296   :  { %v4766_v58 = vpop.eup %4765  ;;  %v1736_v49 = vadd.f32 1e-05, %v1672_v11  ;;  %v1924_v45 = vmul.f32 %v6247_v43, %v1856_v54 }
 0x297   :  { %v4768_v39 = vpop.eup %4767  ;;  %v1733_v61 = vadd.f32 1e-05, %v1669_v22  ;;  %v1498_v27 = vpop.xlane.xlu1 %1497  ;;  %v1854_v4 = vmul.f32 %v4766_v58, %v8028_v40  ;;  %v1989_v9 = vadd.f32 %v6251_v59, %v1921_v17 }
 0x298   :  { %v1859_v48 = vmul.f32 %v4768_v39, %v5870_v63  ;;  %4777 = vrsqrt.f32 %v1736_v49  ;;  %v1670_v31 = vmul.f32 0.015625, %v1498_v27  ;;  %v1513_v0 = vpop.xlane.xlu0 %1512  ;;  %v1992_v3 = vadd.f32 %v6251_v59, %v1924_v45 }
 0x299   :  { %4779 = vrsqrt.f32 %v1733_v61  ;;  %v1675_v11 = vmul.f32 0.015625, %v1513_v0  ;;  %v1922_v6 = vmul.f32 %v6247_v43, %v1854_v4  ;;  %v2055_v39 = vmax.f32 %v1991_v21, 0.0 }
 0x29a   :  { %v4770_v34 = vpop.eup %4769  ;;  %v1734_v54 = vadd.f32 1e-05, %v1670_v31  ;;  %v2056_v16 = vmax.f32 %v1992_v3, 0.0  ;;  %v1927_v22 = vmul.f32 %v6247_v43, %v1859_v48  ;;  %v2053_v27 = vmax.f32 %v1989_v9, 0.0 }
 0x29b   :  { %v4772_v58 = vpop.eup %4771  ;;  %v1860_v17 = vmul.f32 %v4770_v34, %v5873_v18  ;;  %v1739_v28 = vadd.f32 1e-05, %v1675_v11  ;;  %v1516_v40 = vpop.xlane.xlu1 %1515  ;;  %v1990_v63 = vadd.f32 %v6251_v59, %v1922_v6 }
 0x29c   :  { %v1857_v49 = vmul.f32 %v4772_v58, %v5881_v23  ;;  %4781 = vrsqrt.f32 %v1734_v54  ;;  %v1676_v61 = vmul.f32 0.015625, %v1516_v40  ;;  %v1507_v45 = vpop.xlane.xlu0 %1506  ;;  %v2118_v12 = vpack.c.bf16 %v2056_v16, %v2055_v39 }
 0x29d   :  { %4783 = vrsqrt.f32 %v1739_v28  ;;  %v1673_v4 = vmul.f32 0.015625, %v1507_v45  ;;  %v2054_v31 = vmax.f32 %v1990_v63, 0.0  ;;  %v1928_v0 = vmul.f32 %v6247_v43, %v1860_v17 }
 0x29e   :  { %v4774_v48 = vpop.eup %4773  ;;  %v1740_v3 = vadd.f32 1e-05, %v1676_v61  ;;  %v1925_v18 = vmul.f32 %v6247_v43, %v1857_v49  ;;  %v1995_v11 = vadd.f32 %v6251_v59, %v1927_v22 }
 0x29f   :  { %v4776_v6 = vpop.eup %4775  ;;  %v1858_v21 = vmul.f32 %v4774_v48, %v5885_v26  ;;  %v1737_v23 = vadd.f32 1e-05, %v1673_v4  ;;  %v1510_v34 = vpop.xlane.xlu1 %1509  ;;  %v2117_v54 = vpack.c.bf16 %v2054_v31, %v2053_v27  ;;  %v1996_v9 = vadd.f32 %v6251_v59, %v1928_v0 }
 0x2a0   :  { %v1863_v58 = vmul.f32 %v4776_v6, %v5893_v5  ;;  %4785 = vrsqrt.f32 %v1740_v3  ;;  %v1674_v28 = vmul.f32 0.015625, %v1510_v34  ;;  %v1525_v17 = vpop.xlane.xlu0 %1524  ;;  %v1993_v40 = vadd.f32 %v6251_v59, %v1925_v18 }
 0x2a1   :  { %4787 = vrsqrt.f32 %v1737_v23  ;;  %v1679_v16 = vmul.f32 0.015625, %v1525_v17  ;;  %4547 = vmatprep.mubr.msk.bf16.mxu1 %vm1083_vm3, %v2117_v54  ;;  %v1926_v22 = vmul.f32 %v6247_v43, %v1858_v21  ;;  %v2060_v39 = vmax.f32 %v1996_v9, 0.0 }
 0x2a2   :  { %v4778_v63 = vpop.eup %4777  ;;  %v1738_v26 = vadd.f32 1e-05, %v1674_v28  ;;  %4548 = vmatmul.mubr.msk.bf16.vlgmr.msra.gmra.mrb[0].mxu1 %vm1083_vm3, %v2118_v12  ;;  %v1931_v49 = vmul.f32 %v6247_v43, %v1863_v58  ;;  %v2059_v31 = vmax.f32 %v1995_v11, 0.0  ;;  %v2057_v18 = vmax.f32 %v1993_v40, 0.0 }
 0x2a3   :  { %v4780_v61 = vpop.eup %4779  ;;  %v1864_v5 = vmul.f32 %v4778_v63, %v5897_v35  ;;  %v1743_v45 = vadd.f32 1e-05, %v1679_v16  ;;  %v1528_v27 = vpop.xlane.xlu1 %1527  ;;  %v1994_v4 = vadd.f32 %v6251_v59, %v1926_v22 }
 0x2a4   :  { %v1861_v0 = vmul.f32 %v4780_v61, %v5905_v57  ;;  %4789 = vrsqrt.f32 %v1738_v26  ;;  %v1680_v48 = vmul.f32 0.015625, %v1528_v27  ;;  %v1519_v3 = vpop.xlane.xlu0 %1518  ;;  %v2120_v54 = vpack.c.bf16 %v2060_v39, %v2059_v31 }
 0x2a5   :  { %4791 = vrsqrt.f32 %v1743_v45  ;;  %v1677_v6 = vmul.f32 0.015625, %v1519_v3  ;;  %v2058_v12 = vmax.f32 %v1994_v4, 0.0  ;;  %v1932_v21 = vmul.f32 %v6247_v43, %v1864_v5 }
 0x2a6   :  { %v4782_v23 = vpop.eup %4781  ;;  %v1744_v34 = vadd.f32 1e-05, %v1680_v48  ;;  %v1929_v35 = vmul.f32 %v6247_v43, %v1861_v0  ;;  %v1999_v9 = vadd.f32 %v6251_v59, %v1931_v49 }
 0x2a7   :  { %v4784_v58 = vpop.eup %4783  ;;  %v1862_v11 = vmul.f32 %v4782_v23, %v5909_v51  ;;  %v1741_v57 = vadd.f32 1e-05, %v1677_v6  ;;  %v1522_v28 = vpop.xlane.xlu1 %1521  ;;  %v2119_v17 = vpack.c.bf16 %v2058_v12, %v2057_v18  ;;  %v2000_v40 = vadd.f32 %v6251_v59, %v1932_v21 }
 0x2a8   :  { %v1867_v16 = vmul.f32 %v4784_v58, %v5917_v60  ;;  %4793 = vrsqrt.f32 %v1744_v34  ;;  %v1678_v22 = vmul.f32 0.015625, %v1522_v28  ;;  %v1537_v63 = vpop.xlane.xlu0 %1536  ;;  %v1997_v26 = vadd.f32 %v6251_v59, %v1929_v35 }
 0x2a9   :  { %4795 = vrsqrt.f32 %v1741_v57  ;;  %v1683_v39 = vmul.f32 0.015625, %v1537_v63  ;;  %4551 = vmatprep.mubr.msk.bf16.mxu1 %vm1083_vm3, %v2119_v17  ;;  %v1930_v49 = vmul.f32 %v6247_v43, %v1862_v11  ;;  %v2064_v5 = vmax.f32 %v2000_v40, 0.0 }
 0x2aa   :  { %v4786_v61 = vpop.eup %4785  ;;  %v1742_v51 = vadd.f32 1e-05, %v1678_v22  ;;  %4552 = vmatmul.mubr.msk.bf16.gmra.mrb[4].mxu1 %vm1083_vm3, %v2120_v54  ;;  %v1935_v45 = vmul.f32 %v6247_v43, %v1867_v16  ;;  %v2063_v48 = vmax.f32 %v1999_v9, 0.0  ;;  %v2061_v12 = vmax.f32 %v1997_v26, 0.0 }
 0x2ab   :  { %v4788_v27 = vpop.eup %4787  ;;  %v1868_v60 = vmul.f32 %v4786_v61, %v5921_v47  ;;  %v1747_v4 = vadd.f32 1e-05, %v1683_v39  ;;  %v1540_v31 = vpop.xlane.xlu1 %1539  ;;  %v1998_v0 = vadd.f32 %v6251_v59, %v1930_v49 }
 0x2ac   :  { %v1865_v3 = vmul.f32 %v4788_v27, %v5929_v13  ;;  %4797 = vrsqrt.f32 %v1742_v51  ;;  %v1684_v18 = vmul.f32 0.015625, %v1540_v31  ;;  %v1531_v6 = vpop.xlane.xlu0 %1530  ;;  %v2122_v58 = vpack.c.bf16 %v2064_v5, %v2063_v48 }
 0x2ad   :  { %4799 = vrsqrt.f32 %v1747_v4  ;;  %v1681_v21 = vmul.f32 0.015625, %v1531_v6  ;;  %v2062_v23 = vmax.f32 %v1998_v0, 0.0  ;;  %v1936_v34 = vmul.f32 %v6247_v43, %v1868_v60 }
 0x2ae   :  { %v4790_v54 = vpop.eup %4789  ;;  %v1748_v35 = vadd.f32 1e-05, %v1684_v18  ;;  %v1933_v47 = vmul.f32 %v6247_v43, %v1865_v3  ;;  %v2003_v11 = vadd.f32 %v6251_v59, %v1935_v45 }
 0x2af   :  { %v4792_v57 = vpop.eup %4791  ;;  %v1866_v9 = vmul.f32 %v4790_v54, %v5933_v33  ;;  %v1745_v13 = vadd.f32 1e-05, %v1681_v21  ;;  %v1534_v28 = vpop.xlane.xlu1 %1533  ;;  %v2121_v17 = vpack.c.bf16 %v2062_v23, %v2061_v12  ;;  %v2004_v40 = vadd.f32 %v6251_v59, %v1936_v34 }
 0x2b0   :  { %v1871_v16 = vmul.f32 %v4792_v57, %v5941_v15  ;;  %4801 = vrsqrt.f32 %v1748_v35  ;;  %v1682_v22 = vmul.f32 0.015625, %v1534_v28  ;;  %v1272_v63 = vpop.xlane.xlu0 %1271  ;;  %v2001_v26 = vadd.f32 %v6251_v59, %v1933_v47  ;;  %v8029_v15 = vld [vmem:[#allocation18_spill] sm:$0xff] }
 0x2b1   :  { %4803 = vrsqrt.f32 %v1745_v13  ;;  %v1339_v39 = vmul.f32 0.015625, %v1272_v63  ;;  %4555 = vmatprep.mubr.msk.bf16.mxu1 %vm1083_vm3, %v2121_v17  ;;  %v1934_v49 = vmul.f32 %v6247_v43, %v1866_v9  ;;  %v2068_v51 = vmax.f32 %v2004_v40, 0.0 }
 0x2b2   :  { %v4794_v61 = vpop.eup %4793  ;;  %v1746_v33 = vadd.f32 1e-05, %v1682_v22  ;;  %4556 = vmatmul.mubr.msk.bf16.gmra.mrb[8].mxu1 %vm1083_vm3, %v2122_v58  ;;  %v1939_v5 = vmul.f32 %v6247_v43, %v1871_v16  ;;  %v2067_v0 = vmax.f32 %v2003_v11, 0.0  ;;  %v2065_v6 = vmax.f32 %v2001_v26, 0.0 }
 0x2b3   :  { %v4796_v45 = vpop.eup %4795  ;;  %v1872_v27 = vmul.f32 %v4794_v61, %v8029_v15  ;;  %v6308_v60 = vsub.f32 %v6002_v20, %v1339_v39  ;;  %v1275_v4 = vpop.xlane.xlu1 %1274  ;;  %v2002_v31 = vadd.f32 %v6251_v59, %v1934_v49 }
 0x2b4   :  { %v1869_v48 = vmul.f32 %v4796_v45, %v5956_v62  ;;  %4805 = vrsqrt.f32 %v1746_v33  ;;  %v1340_v3 = vmul.f32 0.015625, %v1275_v4  ;;  %v1543_v18 = vpop.xlane.xlu0 %1542  ;;  %v2124_v35 = vpack.c.bf16 %v2068_v51, %v2067_v0 }
 0x2b5   :  { %v1685_v12 = vmul.f32 0.015625, %v1543_v18  ;;  %v1467_v21 = vmul.f32 %v6308_v60, %v6308_v60  ;;  %v2066_v23 = vmax.f32 %v2002_v31, 0.0  ;;  %v1940_v34 = vmul.f32 %v6247_v43, %v1872_v27 }
 0x2b6   :  { %v4798_v54 = vpop.eup %4797  ;;  %v6316_v20 = vsub.f32 %v6007_v7, %v1340_v3  ;;  %v1937_v58 = vmul.f32 %v6247_v43, %v1869_v48  ;;  %v2007_v62 = vadd.f32 %v6251_v59, %v1939_v5 }
 0x2b7   :  { %v4800_v47 = vpop.eup %4799  ;;  %v1870_v11 = vmul.f32 %v4798_v54, %v5960_v41  ;;  %v1749_v57 = vadd.f32 1e-05, %v1685_v12  ;;  %v1546_v9 = vpop.xlane.xlu1 %1545  ;;  %v1655_v13 = vsel %vm1083_vm3, %v1467_v21, 0.0  ;;  %v2123_v28 = vpack.c.bf16 %v2066_v23, %v2065_v6 }
 0x2b8   :  { %v1875_v17 = vmul.f32 %v4800_v47, %v5971_v30  ;;  %v1686_v40 = vmul.f32 0.015625, %v1546_v9  ;;  %1656 = vadd.xlane.f32.xlu0 %v1655_v13  ;;  %v1549_v16 = vpop.xlane.xlu0 %1548  ;;  %v1468_v7 = vmul.f32 %v6316_v20, %v6316_v20  ;;  %v2005_v22 = vadd.f32 %v6251_v59, %v1937_v58 }
 0x2b9   :  { %4807 = vrsqrt.f32 %v1749_v57  ;;  %v1687_v63 = vmul.f32 0.015625, %v1549_v16  ;;  %4559 = vmatprep.mubr.msk.bf16.mxu1 %vm1083_vm3, %v2123_v28  ;;  %v1938_v41 = vmul.f32 %v6247_v43, %v1870_v11  ;;  %v2008_v26 = vadd.f32 %v6251_v59, %v1940_v34  ;;  %v8030_v34 = vld [vmem:[#allocation19_spill] sm:$0xff] }
 0x2ba   :  { %v4802_v39 = vpop.eup %4801  ;;  %v1750_v49 = vadd.f32 1e-05, %v1686_v40  ;;  %4560 = vmatmul.mubr.msk.bf16.gmra.mrb[12].mxu1 %vm1083_vm3, %v2124_v35  ;;  %v1658_v30 = vsel %vm1083_vm3, %v1468_v7, 0.0  ;;  %v2069_v61 = vmax.f32 %v2005_v22, 0.0  ;;  %v1943_v48 = vmul.f32 %v6247_v43, %v1875_v17 }
 0x2bb   :  { %v4804_v33 = vpop.eup %4803  ;;  %v1876_v51 = vmul.f32 %v4802_v39, %v5975_v46  ;;  %v1751_v5 = vadd.f32 1e-05, %v1687_v63  ;;  %1659 = vadd.xlane.f32.xlu1 %v1658_v30  ;;  %v1552_v45 = vpop.xlane.xlu1 %1551  ;;  %v2006_v15 = vadd.f32 %v6251_v59, %v1938_v41  ;;  %v2072_v27 = vmax.f32 %v2008_v26, 0.0 }
 0x2bc   :  { %v1873_v4 = vmul.f32 %v4804_v33, %v5986_v24  ;;  %4809 = vrsqrt.f32 %v1750_v49  ;;  %v1688_v31 = vmul.f32 0.015625, %v1552_v45  ;;  %v1555_v0 = vpop.xlane.xlu0 %1554  ;;  %v2071_v6 = vmax.f32 %v2007_v62, 0.0 }
 0x2bd   :  { %4811 = vrsqrt.f32 %v1751_v5  ;;  %v1689_v3 = vmul.f32 0.015625, %v1555_v0  ;;  %v2070_v18 = vmax.f32 %v2006_v15, 0.0  ;;  %v1944_v23 = vmul.f32 %v6247_v43, %v1876_v51 }
 0x2be   :  { %v4806_v12 = vpop.eup %4805  ;;  %v1752_v21 = vadd.f32 1e-05, %v1688_v31  ;;  %v1941_v46 = vmul.f32 %v6247_v43, %v1873_v4  ;;  %v2126_v47 = vpack.c.bf16 %v2072_v27, %v2071_v6  ;;  %v2011_v9 = vadd.f32 %v6251_v59, %v1943_v48 }
 0x2bf   :  { %v1874_v54 = vmul.f32 %v4806_v12, %v8030_v34  ;;  %v1753_v35 = vadd.f32 1e-05, %v1689_v3  ;;  %v1558_v58 = vpop.xlane.xlu1 %1557  ;;  %v2125_v24 = vpack.c.bf16 %v2070_v18, %v2069_v61  ;;  %v2012_v13 = vadd.f32 %v6251_v59, %v1944_v23 }
 0x2c0   :  { %4813 = vrsqrt.f32 %v1752_v21  ;;  %v1690_v11 = vmul.f32 0.015625, %v1558_v58  ;;  %v1561_v57 = vpop.xlane.xlu0 %1560  ;;  %v2009_v17 = vadd.f32 %v6251_v59, %v1941_v46  ;;  %v2075_v30 = vmax.f32 %v2011_v9, 0.0 }
 0x2c1   :  { %4815 = vrsqrt.f32 %v1753_v35  ;;  %v1691_v62 = vmul.f32 0.015625, %v1561_v57  ;;  %4563 = vmatprep.mubr.msk.bf16.mxu1 %vm1083_vm3, %v2125_v24  ;;  %v1942_v28 = vmul.f32 %v6247_v43, %v1874_v54  ;;  %v2076_v41 = vmax.f32 %v2012_v13, 0.0 }
 0x2c2   :  { %v1754_v40 = vadd.f32 1e-05, %v1690_v11  ;;  %4564 = vmatmul.mubr.msk.bf16.gmra.mrb[16].mxu1 %vm1083_vm3, %v2126_v47  ;;  %v2073_v33 = vmax.f32 %v2009_v17, 0.0 }
 0x2c3   :  { %v4808_v16 = vpop.eup %4807  ;;  %v1755_v7 = vadd.f32 1e-05, %v1691_v62  ;;  %v1564_v22 = vpop.xlane.xlu1 %1563  ;;  %v2010_v63 = vadd.f32 %v6251_v59, %v1942_v28  ;;  %v2128_v3 = vpack.c.bf16 %v2076_v41, %v2075_v30 }
 0x2c4   :  { %v1877_v26 = vmul.f32 %v4808_v16, %v6014_v50  ;;  %4817 = vrsqrt.f32 %v1754_v40  ;;  %v1692_v39 = vmul.f32 0.015625, %v1564_v22  ;;  %v1567_v49 = vpop.xlane.xlu0 %1566 }
 0x2c5   :  { %4819 = vrsqrt.f32 %v1755_v7  ;;  %v1693_v61 = vmul.f32 0.015625, %v1567_v49  ;;  %v2074_v51 = vmax.f32 %v2010_v63, 0.0 }
 0x2c6   :  { %v4810_v5 = vpop.eup %4809  ;;  %v1756_v45 = vadd.f32 1e-05, %v1692_v39  ;;  %v1945_v15 = vmul.f32 %v6247_v43, %v1877_v26 }
 0x2c7   :  { %v4812_v27 = vpop.eup %4811  ;;  %v1878_v4 = vmul.f32 %v4810_v5, %v6019_v29  ;;  %v1757_v31 = vadd.f32 1e-05, %v1693_v61  ;;  %v1570_v0 = vpop.xlane.xlu1 %1569  ;;  %v2127_v48 = vpack.c.bf16 %v2074_v51, %v2073_v33 }
 0x2c8   :  { %v1879_v50 = vmul.f32 %v4812_v27, %v6011_v52  ;;  %4821 = vrsqrt.f32 %v1756_v45  ;;  %v1694_v18 = vmul.f32 0.015625, %v1570_v0  ;;  %v1573_v6 = vpop.xlane.xlu0 %1572  ;;  %v2013_v12 = vadd.f32 %v6251_v59, %v1945_v15 }
 0x2c9   :  { %4823 = vrsqrt.f32 %v1757_v31  ;;  %v1695_v21 = vmul.f32 0.015625, %v1573_v6  ;;  %4567 = vmatprep.mubr.msk.bf16.mxu1 %vm1083_vm3, %v2127_v48  ;;  %v1946_v46 = vmul.f32 %v6247_v43, %v1878_v4 }
 0x2ca   :  { %v4814_v23 = vpop.eup %4813  ;;  %v1758_v34 = vadd.f32 1e-05, %v1694_v18  ;;  %4568 = vmatmul.mubr.msk.bf16.gmra.mrb[20].mxu1 %vm1083_vm3, %v2128_v3  ;;  %v1947_v29 = vmul.f32 %v6247_v43, %v1879_v50  ;;  %v2077_v47 = vmax.f32 %v2013_v12, 0.0 }
 0x2cb   :  { %v4816_v54 = vpop.eup %4815  ;;  %v1880_v52 = vmul.f32 %v4814_v23, %v6024_v1  ;;  %v1759_v35 = vadd.f32 1e-05, %v1695_v21  ;;  %v1576_v58 = vpop.xlane.xlu1 %1575  ;;  %v2014_v24 = vadd.f32 %v6251_v59, %v1946_v46 }
 0x2cc   :  { %v1881_v11 = vmul.f32 %v4816_v54, %v6040_v2  ;;  %4825 = vrsqrt.f32 %v1758_v34  ;;  %v1696_v57 = vmul.f32 0.015625, %v1576_v58  ;;  %v1579_v9 = vpop.xlane.xlu0 %1578  ;;  %v2015_v13 = vadd.f32 %v6251_v59, %v1947_v29 }
 0x2cd   :  { %4827 = vrsqrt.f32 %v1759_v35  ;;  %v1697_v62 = vmul.f32 0.015625, %v1579_v9  ;;  %v2078_v28 = vmax.f32 %v2014_v24, 0.0  ;;  %v1948_v17 = vmul.f32 %v6247_v43, %v1880_v52 }
 0x2ce   :  { %v4818_v40 = vpop.eup %4817  ;;  %v1760_v16 = vadd.f32 1e-05, %v1696_v57  ;;  %v2079_v1 = vmax.f32 %v2015_v13, 0.0  ;;  %v1949_v7 = vmul.f32 %v6247_v43, %v1881_v11 }
 0x2cf   :  { %v4820_v22 = vpop.eup %4819  ;;  %v1882_v63 = vmul.f32 %v4818_v40, %v6044_v8  ;;  %v1761_v41 = vadd.f32 1e-05, %v1697_v62  ;;  %v1582_v2 = vpop.xlane.xlu1 %1581  ;;  %v2129_v26 = vpack.c.bf16 %v2078_v28, %v2077_v47  ;;  %v2016_v39 = vadd.f32 %v6251_v59, %v1948_v17 }
 0x2d0   :  { %v1883_v49 = vmul.f32 %v4820_v22, %v6037_v53  ;;  %4829 = vrsqrt.f32 %v1760_v16  ;;  %v1698_v30 = vmul.f32 0.015625, %v1582_v2  ;;  %v1585_v61 = vpop.xlane.xlu0 %1584  ;;  %v2017_v33 = vadd.f32 %v6251_v59, %v1949_v7 }
 0x2d1   :  { %4831 = vrsqrt.f32 %v1761_v41  ;;  %v1699_v51 = vmul.f32 0.015625, %v1585_v61  ;;  %4571 = vmatprep.mubr.msk.bf16.mxu1 %vm1083_vm3, %v2129_v26  ;;  %v2080_v5 = vmax.f32 %v2016_v39, 0.0  ;;  %v1950_v45 = vmul.f32 %v6247_v43, %v1882_v63 }
 0x2d2   :  { %v4822_v8 = vpop.eup %4821  ;;  %v1762_v15 = vadd.f32 1e-05, %v1698_v30  ;;  %v2081_v27 = vmax.f32 %v2017_v33, 0.0  ;;  %v1951_v4 = vmul.f32 %v6247_v43, %v1883_v49 }
 0x2d3   :  { %v4824_v31 = vpop.eup %4823  ;;  %v1884_v53 = vmul.f32 %v4822_v8, %v6049_v37  ;;  %v1763_v0 = vadd.f32 1e-05, %v1699_v51  ;;  %v1588_v48 = vpop.xlane.xlu1 %1587  ;;  %v2130_v3 = vpack.c.bf16 %v2080_v5, %v2079_v1  ;;  %v2018_v50 = vadd.f32 %v6251_v59, %v1950_v45 }
 0x2d4   :  { %v1885_v18 = vmul.f32 %v4824_v31, %v6064_v42  ;;  %4833 = vrsqrt.f32 %v1762_v15  ;;  %v1700_v6 = vmul.f32 0.015625, %v1588_v48  ;;  %v1591_v12 = vpop.xlane.xlu0 %1590  ;;  %v2019_v21 = vadd.f32 %v6251_v59, %v1951_v4 }
 0x2d5   :  { %4835 = vrsqrt.f32 %v1763_v0  ;;  %v1701_v46 = vmul.f32 0.015625, %v1591_v12  ;;  %4572 = vmatmul.mubr.msk.bf16.gmra.mrb[24].mxu1 %vm1083_vm3, %v2130_v3  ;;  %v2082_v23 = vmax.f32 %v2018_v50, 0.0  ;;  %v1952_v34 = vmul.f32 %v6247_v43, %v1884_v53 }
 0x2d6   :  { %v4826_v37 = vpop.eup %4825  ;;  %v1764_v29 = vadd.f32 1e-05, %v1700_v6  ;;  %v2083_v54 = vmax.f32 %v2019_v21, 0.0  ;;  %v1953_v52 = vmul.f32 %v6247_v43, %v1885_v18 }
 0x2d7   :  { %v4828_v35 = vpop.eup %4827  ;;  %v1886_v42 = vmul.f32 %v4826_v37, %v6068_v36  ;;  %v1765_v58 = vadd.f32 1e-05, %v1701_v46  ;;  %v1594_v24 = vpop.xlane.xlu1 %1593  ;;  %v2131_v47 = vpack.c.bf16 %v2082_v23, %v2081_v27  ;;  %v2020_v11 = vadd.f32 %v6251_v59, %v1952_v34 }
 0x2d8   :  { %v1887_v57 = vmul.f32 %v4828_v35, %v6061_v14  ;;  %4837 = vrsqrt.f32 %v1764_v29  ;;  %v1702_v9 = vmul.f32 0.015625, %v1594_v24  ;;  %v1597_v13 = vpop.xlane.xlu0 %1596  ;;  %v2021_v62 = vadd.f32 %v6251_v59, %v1953_v52 }
 0x2d9   :  { %4839 = vrsqrt.f32 %v1765_v58  ;;  %v1703_v28 = vmul.f32 0.015625, %v1597_v13  ;;  %4575 = vmatprep.mubr.msk.bf16.mxu1 %vm1083_vm3, %v2131_v47  ;;  %v2084_v17 = vmax.f32 %v2020_v11, 0.0  ;;  %v1954_v40 = vmul.f32 %v6247_v43, %v1886_v42 }
 0x2da   :  { %v4830_v36 = vpop.eup %4829  ;;  %v1766_v16 = vadd.f32 1e-05, %v1702_v9  ;;  %v2085_v1 = vmax.f32 %v2021_v62, 0.0  ;;  %v1955_v7 = vmul.f32 %v6247_v43, %v1887_v57 }
 0x2db   :  { %v4832_v22 = vpop.eup %4831  ;;  %v1888_v14 = vmul.f32 %v4830_v36, %v6073_v19  ;;  %v1767_v63 = vadd.f32 1e-05, %v1703_v28  ;;  %v1600_v41 = vpop.xlane.xlu1 %1599  ;;  %v2132_v2 = vpack.c.bf16 %v2084_v17, %v2083_v54  ;;  %v2022_v26 = vadd.f32 %v6251_v59, %v1954_v40 }
 0x2dc   :  { %v1889_v39 = vmul.f32 %v4832_v22, %v6088_v25  ;;  %4841 = vrsqrt.f32 %v1766_v16  ;;  %v1704_v49 = vmul.f32 0.015625, %v1600_v41  ;;  %v1603_v30 = vpop.xlane.xlu0 %1602  ;;  %v2023_v61 = vadd.f32 %v6251_v59, %v1955_v7 }
 0x2dd   :  { %4843 = vrsqrt.f32 %v1767_v63  ;;  %v1705_v33 = vmul.f32 0.015625, %v1603_v30  ;;  %4576 = vmatmul.mubr.msk.bf16.gmra.mrb[28].mxu1 %vm1083_vm3, %v2132_v2  ;;  %v2086_v51 = vmax.f32 %v2022_v26, 0.0  ;;  %v1956_v5 = vmul.f32 %v6247_v43, %v1888_v14 }
 0x2de   :  { %v4834_v19 = vpop.eup %4833  ;;  %v1768_v45 = vadd.f32 1e-05, %v1704_v49  ;;  %v2087_v8 = vmax.f32 %v2023_v61, 0.0  ;;  %v1957_v15 = vmul.f32 %v6247_v43, %v1889_v39 }
 0x2df   :  { %v4836_v27 = vpop.eup %4835  ;;  %v1890_v25 = vmul.f32 %v4834_v19, %v6092_v55  ;;  %v1769_v4 = vadd.f32 1e-05, %v1705_v33  ;;  %v1606_v31 = vpop.xlane.xlu1 %1605  ;;  %v2133_v53 = vpack.c.bf16 %v2086_v51, %v2085_v1  ;;  %v2024_v0 = vadd.f32 %v6251_v59, %v1956_v5  ;;  %v8031_v33 = vld [vmem:[#allocation20_spill] sm:$0xff] }
 0x2e0   :  { %v1891_v48 = vmul.f32 %v4836_v27, %v6085_v38  ;;  %4845 = vrsqrt.f32 %v1768_v45  ;;  %v1706_v3 = vmul.f32 0.015625, %v1606_v31  ;;  %v1609_v50 = vpop.xlane.xlu0 %1608  ;;  %v2025_v18 = vadd.f32 %v6251_v59, %v1957_v15 }
 0x2e1   :  { %4847 = vrsqrt.f32 %v1769_v4  ;;  %v1707_v6 = vmul.f32 0.015625, %v1609_v50  ;;  %4579 = vmatprep.mubr.msk.bf16.mxu1 %vm1083_vm3, %v2133_v53  ;;  %v2088_v12 = vmax.f32 %v2024_v0, 0.0  ;;  %v1958_v21 = vmul.f32 %v6247_v43, %v1890_v25 }
 0x2e2   :  { %v4838_v55 = vpop.eup %4837  ;;  %v1770_v46 = vadd.f32 1e-05, %v1706_v3  ;;  %v2089_v23 = vmax.f32 %v2025_v18, 0.0  ;;  %v1959_v34 = vmul.f32 %v6247_v43, %v1891_v48 }
 0x2e3   :  { %v4840_v37 = vpop.eup %4839  ;;  %v1892_v38 = vmul.f32 %v4838_v55, %v6097_v56  ;;  %v1771_v29 = vadd.f32 1e-05, %v1707_v6  ;;  %v1612_v54 = vpop.xlane.xlu1 %1611  ;;  %v2134_v52 = vpack.c.bf16 %v2088_v12, %v2087_v8  ;;  %v2026_v35 = vadd.f32 %v6251_v59, %v1958_v21  ;;  %v8032_v8 = vld [vmem:[#allocation22_spill] sm:$0xff]  ;;  %v8033_v12 = vld [vmem:[#allocation23_spill] sm:$0xff] }
 0x2e4   :  { %v1893_v42 = vmul.f32 %v4840_v37, %v6112_v44  ;;  %4849 = vrsqrt.f32 %v1770_v46  ;;  %v1708_v58 = vmul.f32 0.015625, %v1612_v54  ;;  %v1615_v24 = vpop.xlane.xlu0 %1614  ;;  %v2027_v47 = vadd.f32 %v6251_v59, %v1959_v34  ;;  %v8034_v37 = vld [vmem:[#allocation21_spill] sm:$0xff] }
 0x2e5   :  { %4851 = vrsqrt.f32 %v1771_v29  ;;  %v1709_v11 = vmul.f32 0.015625, %v1615_v24  ;;  %4580 = vmatmul.mubr.msk.bf16.gmra.mrb[32].mxu1 %vm1083_vm3, %v2134_v52  ;;  %v2090_v57 = vmax.f32 %v2026_v35, 0.0  ;;  %v1960_v9 = vmul.f32 %v6247_v43, %v1892_v38 }
 0x2e6   :  { %v4842_v56 = vpop.eup %4841  ;;  %v1772_v13 = vadd.f32 1e-05, %v1708_v58  ;;  %v2091_v62 = vmax.f32 %v2027_v47, 0.0  ;;  %v1961_v28 = vmul.f32 %v6247_v43, %v1893_v42 }
 0x2e7   :  { %v4844_v17 = vpop.eup %4843  ;;  %v1894_v44 = vmul.f32 %v4842_v56, %v6116_v10  ;;  %v1773_v40 = vadd.f32 1e-05, %v1709_v11  ;;  %v1618_v36 = vpop.xlane.xlu1 %1617  ;;  %v2135_v16 = vpack.c.bf16 %v2090_v57, %v2089_v23  ;;  %v2028_v1 = vadd.f32 %v6251_v59, %v1960_v9  ;;  %v8035_v56 = vld [vmem:[#allocation24_spill] sm:$0xff] }
 0x2e8   :  { %v1895_v7 = vmul.f32 %v4844_v17, %v6109_v32  ;;  %4853 = vrsqrt.f32 %v1772_v13  ;;  %v1710_v22 = vmul.f32 0.015625, %v1618_v36  ;;  %v1621_v14 = vpop.xlane.xlu0 %1620  ;;  %v2029_v63 = vadd.f32 %v6251_v59, %v1961_v28 }
 0x2e9   :  { %4855 = vrsqrt.f32 %v1773_v40  ;;  %v1711_v41 = vmul.f32 0.015625, %v1621_v14  ;;  %4583 = vmatprep.mubr.msk.bf16.mxu1 %vm1083_vm3, %v2135_v16  ;;  %v2092_v2 = vmax.f32 %v2028_v1, 0.0  ;;  %v1962_v26 = vmul.f32 %v6247_v43, %v1894_v44  ;;  %v8036_v40 = vld [vmem:[#allocation5_spill] sm:$0xff] }
 0x2ea   :  { %v4846_v10 = vpop.eup %4845  ;;  %v1774_v39 = vadd.f32 1e-05, %v1710_v22  ;;  %v2093_v49 = vmax.f32 %v2029_v63, 0.0  ;;  %v1963_v30 = vmul.f32 %v6247_v43, %v1895_v7 }
 0x2eb   :  { %v4848_v61 = vpop.eup %4847  ;;  %v1896_v32 = vmul.f32 %v4846_v10, %v8031_v33  ;;  %v1775_v51 = vadd.f32 1e-05, %v1711_v41  ;;  %v1624_v5 = vpop.xlane.xlu1 %1623  ;;  %v2136_v19 = vpack.c.bf16 %v2092_v2, %v2091_v62  ;;  %v2030_v45 = vadd.f32 %v6251_v59, %v1962_v26 }
 0x2ec   :  { %v1897_v15 = vmul.f32 %v4848_v61, %v8032_v8  ;;  %4857 = vrsqrt.f32 %v1774_v39  ;;  %v1712_v27 = vmul.f32 0.015625, %v1624_v5  ;;  %v1627_v25 = vpop.xlane.xlu0 %1626  ;;  %v2031_v4 = vadd.f32 %v6251_v59, %v1963_v30  ;;  %v8038_v5 = vld [vmem:[#allocation3_spill] sm:$0xff] }
 0x2ed   :  { %4859 = vrsqrt.f32 %v1775_v51  ;;  %v1713_v31 = vmul.f32 0.015625, %v1627_v25  ;;  %4584 = vmatmul.mubr.msk.bf16.gmra.mrb[36].mxu1 %vm1083_vm3, %v2136_v19  ;;  %v2094_v53 = vmax.f32 %v2030_v45, 0.0  ;;  %v1964_v0 = vmul.f32 %v6247_v43, %v1896_v32 }
 0x2ee   :  { %v4850_v48 = vpop.eup %4849  ;;  %v1776_v3 = vadd.f32 1e-05, %v1712_v27  ;;  %v2095_v50 = vmax.f32 %v2031_v4, 0.0  ;;  %v1965_v18 = vmul.f32 %v6247_v43, %v1897_v15 }
 0x2ef   :  { %v4852_v6 = vpop.eup %4851  ;;  %v1898_v21 = vmul.f32 %v4850_v48, %v8033_v12  ;;  %v1777_v55 = vadd.f32 1e-05, %v1713_v31  ;;  %v1630_v46 = vpop.xlane.xlu1 %1629  ;;  %v2137_v23 = vpack.c.bf16 %v2094_v53, %v2093_v49  ;;  %v2032_v34 = vadd.f32 %v6251_v59, %v1964_v0  ;;  %v8037_v49 = vld [vmem:[#allocation6_spill] sm:$0xff] }
 0x2f0   :  { %v1899_v38 = vmul.f32 %v4852_v6, %v8034_v37  ;;  %4861 = vrsqrt.f32 %v1776_v3  ;;  %v1714_v29 = vmul.f32 0.015625, %v1630_v46  ;;  %v1633_v54 = vpop.xlane.xlu0 %1632  ;;  %v2033_v52 = vadd.f32 %v6251_v59, %v1965_v18  ;;  %v8040_v46 = vld [vmem:[#allocation9_spill] sm:$0xff] }
 0x2f1   :  { %4863 = vrsqrt.f32 %v1777_v55  ;;  %v1715_v35 = vmul.f32 0.015625, %v1633_v54  ;;  %4587 = vmatprep.mubr.msk.bf16.mxu1 %vm1083_vm3, %v2137_v23  ;;  %v2096_v42 = vmax.f32 %v2032_v34, 0.0  ;;  %v1966_v58 = vmul.f32 %v6247_v43, %v1898_v21 }
 0x2f2   :  { %v4854_v24 = vpop.eup %4853  ;;  %v1778_v47 = vadd.f32 1e-05, %v1714_v29  ;;  %v2097_v11 = vmax.f32 %v2033_v52, 0.0  ;;  %v1967_v57 = vmul.f32 %v6247_v43, %v1899_v38 }
 0x2f3   :  { %v4856_v9 = vpop.eup %4855  ;;  %v1900_v13 = vmul.f32 %v4854_v24, %v8035_v56  ;;  %v1779_v62 = vadd.f32 1e-05, %v1715_v35  ;;  %v1636_v28 = vpop.xlane.xlu1 %1635  ;;  %v2138_v17 = vpack.c.bf16 %v2096_v42, %v2095_v50  ;;  %v2034_v44 = vadd.f32 %v6251_v59, %v1966_v58  ;;  %v8039_v50 = vld [vmem:[#allocation4_spill] sm:$0xff] }
 0x2f4   :  { %v1901_v36 = vmul.f32 %v4856_v9, %v8036_v40  ;;  %4865 = vrsqrt.f32 %v1778_v47  ;;  %v1716_v16 = vmul.f32 0.015625, %v1636_v28  ;;  %v1639_v1 = vpop.xlane.xlu0 %1638  ;;  %v2035_v7 = vadd.f32 %v6251_v59, %v1967_v57  ;;  %v8041_v47 = vld [vmem:[#allocation10_spill] sm:$0xff] }
 0x2f5   :  { %4867 = vrsqrt.f32 %v1779_v62  ;;  %v1717_v22 = vmul.f32 0.015625, %v1639_v1  ;;  %4588 = vmatmul.mubr.msk.bf16.gmra.mrb[40].mxu1 %vm1083_vm3, %v2138_v17  ;;  %v2098_v14 = vmax.f32 %v2034_v44, 0.0  ;;  %v1968_v63 = vmul.f32 %v6247_v43, %v1900_v13  ;;  %v8042_v62 = vld [vmem:[#allocation7_spill] sm:$0xff] }
 0x2f6   :  { %v4858_v41 = vpop.eup %4857  ;;  %v1780_v2 = vadd.f32 1e-05, %v1716_v16  ;;  %v2099_v26 = vmax.f32 %v2035_v7, 0.0  ;;  %v1969_v10 = vmul.f32 %v6247_v43, %v1901_v36 }
 0x2f7   :  { %v4860_v39 = vpop.eup %4859  ;;  %v1902_v30 = vmul.f32 %v4858_v41, %v8037_v49  ;;  %v1781_v61 = vadd.f32 1e-05, %v1717_v22  ;;  %v1642_v33 = vpop.xlane.xlu1 %1641  ;;  %v2139_v32 = vpack.c.bf16 %v2098_v14, %v2097_v11  ;;  %v2036_v51 = vadd.f32 %v6251_v59, %v1968_v63  ;;  %v8043_v63 = vld [vmem:[#allocation8_spill] sm:$0xff] }
 0x2f8   :  { %v1903_v19 = vmul.f32 %v4860_v39, %v8038_v5  ;;  %4869 = vrsqrt.f32 %v1780_v2  ;;  %v1718_v45 = vmul.f32 0.015625, %v1642_v33  ;;  %v1645_v8 = vpop.xlane.xlu0 %1644  ;;  %v2037_v15 = vadd.f32 %v6251_v59, %v1969_v10  ;;  %v8044_v10 = vld [vmem:[#allocation13_spill] sm:$0xff] }
 0x2f9   :  { %4871 = vrsqrt.f32 %v1781_v61  ;;  %v1719_v27 = vmul.f32 0.015625, %v1645_v8  ;;  %4591 = vmatprep.mubr.msk.bf16.mxu1 %vm1083_vm3, %v2139_v32  ;;  %v2100_v25 = vmax.f32 %v2036_v51, 0.0  ;;  %v1970_v4 = vmul.f32 %v6247_v43, %v1902_v30 }
 0x2fa   :  { %v4862_v31 = vpop.eup %4861  ;;  %v1782_v53 = vadd.f32 1e-05, %v1718_v45  ;;  %v2101_v0 = vmax.f32 %v2037_v15, 0.0  ;;  %v1971_v48 = vmul.f32 %v6247_v43, %v1903_v19  ;;  %v8045_v19 = vld [vmem:[#allocation14_spill] sm:$0xff] }
 0x2fb   :  { %v4864_v3 = vpop.eup %4863  ;;  %v1904_v18 = vmul.f32 %v4862_v31, %v8039_v50  ;;  %v1783_v6 = vadd.f32 1e-05, %v1719_v27  ;;  %v1648_v12 = vpop.xlane.xlu1 %1647  ;;  %v2140_v21 = vpack.c.bf16 %v2100_v25, %v2099_v26  ;;  %v2038_v55 = vadd.f32 %v6251_v59, %v1970_v4  ;;  %v8046_v27 = vld [vmem:[#allocation11_spill] sm:$0xff] }
 0x2fc   :  { %v1905_v23 = vmul.f32 %v4864_v3, %v8040_v46  ;;  %4873 = vrsqrt.f32 %v1782_v53  ;;  %v1720_v34 = vmul.f32 0.015625, %v1648_v12  ;;  %v1651_v37 = vpop.xlane.xlu0 %1650  ;;  %v2039_v38 = vadd.f32 %v6251_v59, %v1971_v48 }
 0x2fd   :  { %4875 = vrsqrt.f32 %v1783_v6  ;;  %v1721_v29 = vmul.f32 0.015625, %v1651_v37  ;;  %4592 = vmatmul.mubr.msk.bf16.gmra.mrb[44].mxu1 %vm1083_vm3, %v2140_v21  ;;  %v2102_v54 = vmax.f32 %v2038_v55, 0.0  ;;  %v1972_v52 = vmul.f32 %v6247_v43, %v1904_v18  ;;  %v8047_v18 = vld [vmem:[#allocation12_spill] sm:$0xff]  ;;  %v8048_v55 = vld [vmem:[#allocation15_spill] sm:$0xff] }
 0x2fe   :  { %v4866_v35 = vpop.eup %4865  ;;  %v1784_v42 = vadd.f32 1e-05, %v1720_v34  ;;  %v1973_v58 = vmul.f32 %v6247_v43, %v1905_v23  ;;  %v2103_v44 = vmax.f32 %v2039_v38, 0.0 }
 0x2ff   :  { %v4868_v24 = vpop.eup %4867  ;;  %v1906_v11 = vmul.f32 %v4866_v35, %v8041_v47  ;;  %v1785_v57 = vadd.f32 1e-05, %v1721_v29  ;;  %v1654_v9 = vpop.xlane.xlu1 %1653  ;;  %v2141_v56 = vpack.c.bf16 %v2102_v54, %v2101_v0  ;;  %v2040_v13 = vadd.f32 %v6251_v59, %v1972_v52  ;;  %v8049_v52 = vld [vmem:[#allocation16_spill] sm:$0xff] }
 0x300   :  { %v1907_v28 = vmul.f32 %v4868_v24, %v8042_v62  ;;  %4877 = vrsqrt.f32 %v1784_v42  ;;  %v1722_v17 = vmul.f32 0.015625, %v1654_v9  ;;  %v2041_v16 = vadd.f32 %v6251_v59, %v1973_v58 }
 0x301   :  { %4879 = vrsqrt.f32 %v1785_v57  ;;  %4595 = vmatprep.mubr.msk.bf16.mxu1 %vm1083_vm3, %v2141_v56  ;;  %v2104_v40 = vmax.f32 %v2040_v13, 0.0  ;;  %v1974_v36 = vmul.f32 %v6247_v43, %v1906_v11 }
 0x302   :  { %v4870_v1 = vpop.eup %4869  ;;  %v1786_v7 = vadd.f32 1e-05, %v1722_v17  ;;  %v1975_v22 = vmul.f32 %v6247_v43, %v1907_v28  ;;  %v2105_v49 = vmax.f32 %v2041_v16, 0.0 }
 0x303   :  { %v4872_v14 = vpop.eup %4871  ;;  %v1908_v41 = vmul.f32 %v4870_v1, %v8043_v63  ;;  %v2142_v2 = vpack.c.bf16 %v2104_v40, %v2103_v44  ;;  %v2042_v26 = vadd.f32 %v6251_v59, %v1974_v36 }
 0x304   :  { %v1909_v39 = vmul.f32 %v4872_v14, %v8044_v10  ;;  %4881 = vrsqrt.f32 %v1786_v7  ;;  %v2043_v33 = vadd.f32 %v6251_v59, %v1975_v22 }
 0x305   :  { %4596 = vmatmul.mubr.msk.bf16.gmra.mrb[48].mxu1 %vm1083_vm3, %v2142_v2  ;;  %v2106_v30 = vmax.f32 %v2042_v26, 0.0  ;;  %v1976_v61 = vmul.f32 %v6247_v43, %v1908_v41 }
 0x306   :  { %v4874_v32 = vpop.eup %4873  ;;  %v1977_v51 = vmul.f32 %v6247_v43, %v1909_v39  ;;  %v2107_v4 = vmax.f32 %v2043_v33, 0.0 }
 0x307   :  { %v4876_v5 = vpop.eup %4875  ;;  %v1910_v45 = vmul.f32 %v4874_v32, %v8045_v19  ;;  %v2143_v8 = vpack.c.bf16 %v2106_v30, %v2105_v49  ;;  %v2044_v15 = vadd.f32 %v6251_v59, %v1976_v61  ;;  %v8050_v61 = vld [vmem:[#allocation2_spill] sm:$0xff] }
 0x308   :  { %v1911_v25 = vmul.f32 %v4876_v5, %v8046_v27  ;;  %v2045_v0 = vadd.f32 %v6251_v59, %v1977_v51  ;;  %v2159_v33 = vsub.s32 3, %v8050_v61 }
 0x309   :  { %4599 = vmatprep.mubr.msk.bf16.mxu1 %vm1083_vm3, %v2143_v8  ;;  %v2108_v31 = vmax.f32 %v2044_v15, 0.0  ;;  %v1978_v53 = vmul.f32 %v6247_v43, %v1910_v45 }
 0x30a   :  { %v4878_v48 = vpop.eup %4877  ;;  %v1979_v3 = vmul.f32 %v6247_v43, %v1911_v25  ;;  %v2109_v23 = vmax.f32 %v2045_v0, 0.0 }
 0x30b   :  { %v4880_v50 = vpop.eup %4879  ;;  %v1912_v6 = vmul.f32 %v4878_v48, %v8047_v18  ;;  %v2144_v12 = vpack.c.bf16 %v2108_v31, %v2107_v4  ;;  %v2046_v21 = vadd.f32 %v6251_v59, %v1978_v53 }
 0x30c   :  { %v1913_v46 = vmul.f32 %v4880_v50, %v8048_v55  ;;  %v2047_v38 = vadd.f32 %v6251_v59, %v1979_v3 }
 0x30d   :  { %4600 = vmatmul.mubr.msk.bf16.gmra.mrb[52].mxu1 %vm1083_vm3, %v2144_v12  ;;  %v2110_v34 = vmax.f32 %v2046_v21, 0.0  ;;  %v1980_v37 = vmul.f32 %v6247_v43, %v1912_v6 }
 0x30e   :  { %v4882_v29 = vpop.eup %4881  ;;  %v1981_v54 = vmul.f32 %v6247_v43, %v1913_v46  ;;  %v2111_v24 = vmax.f32 %v2047_v38, 0.0 }
 0x30f   :  { %v1914_v35 = vmul.f32 %v4882_v29, %v8049_v52  ;;  %v2145_v42 = vpack.c.bf16 %v2110_v34, %v2109_v23  ;;  %v2048_v58 = vadd.f32 %v6251_v59, %v1980_v37 }
 0x310   :  { %v2049_v57 = vadd.f32 %v6251_v59, %v1981_v54 }
 0x311   :  { %4603 = vmatprep.mubr.msk.bf16.mxu1 %vm1083_vm3, %v2145_v42  ;;  %v2112_v47 = vmax.f32 %v2048_v58, 0.0  ;;  %v1982_v11 = vmul.f32 %v6247_v43, %v1914_v35 }
 0x312   :  { %v2113_v13 = vmax.f32 %v2049_v57, 0.0 }
 0x313   :  { %v2146_v9 = vpack.c.bf16 %v2112_v47, %v2111_v24  ;;  %v2050_v56 = vadd.f32 %v6251_v59, %v1982_v11 }
 0x315   :  { %4604 = vmatmul.mubr.msk.bf16.gmra.mrb[56].mxu1 %vm1083_vm3, %v2146_v9  ;;  %v2114_v62 = vmax.f32 %v2050_v56, 0.0 }
 0x317   :  { %v2147_v28 = vpack.c.bf16 %v2114_v62, %v2113_v13 }
 0x319   :  { %4607 = vmatprep.mubr.msk.bf16.mxu1 %vm1083_vm3, %v2147_v28 }
 0x345   :  { %v1657_v17 = vpop.xlane.xlu0 %1656 }
 0x346   :  { %v1723_v44 = vmul.f32 0.015625, %v1657_v17 }
 0x348   :  { %v1787_v40 = vadd.f32 1e-05, %v1723_v44  ;;  %v1660_v36 = vpop.xlane.xlu1 %1659 }
 0x349   :  { %v1724_v16 = vmul.f32 0.015625, %v1660_v36 }
 0x34a   :  { %4883 = vrsqrt.f32 %v1787_v40 }
 0x34b   :  { %v1788_v1 = vadd.f32 1e-05, %v1724_v16 }
 0x34d   :  { %4885 = vrsqrt.f32 %v1788_v1 }
 0x354   :  { %v4884_v7 = vpop.eup %4883 }
 0x355   :  { %v1915_v22 = vmul.f32 %v4884_v7, %v6308_v60  ;;  %v5016_v60 = vld [vmem:[%s7879_s6] sm:$0x3f] }
 0x356   :  { %v6491_v32 = vrot.slane %v5016_v60, %v2159_v33 }
 0x357   :  { %v4886_v14 = vpop.eup %4885  ;;  %v1983_v63 = vmul.f32 %v6247_v43, %v1915_v22 }
 0x358   :  { %v1916_v41 = vmul.f32 %v4886_v14, %v6316_v20 }
 0x359   :  { %v2051_v26 = vadd.f32 %v6251_v59, %v1983_v63 }
 0x35a   :  { %v1984_v2 = vmul.f32 %v6247_v43, %v1916_v41 }
 0x35b   :  { %v2115_v39 = vmax.f32 %v2051_v26, 0.0 }
 0x35c   :  { %v2052_v10 = vadd.f32 %v6251_v59, %v1984_v2 }
 0x35e   :  { %v2116_v49 = vmax.f32 %v2052_v10, 0.0 }
 0x360   :  { %v2148_v30 = vpack.c.bf16 %v2116_v49, %v2115_v39 }
 0x362   :  { %4608 = vmatmul.mubr.msk.bf16.gmra.mrb[60].mxu1 %vm1083_vm3, %v2148_v30 }
 0x375   :  { %v4549_v20 = vpop.f32.mrb[0].mxu1 }
 0x376   :  { %v6494_v43 = vadd.f32 %v4549_v20, %v6491_v32  ;;  %v2315_v51 = vpop.f32.mrb[1].mxu1 }
 0x377   :  { %v4550_v5 = vpop.f32.mrb[2].mxu1  ;;  %v6497_v59 = vadd.f32 %v2315_v51, %v6491_v32 }
 0x378   :  { %v6500_v19 = vadd.f32 %v4550_v5, %v6491_v32  ;;  %v2318_v45 = vpop.f32.mrb[3].mxu1  ;;  %v2576_v8 = vsel %vm1083_vm3, %v6494_v43, 0.0 }
 0x379   :  { %2577 = vadd.xlane.f32.xlu0 %v2576_v8  ;;  %v6505_v15 = vadd.f32 %v2318_v45, %v6491_v32  ;;  %v2570_v25 = vsel %vm1083_vm3, %v6497_v59, 0.0 }
 0x37a   :  { %v2579_v27 = vsel %vm1083_vm3, %v6500_v19, 0.0 }
 0x37b   :  { %2580 = vadd.xlane.f32.xlu1 %v2579_v27  ;;  %v2573_v0 = vsel %vm1083_vm3, %v6505_v15, 0.0 }
 0x37d   :  { %2571 = vadd.xlane.f32.xlu0 %v2570_v25  ;;  %v4553_v4 = vpop.f32.mrb[4].mxu1 }
 0x37e   :  { %v6512_v31 = vadd.f32 %v4553_v4, %v6491_v32  ;;  %v2331_v53 = vpop.f32.mrb[5].mxu1 }
 0x37f   :  { %v4554_v48 = vpop.f32.mrb[6].mxu1  ;;  %2574 = vadd.xlane.f32.xlu1 %v2573_v0  ;;  %v6517_v3 = vadd.f32 %v2331_v53, %v6491_v32 }
 0x380   :  { %v6520_v50 = vadd.f32 %v4554_v48, %v6491_v32  ;;  %v2334_v18 = vpop.f32.mrb[7].mxu1  ;;  %v2588_v6 = vsel %vm1083_vm3, %v6512_v31, 0.0 }
 0x381   :  { %2589 = vadd.xlane.f32.xlu0 %v2588_v6  ;;  %v6525_v12 = vadd.f32 %v2334_v18, %v6491_v32  ;;  %v2582_v55 = vsel %vm1083_vm3, %v6517_v3, 0.0 }
 0x382   :  { %v2591_v21 = vsel %vm1083_vm3, %v6520_v50, 0.0 }
 0x383   :  { %2592 = vadd.xlane.f32.xlu1 %v2591_v21  ;;  %v2585_v37 = vsel %vm1083_vm3, %v6525_v12, 0.0 }
 0x385   :  { %2583 = vadd.xlane.f32.xlu0 %v2582_v55  ;;  %v4557_v46 = vpop.f32.mrb[8].mxu1 }
 0x386   :  { %v6532_v23 = vadd.f32 %v4557_v46, %v6491_v32  ;;  %v2347_v34 = vpop.f32.mrb[9].mxu1 }
 0x387   :  { %v4558_v38 = vpop.f32.mrb[10].mxu1  ;;  %2586 = vadd.xlane.f32.xlu1 %v2585_v37  ;;  %v6537_v29 = vadd.f32 %v2347_v34, %v6491_v32 }
 0x388   :  { %v6540_v54 = vadd.f32 %v4558_v38, %v6491_v32  ;;  %v2350_v52 = vpop.f32.mrb[11].mxu1  ;;  %v2600_v35 = vsel %vm1083_vm3, %v6532_v23, 0.0 }
 0x389   :  { %2601 = vadd.xlane.f32.xlu0 %v2600_v35  ;;  %v6545_v42 = vadd.f32 %v2350_v52, %v6491_v32  ;;  %v2594_v24 = vsel %vm1083_vm3, %v6537_v29, 0.0 }
 0x38a   :  { %v2603_v58 = vsel %vm1083_vm3, %v6540_v54, 0.0 }
 0x38b   :  { %2604 = vadd.xlane.f32.xlu1 %v2603_v58  ;;  %v2597_v9 = vsel %vm1083_vm3, %v6545_v42, 0.0 }
 0x38d   :  { %2595 = vadd.xlane.f32.xlu0 %v2594_v24  ;;  %v4561_v47 = vpop.f32.mrb[12].mxu1 }
 0x38e   :  { %v6552_v11 = vadd.f32 %v4561_v47, %v6491_v32  ;;  %v2363_v57 = vpop.f32.mrb[13].mxu1 }
 0x38f   :  { %v4562_v56 = vpop.f32.mrb[14].mxu1  ;;  %2598 = vadd.xlane.f32.xlu1 %v2597_v9  ;;  %v6557_v13 = vadd.f32 %v2363_v57, %v6491_v32 }
 0x390   :  { %v6560_v62 = vadd.f32 %v4562_v56, %v6491_v32  ;;  %v2366_v28 = vpop.f32.mrb[15].mxu1  ;;  %v2612_v17 = vsel %vm1083_vm3, %v6552_v11, 0.0 }
 0x391   :  { %2613 = vadd.xlane.f32.xlu0 %v2612_v17  ;;  %v6565_v44 = vadd.f32 %v2366_v28, %v6491_v32  ;;  %v2606_v36 = vsel %vm1083_vm3, %v6557_v13, 0.0 }
 0x392   :  { %v2615_v40 = vsel %vm1083_vm3, %v6560_v62, 0.0 }
 0x393   :  { %2616 = vadd.xlane.f32.xlu1 %v2615_v40  ;;  %v2609_v22 = vsel %vm1083_vm3, %v6565_v44, 0.0 }
 0x395   :  { %2607 = vadd.xlane.f32.xlu0 %v2606_v36  ;;  %v4565_v16 = vpop.f32.mrb[16].mxu1 }
 0x396   :  { %v6572_v1 = vadd.f32 %v4565_v16, %v6491_v32  ;;  %v2379_v7 = vpop.f32.mrb[17].mxu1 }
 0x397   :  { %v4566_v14 = vpop.f32.mrb[18].mxu1  ;;  %2610 = vadd.xlane.f32.xlu1 %v2609_v22  ;;  %v6577_v63 = vadd.f32 %v2379_v7, %v6491_v32 }
 0x398   :  { %v6580_v41 = vadd.f32 %v4566_v14, %v6491_v32  ;;  %v2382_v2 = vpop.f32.mrb[19].mxu1  ;;  %v2624_v26 = vsel %vm1083_vm3, %v6572_v1, 0.0 }
 0x399   :  { %2625 = vadd.xlane.f32.xlu0 %v2624_v26  ;;  %v6585_v10 = vadd.f32 %v2382_v2, %v6491_v32  ;;  %v2618_v49 = vsel %vm1083_vm3, %v6577_v63, 0.0 }
 0x39a   :  { %v2627_v39 = vsel %vm1083_vm3, %v6580_v41, 0.0 }
 0x39b   :  { %2628 = vadd.xlane.f32.xlu1 %v2627_v39  ;;  %v2621_v20 = vsel %vm1083_vm3, %v6585_v10, 0.0 }
 0x39d   :  { %2619 = vadd.xlane.f32.xlu0 %v2618_v49  ;;  %v4569_v30 = vpop.f32.mrb[20].mxu1 }
 0x39e   :  { %v6592_v33 = vadd.f32 %v4569_v30, %v6491_v32  ;;  %v2395_v60 = vpop.f32.mrb[21].mxu1 }
 0x39f   :  { %v4570_v51 = vpop.f32.mrb[22].mxu1  ;;  %2622 = vadd.xlane.f32.xlu1 %v2621_v20  ;;  %v6597_v5 = vadd.f32 %v2395_v60, %v6491_v32 }
 0x3a0   :  { %v6600_v45 = vadd.f32 %v4570_v51, %v6491_v32  ;;  %v2398_v8 = vpop.f32.mrb[23].mxu1  ;;  %v2636_v27 = vsel %vm1083_vm3, %v6592_v33, 0.0 }
 0x3a1   :  { %2637 = vadd.xlane.f32.xlu0 %v2636_v27  ;;  %v6605_v25 = vadd.f32 %v2398_v8, %v6491_v32  ;;  %v2630_v53 = vsel %vm1083_vm3, %v6597_v5, 0.0 }
 0x3a2   :  { %v2639_v4 = vsel %vm1083_vm3, %v6600_v45, 0.0 }
 0x3a3   :  { %2640 = vadd.xlane.f32.xlu1 %v2639_v4  ;;  %v2633_v0 = vsel %vm1083_vm3, %v6605_v25, 0.0 }
 0x3a5   :  { %2631 = vadd.xlane.f32.xlu0 %v2630_v53 }
 0x3a7   :  { %2634 = vadd.xlane.f32.xlu1 %v2633_v0 }
 0x3a8   :  { %v4573_v48 = vpop.f32.mrb[24].mxu1 }
 0x3a9   :  { %v6614_v18 = vadd.f32 %v4573_v48, %v6491_v32  ;;  %v2411_v6 = vpop.f32.mrb[25].mxu1 }
 0x3aa   :  { %v4574_v21 = vpop.f32.mrb[26].mxu1  ;;  %v6617_v55 = vadd.f32 %v2411_v6, %v6491_v32 }
 0x3ab   :  { %v6620_v46 = vadd.f32 %v4574_v21, %v6491_v32  ;;  %v2414_v34 = vpop.f32.mrb[27].mxu1  ;;  %v2648_v37 = vsel %vm1083_vm3, %v6614_v18, 0.0 }
 0x3ac   :  { %2649 = vadd.xlane.f32.xlu0 %v2648_v37  ;;  %v6625_v38 = vadd.f32 %v2414_v34, %v6491_v32  ;;  %v2642_v35 = vsel %vm1083_vm3, %v6617_v55, 0.0 }
 0x3ad   :  { %v2651_v52 = vsel %vm1083_vm3, %v6620_v46, 0.0 }
 0x3ae   :  { %2652 = vadd.xlane.f32.xlu1 %v2651_v52  ;;  %v2645_v57 = vsel %vm1083_vm3, %v6625_v38, 0.0 }
 0x3b0   :  { %2643 = vadd.xlane.f32.xlu0 %v2642_v35  ;;  %v4577_v58 = vpop.f32.mrb[28].mxu1 }
 0x3b1   :  { %v6632_v24 = vadd.f32 %v4577_v58, %v6491_v32  ;;  %v2427_v47 = vpop.f32.mrb[29].mxu1 }
 0x3b2   :  { %2646 = vadd.xlane.f32.xlu1 %v2645_v57  ;;  %v4578_v9 = vpop.f32.mrb[30].mxu1  ;;  %v6637_v56 = vadd.f32 %v2427_v47, %v6491_v32 }
 0x3b3   :  { %8051 = vst [vmem:[#allocation17_spill] sm:$0xff] %v6632_v24  ;;  %v6640_v28 = vadd.f32 %v4578_v9, %v6491_v32  ;;  %v2430_v17 = vpop.f32.mrb[31].mxu1  ;;  %v2660_v40 = vsel %vm1083_vm3, %v6632_v24, 0.0 }
 0x3b4   :  { %2661 = vadd.xlane.f32.xlu0 %v2660_v40  ;;  %v6645_v36 = vadd.f32 %v2430_v17, %v6491_v32  ;;  %v2654_v7 = vsel %vm1083_vm3, %v6637_v56, 0.0 }
 0x3b5   :  { %8052 = vst [vmem:[#allocation18_spill] sm:$0xff] %v6640_v28  ;;  %v2663_v16 = vsel %vm1083_vm3, %v6640_v28, 0.0 }
 0x3b6   :  { %2664 = vadd.xlane.f32.xlu1 %v2663_v16  ;;  %v2657_v26 = vsel %vm1083_vm3, %v6645_v36, 0.0 }
 0x3b8   :  { %2655 = vadd.xlane.f32.xlu0 %v2654_v7  ;;  %v4581_v22 = vpop.f32.mrb[32].mxu1 }
 0x3b9   :  { %v6652_v14 = vadd.f32 %v4581_v22, %v6491_v32  ;;  %v2443_v2 = vpop.f32.mrb[33].mxu1 }
 0x3ba   :  { %2658 = vadd.xlane.f32.xlu1 %v2657_v26  ;;  %v4582_v39 = vpop.f32.mrb[34].mxu1  ;;  %v6657_v49 = vadd.f32 %v2443_v2, %v6491_v32 }
 0x3bb   :  { %8053 = vst [vmem:[#allocation19_spill] sm:$0xff] %v6652_v14  ;;  %v6660_v30 = vadd.f32 %v4582_v39, %v6491_v32  ;;  %v2446_v60 = vpop.f32.mrb[35].mxu1  ;;  %v2672_v20 = vsel %vm1083_vm3, %v6652_v14, 0.0 }
 0x3bc   :  { %8054 = vst [vmem:[#allocation20_spill] sm:$0xff] %v6657_v49  ;;  %2673 = vadd.xlane.f32.xlu0 %v2672_v20  ;;  %v6665_v51 = vadd.f32 %v2446_v60, %v6491_v32  ;;  %v2666_v27 = vsel %vm1083_vm3, %v6657_v49, 0.0 }
 0x3bd   :  { %8055 = vst [vmem:[#allocation22_spill] sm:$0xff] %v6660_v30  ;;  %v2675_v8 = vsel %vm1083_vm3, %v6660_v30, 0.0 }
 0x3be   :  { %8056 = vst [vmem:[#allocation23_spill] sm:$0xff] %v6665_v51  ;;  %2676 = vadd.xlane.f32.xlu1 %v2675_v8  ;;  %v2669_v48 = vsel %vm1083_vm3, %v6665_v51, 0.0 }
 0x3c0   :  { %2667 = vadd.xlane.f32.xlu0 %v2666_v27  ;;  %v4585_v4 = vpop.f32.mrb[36].mxu1 }
 0x3c1   :  { %v6672_v53 = vadd.f32 %v4585_v4, %v6491_v32  ;;  %v2459_v0 = vpop.f32.mrb[37].mxu1 }
 0x3c2   :  { %2670 = vadd.xlane.f32.xlu1 %v2669_v48  ;;  %v4586_v6 = vpop.f32.mrb[38].mxu1  ;;  %v6677_v21 = vadd.f32 %v2459_v0, %v6491_v32 }
 0x3c3   :  { %8057 = vst [vmem:[#allocation21_spill] sm:$0xff] %v6672_v53  ;;  %v6680_v34 = vadd.f32 %v4586_v6, %v6491_v32  ;;  %v2462_v37 = vpop.f32.mrb[39].mxu1  ;;  %v2684_v52 = vsel %vm1083_vm3, %v6672_v53, 0.0 }
 0x3c4   :  { %8058 = vst [vmem:[#allocation24_spill] sm:$0xff] %v6677_v21  ;;  %2685 = vadd.xlane.f32.xlu0 %v2684_v52  ;;  %v6685_v35 = vadd.f32 %v2462_v37, %v6491_v32  ;;  %v2678_v47 = vsel %vm1083_vm3, %v6677_v21, 0.0 }
 0x3c5   :  { %8059 = vst [vmem:[#allocation5_spill] sm:$0xff] %v6680_v34  ;;  %v2687_v58 = vsel %vm1083_vm3, %v6680_v34, 0.0 }
 0x3c6   :  { %8060 = vst [vmem:[#allocation6_spill] sm:$0xff] %v6685_v35  ;;  %2688 = vadd.xlane.f32.xlu1 %v2687_v58  ;;  %v2681_v40 = vsel %vm1083_vm3, %v6685_v35, 0.0  ;;  %v4755_v35 = vld [vmem:[%s7881_s5] sm:$0xff]  }
 0x3c7   :  { %4611 = vmatprep.subr.bf16.mxu1 %v4755_v35 }
 0x3c8   :  { %2679 = vadd.xlane.f32.xlu0 %v2678_v47  ;;  %v4589_v57 = vpop.f32.mrb[40].mxu1  ;;  %4612 = vmatpush3.bf16.msra.mxu1 %v4755_v35 }
 0x3c9   :  { %v6692_v9 = vadd.f32 %v4589_v57, %v6491_v32  ;;  %v2475_v17 = vpop.f32.mrb[41].mxu1 }
 0x3ca   :  { %2682 = vadd.xlane.f32.xlu1 %v2681_v40  ;;  %v4590_v16 = vpop.f32.mrb[42].mxu1  ;;  %v6697_v7 = vadd.f32 %v2475_v17, %v6491_v32 }
 0x3cb   :  { %8061 = vst [vmem:[#allocation3_spill] sm:$0xff] %v6692_v9  ;;  %v6700_v22 = vadd.f32 %v4590_v16, %v6491_v32  ;;  %v2478_v2 = vpop.f32.mrb[43].mxu1  ;;  %v2696_v26 = vsel %vm1083_vm3, %v6692_v9, 0.0 }
 0x3cc   :  { %8062 = vst [vmem:[#allocation4_spill] sm:$0xff] %v6697_v7  ;;  %2697 = vadd.xlane.f32.xlu0 %v2696_v26  ;;  %v6705_v39 = vadd.f32 %v2478_v2, %v6491_v32  ;;  %v2690_v20 = vsel %vm1083_vm3, %v6697_v7, 0.0 }
 0x3cd   :  { %8063 = vst [vmem:[#allocation9_spill] sm:$0xff] %v6700_v22  ;;  %v2699_v60 = vsel %vm1083_vm3, %v6700_v22, 0.0 }
 0x3ce   :  { %8064 = vst [vmem:[#allocation10_spill] sm:$0xff] %v6705_v39  ;;  %2700 = vadd.xlane.f32.xlu1 %v2699_v60  ;;  %v2693_v0 = vsel %vm1083_vm3, %v6705_v39, 0.0 }
 0x3d0   :  { %2691 = vadd.xlane.f32.xlu0 %v2690_v20  ;;  %v4593_v8 = vpop.f32.mrb[44].mxu1 }
 0x3d1   :  { %v6712_v27 = vadd.f32 %v4593_v8, %v6491_v32  ;;  %v2491_v4 = vpop.f32.mrb[45].mxu1 }
 0x3d2   :  { %2694 = vadd.xlane.f32.xlu1 %v2693_v0  ;;  %v4594_v48 = vpop.f32.mrb[46].mxu1  ;;  %v6717_v6 = vadd.f32 %v2491_v4, %v6491_v32 }
 0x3d3   :  { %8065 = vst [vmem:[#allocation7_spill] sm:$0xff] %v6712_v27  ;;  %v6720_v37 = vadd.f32 %v4594_v48, %v6491_v32  ;;  %v2494_v52 = vpop.f32.mrb[47].mxu1  ;;  %v2708_v58 = vsel %vm1083_vm3, %v6712_v27, 0.0 }
 0x3d4   :  { %8066 = vst [vmem:[#allocation8_spill] sm:$0xff] %v6717_v6  ;;  %2709 = vadd.xlane.f32.xlu0 %v2708_v58  ;;  %v6725_v47 = vadd.f32 %v2494_v52, %v6491_v32  ;;  %v2702_v17 = vsel %vm1083_vm3, %v6717_v6, 0.0 }
 0x3d5   :  { %8067 = vst [vmem:[#allocation13_spill] sm:$0xff] %v6720_v37  ;;  %v2711_v57 = vsel %vm1083_vm3, %v6720_v37, 0.0 }
 0x3d6   :  { %8068 = vst [vmem:[#allocation14_spill] sm:$0xff] %v6725_v47  ;;  %2712 = vadd.xlane.f32.xlu1 %v2711_v57  ;;  %v2705_v26 = vsel %vm1083_vm3, %v6725_v47, 0.0 }
 0x3d8   :  { %2703 = vadd.xlane.f32.xlu0 %v2702_v17  ;;  %v4597_v40 = vpop.f32.mrb[48].mxu1 }
 0x3d9   :  { %v6732_v16 = vadd.f32 %v4597_v40, %v6491_v32  ;;  %v2507_v2 = vpop.f32.mrb[49].mxu1 }
 0x3da   :  { %2706 = vadd.xlane.f32.xlu1 %v2705_v26  ;;  %v4598_v60 = vpop.f32.mrb[50].mxu1  ;;  %v6737_v20 = vadd.f32 %v2507_v2, %v6491_v32 }
 0x3db   :  { %8069 = vst [vmem:[#allocation11_spill] sm:$0xff] %v6732_v16  ;;  %v6740_v8 = vadd.f32 %v4598_v60, %v6491_v32  ;;  %v2510_v4 = vpop.f32.mrb[51].mxu1  ;;  %v2720_v0 = vsel %vm1083_vm3, %v6732_v16, 0.0 }
 0x3dc   :  { %8070 = vst [vmem:[#allocation12_spill] sm:$0xff] %v6737_v20  ;;  %2721 = vadd.xlane.f32.xlu0 %v2720_v0  ;;  %v6745_v48 = vadd.f32 %v2510_v4, %v6491_v32  ;;  %v2714_v58 = vsel %vm1083_vm3, %v6737_v20, 0.0 }
 0x3dd   :  { %8071 = vst [vmem:[#allocation15_spill] sm:$0xff] %v6740_v8  ;;  %v2723_v52 = vsel %vm1083_vm3, %v6740_v8, 0.0 }
 0x3de   :  { %8072 = vst [vmem:[#allocation16_spill] sm:$0xff] %v6745_v48  ;;  %2724 = vadd.xlane.f32.xlu1 %v2723_v52  ;;  %v2717_v2 = vsel %vm1083_vm3, %v6745_v48, 0.0 }
 0x3e0   :  { %2715 = vadd.xlane.f32.xlu0 %v2714_v58  ;;  %v4601_v57 = vpop.f32.mrb[52].mxu1 }
 0x3e1   :  { %v6752_v17 = vadd.f32 %v4601_v57, %v6491_v32  ;;  %v2523_v40 = vpop.f32.mrb[53].mxu1 }
 0x3e2   :  { %2718 = vadd.xlane.f32.xlu1 %v2717_v2  ;;  %v4602_v26 = vpop.f32.mrb[54].mxu1  ;;  %v6757_v60 = vadd.f32 %v2523_v40, %v6491_v32 }
 0x3e3   :  { %8073 = vst [vmem:[#allocation25_spill] sm:$0xff] %v6752_v17  ;;  %v6760_v4 = vadd.f32 %v4602_v26, %v6491_v32  ;;  %v2526_v0 = vpop.f32.mrb[55].mxu1  ;;  %v2732_v52 = vsel %vm1083_vm3, %v6752_v17, 0.0 }
 0x3e4   :  { %8074 = vst [vmem:[#allocation26_spill] sm:$0xff] %v6757_v60  ;;  %2733 = vadd.xlane.f32.xlu0 %v2732_v52  ;;  %v6765_v58 = vadd.f32 %v2526_v0, %v6491_v32  ;;  %v2726_v2 = vsel %vm1083_vm3, %v6757_v60, 0.0 }
 0x3e5   :  { %8075 = vst [vmem:[#allocation27_spill] sm:$0xff] %v6760_v4  ;;  %v2735_v57 = vsel %vm1083_vm3, %v6760_v4, 0.0 }
 0x3e6   :  { %8076 = vst [vmem:[#allocation28_spill] sm:$0xff] %v6765_v58  ;;  %2736 = vadd.xlane.f32.xlu1 %v2735_v57  ;;  %v2729_v17 = vsel %vm1083_vm3, %v6765_v58, 0.0 }
 0x3e8   :  { %2727 = vadd.xlane.f32.xlu0 %v2726_v2  ;;  %v4605_v40 = vpop.f32.mrb[56].mxu1 }
 0x3e9   :  { %v6772_v26 = vadd.f32 %v4605_v40, %v6491_v32  ;;  %v2539_v61 = vpop.f32.mrb[57].mxu1 }
 0x3ea   :  { %2730 = vadd.xlane.f32.xlu1 %v2729_v17  ;;  %v4606_v52 = vpop.f32.mrb[58].mxu1  ;;  %v6777_v0 = vadd.f32 %v2539_v61, %v6491_v32 }
 0x3eb   :  { %8077 = vst [vmem:[#allocation29_spill] sm:$0xff] %v6772_v26  ;;  %v6780_v4 = vadd.f32 %v4606_v52, %v6491_v32  ;;  %v2542_v57 = vpop.f32.mrb[59].mxu1  ;;  %v2744_v2 = vsel %vm1083_vm3, %v6772_v26, 0.0 }
 0x3ec   :  { %8078 = vst [vmem:[#allocation30_spill] sm:$0xff] %v6777_v0  ;;  %2745 = vadd.xlane.f32.xlu0 %v2744_v2  ;;  %v6785_v40 = vadd.f32 %v2542_v57, %v6491_v32  ;;  %v2738_v17 = vsel %vm1083_vm3, %v6777_v0, 0.0 }
 0x3ed   :  { %8079 = vst [vmem:[#allocation31_spill] sm:$0xff] %v6780_v4  ;;  %v2747_v60 = vsel %vm1083_vm3, %v6780_v4, 0.0 }
 0x3ee   :  { %8080 = vst [vmem:[#allocation32_spill] sm:$0xff] %v6785_v40  ;;  %2748 = vadd.xlane.f32.xlu1 %v2747_v60  ;;  %v2741_v61 = vsel %vm1083_vm3, %v6785_v40, 0.0 }
 0x3f0   :  { %2739 = vadd.xlane.f32.xlu0 %v2738_v17 }
 0x3f2   :  { %2742 = vadd.xlane.f32.xlu1 %v2741_v61 }
 0x406   :  { %v2578_v52 = vpop.xlane.xlu0 %2577 }
 0x407   :  { %v2764_v9 = vmul.f32 0.015625, %v2578_v52 }
 0x408   :  { %v2581_v58 = vpop.xlane.xlu1 %2580 }
 0x409   :  { %v2765_v7 = vmul.f32 0.015625, %v2581_v58  ;;  %v6816_v34 = vsub.f32 %v6494_v43, %v2764_v9 }
 0x40a   :  { %v2572_v8 = vpop.xlane.xlu0 %2571 }
 0x40b   :  { %8081 = vst [vmem:[#allocation33_spill] sm:$0xff] %v6816_v34  ;;  %v2762_v21 = vmul.f32 0.015625, %v2572_v8  ;;  %v6826_v51 = vsub.f32 %v6500_v19, %v2765_v7  ;;  %v2892_v8 = vmul.f32 %v6816_v34, %v6816_v34 }
 0x40c   :  { %v2575_v26 = vpop.xlane.xlu1 %2574 }
 0x40d   :  { %8082 = vst [vmem:[#allocation34_spill] sm:$0xff] %v6826_v51  ;;  %v2763_v52 = vmul.f32 0.015625, %v2575_v26  ;;  %v6838_v28 = vsub.f32 %v6497_v59, %v2762_v21  ;;  %v2893_v59 = vmul.f32 %v6826_v51, %v6826_v51 }
 0x40e   :  { %v2590_v2 = vpop.xlane.xlu0 %2589 }
 0x40f   :  { %v2768_v24 = vmul.f32 0.015625, %v2590_v2  ;;  %v6848_v35 = vsub.f32 %v6505_v15, %v2763_v52  ;;  %v2890_v15 = vmul.f32 %v6838_v28, %v6838_v28  ;;  %v2963_v51 = vsel %vm1083_vm3, %v2893_v59, 0.0 }
 0x410   :  { %v2593_v16 = vpop.xlane.xlu1 %2592 }
 0x411   :  { %v2769_v26 = vmul.f32 0.015625, %v2593_v16 }
 0x412   :  { %v2584_v57 = vpop.xlane.xlu0 %2583 }
 0x413   :  { %v2766_v2 = vmul.f32 0.015625, %v2584_v57  ;;  %v6865_v16 = vsub.f32 %v6520_v50, %v2769_v26  ;;  %v2954_v57 = vsel %vm1083_vm3, %v2890_v15, 0.0 }
 0x414   :  { %v2587_v48 = vpop.xlane.xlu1 %2586 }
 0x416   :  { %v2602_v20 = vpop.xlane.xlu0 %2601 }
 0x418   :  { %v2605_v37 = vpop.xlane.xlu1 %2604 }
 0x41a   :  { %v6793_v4 = vpop.xlane.xlu0 %2595 }
 0x41b   :  { %v2770_v59 = vmul.f32 0.015625, %v6793_v4 }
 0x41c   :  { %v6795_v60 = vpop.xlane.xlu1 %2598 }
 0x41d   :  { %v2771_v15 = vmul.f32 0.015625, %v6795_v60  ;;  %v6903_v4 = vsub.f32 %v6537_v29, %v2770_v59 }
 0x41e   :  { %v6797_v0 = vpop.xlane.xlu0 %2613 }
 0x41f   :  { %v6912_v60 = vsub.f32 %v6545_v42, %v2771_v15 }
 0x420   :  { %v6799_v17 = vpop.xlane.xlu1 %2616 }
 0x422   :  { %v6801_v40 = vpop.xlane.xlu0 %2607 }
 0x424   :  { %v6803_v61 = vpop.xlane.xlu1 %2610 }
 0x426   :  { %v6805_v27 = vpop.xlane.xlu0 %2625 }
 0x428   :  { %v6807_v47 = vpop.xlane.xlu1 %2628 }
 0x42a   :  { %v6809_v6 = vpop.xlane.xlu0 %2619 }
 0x42c   :  { %v6811_v22 = vpop.xlane.xlu1 %2622 }
 0x42e   :  { %v6813_v39 = vpop.xlane.xlu0 %2637 }
 0x430   :  { %v6818_v53 = vpop.xlane.xlu1 %2640 }
 0x432   :  { %v6833_v9 = vpop.xlane.xlu0 %2631 }
 0x434   :  { %v6845_v7 = vpop.xlane.xlu1 %2634 }
 0x435   :  { %v6823_v30 = vpop.f32.mrb[60].mxu1 }
 0x436   :  { %v2555_v14 = vpop.f32.mrb[61].mxu1 }
 0x437   :  { %v6829_v58 = vadd.f32 %v2555_v14, %v6491_v32  ;;  %v6831_v43 = vpop.f32.mrb[62].mxu1 }
 0x438   :  { %v2558_v49 = vpop.f32.mrb[63].mxu1 }
 0x439   :  { %8083 = vst [vmem:[#allocation35_spill] sm:$0xff] %v6829_v58  ;;  %v6841_v19 = vadd.f32 %v2558_v49, %v6491_v32  ;;  %v2750_v14 = vsel %vm1083_vm3, %v6829_v58, 0.0  ;;  %v6854_v21 = vpop.xlane.xlu0 %2649  ;;  %v6857_v49 = vsub.f32 %v6512_v31, %v2768_v24  ;;  %v2960_v58 = vsel %vm1083_vm3, %v2892_v8, 0.0 }
 0x43a   :  { %2751 = vadd.xlane.f32.xlu0 %v2750_v14  ;;  %v2767_v14 = vmul.f32 0.015625, %v2587_v48  ;;  %v6871_v31 = vsub.f32 %v6517_v3, %v2766_v2  ;;  %v2772_v24 = vmul.f32 0.015625, %v2602_v20  ;;  %v2773_v48 = vmul.f32 0.015625, %v2605_v37 }
 0x43b   :  { %v2753_v34 = vsel %vm1083_vm3, %v6841_v19, 0.0  ;;  %v6862_v52 = vpop.xlane.xlu1 %2652  ;;  %v2896_v8 = vmul.f32 %v6857_v49, %v6857_v49 }
 0x43c   :  { %2754 = vadd.xlane.f32.xlu1 %v2753_v34  ;;  %v2891_v34 = vmul.f32 %v6848_v35, %v6848_v35  ;;  %v6879_v50 = vsub.f32 %v6525_v12, %v2767_v14  ;;  %v6887_v20 = vsub.f32 %v6532_v23, %v2772_v24  ;;  %v2894_v12 = vmul.f32 %v6871_v31, %v6871_v31 }
 0x43d   :  { %v2972_v2 = vsel %vm1083_vm3, %v2896_v8, 0.0  ;;  %v6894_v37 = vsub.f32 %v6540_v54, %v2773_v48  ;;  %v2776_v24 = vmul.f32 0.015625, %v6797_v0  ;;  %v2777_v48 = vmul.f32 0.015625, %v6799_v17 }
 0x43e   :  { %2961 = vadd.xlane.f32.xlu0 %v2960_v58  ;;  %v6876_v58 = vpop.xlane.xlu0 %2643  ;;  %v2957_v26 = vsel %vm1083_vm3, %v2891_v34, 0.0  ;;  %v2895_v34 = vmul.f32 %v6879_v50, %v6879_v50  ;;  %v2900_v54 = vmul.f32 %v6887_v20, %v6887_v20 }
 0x43f   :  { %v6884_v3 = vpop.xlane.xlu1 %2646  ;;  %v2901_v29 = vmul.f32 %v6894_v37, %v6894_v37  ;;  %v6919_v0 = vsub.f32 %v6552_v11, %v2776_v24  ;;  %v6928_v17 = vsub.f32 %v6560_v62, %v2777_v48  ;;  %v2899_v11 = vmul.f32 %v6912_v60, %v6912_v60 }
 0x440   :  { %2964 = vadd.xlane.f32.xlu1 %v2963_v51  ;;  %v2897_v51 = vmul.f32 %v6865_v16, %v6865_v16  ;;  %v2984_v59 = vsel %vm1083_vm3, %v2900_v54, 0.0 }
 0x441   :  { %v2987_v15 = vsel %vm1083_vm3, %v2901_v29, 0.0  ;;  %v2904_v62 = vmul.f32 %v6919_v0, %v6919_v0  ;;  %v2981_v54 = vsel %vm1083_vm3, %v2899_v11, 0.0  ;;  %v2905_v48 = vmul.f32 %v6928_v17, %v6928_v17 }
 0x442   :  { %2955 = vadd.xlane.f32.xlu0 %v2954_v57  ;;  %v2975_v14 = vsel %vm1083_vm3, %v2897_v51, 0.0  ;;  %v6900_v23 = vpop.xlane.xlu0 %2661  ;;  %v2966_v57 = vsel %vm1083_vm3, %v2894_v12, 0.0  ;;  %v2774_v51 = vmul.f32 0.015625, %v6801_v40  ;;  %v2775_v12 = vmul.f32 0.015625, %v6803_v61 }
 0x443   :  { %v6909_v8 = vpop.xlane.xlu1 %2664  ;;  %v2996_v29 = vsel %vm1083_vm3, %v2904_v62, 0.0 }
 0x444   :  { %2958 = vadd.xlane.f32.xlu1 %v2957_v26  ;;  %v2969_v26 = vsel %vm1083_vm3, %v2895_v34, 0.0  ;;  %v6937_v40 = vsub.f32 %v6557_v13, %v2774_v51  ;;  %v2780_v34 = vmul.f32 0.015625, %v6805_v27  ;;  %v6944_v61 = vsub.f32 %v6565_v44, %v2775_v12 }
 0x445   :  { %v2784_v12 = vmul.f32 0.015625, %v6813_v39 }
 0x446   :  { %2973 = vadd.xlane.f32.xlu0 %v2972_v2  ;;  %v2898_v2 = vmul.f32 %v6903_v4, %v6903_v4  ;;  %v6925_v42 = vpop.xlane.xlu0 %2655  ;;  %v6953_v27 = vsub.f32 %v6572_v1, %v2780_v34  ;;  %v2902_v44 = vmul.f32 %v6937_v40, %v6937_v40  ;;  %v2903_v1 = vmul.f32 %v6944_v61, %v6944_v61 }
 0x447   :  { %v2785_v34 = vmul.f32 0.015625, %v6818_v53  ;;  %v6987_v39 = vsub.f32 %v6592_v33, %v2784_v12  ;;  %v2786_v12 = vmul.f32 0.015625, %v6876_v58 }
 0x448   :  { %2976 = vadd.xlane.f32.xlu1 %v2975_v14  ;;  %v6934_v14 = vpop.xlane.xlu1 %2658  ;;  %v2978_v24 = vsel %vm1083_vm3, %v2898_v2, 0.0  ;;  %v2999_v2 = vsel %vm1083_vm3, %v2905_v48, 0.0  ;;  %v2908_v11 = vmul.f32 %v6953_v27, %v6953_v27  ;;  %v2783_v48 = vmul.f32 0.015625, %v6845_v7  ;;  %v4756_v7 = vld [vmem:[%s7881_s5 + $0x8] sm:$0xff]  }
 0x449   :  { %v6994_v53 = vsub.f32 %v6600_v45, %v2785_v34  ;;  %4613 = vmatprep.subr.bf16.mxu1 %v4756_v7 }
 0x44a   :  { %2967 = vadd.xlane.f32.xlu0 %v2966_v57  ;;  %v2781_v57 = vmul.f32 0.015625, %v6807_v47  ;;  %v6950_v13 = vpop.xlane.xlu0 %2673  ;;  %4614 = vmatpush3.bf16.msra.mxu1 %v4756_v7  ;;  %v2790_v7 = vmul.f32 0.015625, %v6925_v42 }
 0x44c   :  { %2970 = vadd.xlane.f32.xlu1 %v2969_v26  ;;  %v2778_v26 = vmul.f32 0.015625, %v6809_v6  ;;  %v6959_v51 = vpop.xlane.xlu1 %2676  ;;  %v6962_v47 = vsub.f32 %v6580_v41, %v2781_v57  ;;  %v2782_v57 = vmul.f32 0.015625, %v6833_v9 }
 0x44e   :  { %2985 = vadd.xlane.f32.xlu0 %v2984_v59  ;;  %v2779_v59 = vmul.f32 0.015625, %v6811_v22  ;;  %v6969_v6 = vsub.f32 %v6577_v63, %v2778_v26  ;;  %v6975_v41 = vpop.xlane.xlu0 %2667  ;;  %v2909_v63 = vmul.f32 %v6962_v47, %v6962_v47  ;;  %v7003_v9 = vsub.f32 %v6597_v5, %v2782_v57 }
 0x44f   :  { %v2913_v5 = vmul.f32 %v6994_v53, %v6994_v53 }
 0x450   :  { %2988 = vadd.xlane.f32.xlu1 %v2987_v15  ;;  %v2990_v15 = vsel %vm1083_vm3, %v2902_v44, 0.0  ;;  %v6978_v22 = vsub.f32 %v6585_v10, %v2779_v59  ;;  %v6984_v62 = vpop.xlane.xlu1 %2670  ;;  %v2906_v10 = vmul.f32 %v6969_v6, %v6969_v6  ;;  %v3011_v26 = vsel %vm1083_vm3, %v2909_v63, 0.0 }
 0x451   :  { %v2912_v59 = vmul.f32 %v6987_v39, %v6987_v39  ;;  %v3023_v63 = vsel %vm1083_vm3, %v2913_v5, 0.0  ;;  %v2792_v5 = vmul.f32 0.015625, %v6900_v23 }
 0x452   :  { %2979 = vadd.xlane.f32.xlu0 %v2978_v24  ;;  %v2993_v24 = vsel %vm1083_vm3, %v2903_v1, 0.0  ;;  %v7000_v33 = vpop.xlane.xlu0 %2685  ;;  %v3002_v44 = vsel %vm1083_vm3, %v2906_v10, 0.0  ;;  %v2788_v10 = vmul.f32 0.015625, %v6854_v21 }
 0x454   :  { %2982 = vadd.xlane.f32.xlu1 %v2981_v54  ;;  %v3008_v54 = vsel %vm1083_vm3, %v2908_v11, 0.0  ;;  %v7008_v45 = vpop.xlane.xlu1 %2688  ;;  %v2910_v11 = vmul.f32 %v7003_v9, %v7003_v9 }
 0x456   :  { %2997 = vadd.xlane.f32.xlu0 %v2996_v29  ;;  %v2907_v29 = vmul.f32 %v6978_v22, %v6978_v22  ;;  %v7023_v34 = vpop.xlane.xlu0 %2679 }
 0x458   :  { %3000 = vadd.xlane.f32.xlu1 %v2999_v2  ;;  %v7014_v2 = vsub.f32 %v6605_v25, %v2783_v48  ;;  %v3005_v1 = vsel %vm1083_vm3, %v2907_v29, 0.0  ;;  %v4757_v25 = vld [vmem:[%s7881_s5 + $0x10] sm:$0xff]   ;;  %v7032_v57 = vpop.xlane.xlu1 %2682  ;;  %v7040_v48 = vsub.f32 %v6617_v55, %v2786_v12  ;;  %v7048_v29 = vadd.f32 %v6831_v43, %v6491_v32 }
 0x459   :  { %4615 = vmatprep.subr.bf16.mxu1 %v4757_v25  ;;  %v7077_v12 = vsub.f32 %v6637_v56, %v2790_v7  ;;  %v8084_v56 = vld [vmem:[#allocation17_spill] sm:$0xff] }
 0x45a   :  { %2991 = vadd.xlane.f32.xlu0 %v2990_v15  ;;  %v3020_v15 = vsel %vm1083_vm3, %v2912_v59, 0.0  ;;  %v2911_v58 = vmul.f32 %v7014_v2, %v7014_v2  ;;  %4616 = vmatpush3.bf16.msra.mxu1 %v4757_v25  ;;  %v7055_v21 = vpop.xlane.xlu0 %2697  ;;  %v7058_v59 = vsub.f32 %v6614_v18, %v2788_v10  ;;  %v2914_v43 = vmul.f32 %v7040_v48, %v7040_v48 }
 0x45b   :  { %v2759_v18 = vsel %vm1083_vm3, %v7048_v29, 0.0  ;;  %v2794_v10 = vmul.f32 0.015625, %v6975_v41  ;;  %v2796_v41 = vmul.f32 0.015625, %v6950_v13 }
 0x45c   :  { %2994 = vadd.xlane.f32.xlu1 %v2993_v24  ;;  %v2787_v24 = vmul.f32 0.015625, %v6884_v3  ;;  %v3014_v3 = vsel %vm1083_vm3, %v2910_v11, 0.0  ;;  %v3017_v55 = vsel %vm1083_vm3, %v2911_v58, 0.0  ;;  %v7090_v58 = vsub.f32 %v8084_v56, %v2792_v5 }
 0x45d   :  { %v2798_v56 = vmul.f32 0.015625, %v7023_v34  ;;  %v2800_v34 = vmul.f32 0.015625, %v7000_v33 }
 0x45e   :  { %3009 = vadd.xlane.f32.xlu0 %v3008_v54  ;;  %v7036_v54 = vadd.f32 %v6823_v30, %v6491_v32  ;;  %v2789_v30 = vmul.f32 0.015625, %v6862_v52  ;;  %v2692_v11 = vpop.xlane.xlu0 %2691 }
 0x460   :  { %3012 = vadd.xlane.f32.xlu1 %v3011_v26  ;;  %v4758_v26 = vld [vmem:[%s7881_s5 + $0x18] sm:$0xff]   ;;  %v2756_v32 = vsel %vm1083_vm3, %v7036_v54, 0.0  ;;  %v7068_v52 = vsub.f32 %v6620_v46, %v2789_v30  ;;  %v2916_v46 = vmul.f32 %v7058_v59, %v7058_v59  ;;  %v2795_v30 = vmul.f32 0.015625, %v6984_v62 }
 0x461   :  { %4617 = vmatprep.subr.bf16.mxu1 %v4758_v26  ;;  %v2797_v62 = vmul.f32 0.015625, %v6959_v51 }
 0x462   :  { %3003 = vadd.xlane.f32.xlu0 %v3002_v44  ;;  %v7052_v44 = vsub.f32 %v6625_v38, %v2787_v24  ;;  %4618 = vmatpush3.bf16.msra.mxu1 %v4758_v26  ;;  %v7065_v38 = vpop.xlane.xlu1 %2700  ;;  %v2917_v23 = vmul.f32 %v7068_v52, %v7068_v52 }
 0x464   :  { %3006 = vadd.xlane.f32.xlu1 %v3005_v1  ;;  %v2791_v1 = vmul.f32 0.015625, %v6934_v14  ;;  %v2915_v42 = vmul.f32 %v7052_v44, %v7052_v44  ;;  %v2793_v14 = vmul.f32 0.015625, %v6909_v8  ;;  %v2918_v8 = vmul.f32 %v7077_v12, %v7077_v12 }
 0x466   :  { %3021 = vadd.xlane.f32.xlu0 %v3020_v15  ;;  %v3026_v15 = vsel %vm1083_vm3, %v2914_v43, 0.0  ;;  %v7084_v25 = vsub.f32 %v6645_v36, %v2791_v1  ;;  %v3029_v24 = vsel %vm1083_vm3, %v2915_v42, 0.0  ;;  %v8085_v36 = vld [vmem:[#allocation18_spill] sm:$0xff]  ;;  %v8086_v43 = vld [vmem:[#allocation20_spill] sm:$0xff]  ;;  %v2920_v42 = vmul.f32 %v7090_v58, %v7090_v58 }
 0x467   :  { %v7097_v26 = vsub.f32 %v8085_v36, %v2793_v14  ;;  %v7107_v1 = vsub.f32 %v8086_v43, %v2794_v10  ;;  %v8090_v43 = vld [vmem:[#allocation24_spill] sm:$0xff] }
 0x468   :  { %3024 = vadd.xlane.f32.xlu1 %v3023_v63  ;;  %v2695_v63 = vpop.xlane.xlu1 %2694  ;;  %v2919_v7 = vmul.f32 %v7084_v25, %v7084_v25  ;;  %v3044_v10 = vsel %vm1083_vm3, %v2920_v42, 0.0 }
 0x469   :  { %v2921_v13 = vmul.f32 %v7097_v26, %v7097_v26 }
 0x46a   :  { %3015 = vadd.xlane.f32.xlu0 %v3014_v3  ;;  %v3032_v3 = vsel %vm1083_vm3, %v2916_v46, 0.0  ;;  %v3041_v14 = vsel %vm1083_vm3, %v2919_v7, 0.0 }
 0x46c   :  { %3018 = vadd.xlane.f32.xlu1 %v3017_v55  ;;  %v3035_v55 = vsel %vm1083_vm3, %v2917_v23, 0.0  ;;  %v7112_v5 = vpop.xlane.xlu1 %2712 }
 0x46e   :  { %2757 = vadd.xlane.f32.xlu0 %v2756_v32  ;;  %v7103_v32 = vpop.xlane.xlu0 %2709 }
 0x470   :  { %2760 = vadd.xlane.f32.xlu1 %v2759_v18  ;;  %v3038_v18 = vsel %vm1083_vm3, %v2918_v8, 0.0  ;;  %v8089_v8 = vld [vmem:[#allocation22_spill] sm:$0xff] }
 0x471   :  { %v7129_v36 = vsub.f32 %v8089_v8, %v2797_v62 }
 0x472   :  { %3027 = vadd.xlane.f32.xlu0 %v3026_v15  ;;  %v8087_v15 = vld [vmem:[#allocation23_spill] sm:$0xff]  ;;  %v2704_v51 = vpop.xlane.xlu0 %2703 }
 0x473   :  { %v7116_v46 = vsub.f32 %v8087_v15, %v2795_v30  ;;  %v2799_v30 = vmul.f32 0.015625, %v7032_v57  ;;  %v2801_v57 = vmul.f32 0.015625, %v7008_v45  ;;  %v8091_v15 = vld [vmem:[#allocation6_spill] sm:$0xff] }
 0x474   :  { %3030 = vadd.xlane.f32.xlu1 %v3029_v24  ;;  %v8088_v24 = vld [vmem:[#allocation19_spill] sm:$0xff] }
 0x475   :  { %v7122_v23 = vsub.f32 %v8088_v24, %v2796_v41  ;;  %v2923_v7 = vmul.f32 %v7116_v46, %v7116_v46  ;;  %v2707_v41 = vpop.xlane.xlu1 %2706  ;;  %v2925_v24 = vmul.f32 %v7129_v36, %v7129_v36 }
 0x476   :  { %3033 = vadd.xlane.f32.xlu0 %v3032_v3  ;;  %v2922_v3 = vmul.f32 %v7107_v1, %v7107_v1  ;;  %v2722_v33 = vpop.xlane.xlu0 %2721 }
 0x477   :  { %v2924_v62 = vmul.f32 %v7122_v23, %v7122_v23 }
 0x478   :  { %3036 = vadd.xlane.f32.xlu1 %v3035_v55  ;;  %v3047_v55 = vsel %vm1083_vm3, %v2921_v13, 0.0  ;;  %v3050_v42 = vsel %vm1083_vm3, %v2922_v3, 0.0  ;;  %v3053_v13 = vsel %vm1083_vm3, %v2923_v7, 0.0  ;;  %v2802_v3 = vmul.f32 0.015625, %v2692_v11  ;;  %v8096_v11 = vld [vmem:[#allocation4_spill] sm:$0xff] }
 0x479   :  { %v3056_v8 = vsel %vm1083_vm3, %v2924_v62, 0.0  ;;  %v2725_v45 = vpop.xlane.xlu1 %2724  ;;  %v2803_v7 = vmul.f32 0.015625, %v2695_v63  ;;  %v2805_v63 = vmul.f32 0.015625, %v7065_v38  ;;  %v8101_v38 = vld [vmem:[#allocation9_spill] sm:$0xff] }
 0x47a   :  { %3039 = vadd.xlane.f32.xlu0 %v3038_v18  ;;  %v7137_v18 = vsub.f32 %v8090_v43, %v2798_v56  ;;  %v8092_v56 = vld [vmem:[#allocation21_spill] sm:$0xff] }
 0x47c   :  { %3042 = vadd.xlane.f32.xlu1 %v3041_v14  ;;  %v7144_v14 = vsub.f32 %v8091_v15, %v2799_v30  ;;  %v8094_v30 = vld [vmem:[#allocation5_spill] sm:$0xff] }
 0x47d   :  { %v7156_v43 = vsub.f32 %v8094_v30, %v2801_v57  ;;  %v8097_v57 = vld [vmem:[#allocation10_spill] sm:$0xff] }
 0x47e   :  { %3045 = vadd.xlane.f32.xlu0 %v3044_v10  ;;  %v7150_v10 = vsub.f32 %v8092_v56, %v2800_v34  ;;  %v2927_v15 = vmul.f32 %v7144_v14, %v7144_v14  ;;  %v2804_v34 = vmul.f32 0.015625, %v7055_v21 }
 0x47f   :  { %8095 = vst [vmem:[#allocation18_spill] sm:$0xff] %v7156_v43  ;;  %v2929_v21 = vmul.f32 %v7156_v43, %v7156_v43 }
 0x480   :  { %3048 = vadd.xlane.f32.xlu1 %v3047_v55  ;;  %8093 = vst [vmem:[#allocation17_spill] sm:$0xff] %v7150_v10  ;;  %v2926_v55 = vmul.f32 %v7137_v18, %v7137_v18  ;;  %v2928_v56 = vmul.f32 %v7150_v10, %v7150_v10  ;;  %v3065_v30 = vsel %vm1083_vm3, %v2927_v15, 0.0 }
 0x481   :  { %v3071_v15 = vsel %vm1083_vm3, %v2929_v21, 0.0  ;;  %v8104_v21 = vld [vmem:[#allocation14_spill] sm:$0xff] }
 0x482   :  { %3051 = vadd.xlane.f32.xlu0 %v3050_v42  ;;  %v3059_v42 = vsel %vm1083_vm3, %v2925_v24, 0.0  ;;  %v3062_v62 = vsel %vm1083_vm3, %v2926_v55, 0.0  ;;  %v7170_v24 = vsub.f32 %v8097_v57, %v2803_v7  ;;  %v2806_v55 = vmul.f32 0.015625, %v2704_v51  ;;  %v8103_v51 = vld [vmem:[#allocation8_spill] sm:$0xff] }
 0x483   :  { %v3068_v10 = vsel %vm1083_vm3, %v2928_v56, 0.0  ;;  %v7182_v7 = vsub.f32 %v8101_v38, %v2805_v63  ;;  %v2807_v57 = vmul.f32 0.015625, %v2707_v41  ;;  %v2809_v41 = vmul.f32 0.015625, %v7112_v5  ;;  %v8108_v5 = vld [vmem:[#allocation13_spill] sm:$0xff] }
 0x484   :  { %3054 = vadd.xlane.f32.xlu1 %v3053_v13  ;;  %v7163_v13 = vsub.f32 %v8096_v11, %v2802_v3  ;;  %8098 = vst [vmem:[#allocation20_spill] sm:$0xff] %v7170_v24  ;;  %v8099_v3 = vld [vmem:[#allocation3_spill] sm:$0xff]  ;;  %v2931_v43 = vmul.f32 %v7170_v24, %v7170_v24 }
 0x485   :  { %v7176_v11 = vsub.f32 %v8099_v3, %v2804_v34  ;;  %8102 = vst [vmem:[#allocation19_spill] sm:$0xff] %v7182_v7  ;;  %v2808_v34 = vmul.f32 0.015625, %v7103_v32  ;;  %v7189_v3 = vsub.f32 %v8103_v51, %v2806_v55  ;;  %v7196_v38 = vsub.f32 %v8104_v21, %v2807_v57  ;;  %v8106_v55 = vld [vmem:[#allocation7_spill] sm:$0xff] }
 0x486   :  { %3057 = vadd.xlane.f32.xlu0 %v3056_v8  ;;  %v2716_v8 = vpop.xlane.xlu0 %2715  ;;  %v3077_v24 = vsel %vm1083_vm3, %v2931_v43, 0.0  ;;  %v2933_v32 = vmul.f32 %v7182_v7, %v7182_v7  ;;  %v7208_v57 = vsub.f32 %v8108_v5, %v2809_v41  ;;  %v2813_v41 = vmul.f32 0.015625, %v2725_v45  ;;  %v8111_v5 = vld [vmem:[#allocation16_spill] sm:$0xff] }
 0x487   :  { %8100 = vst [vmem:[#allocation23_spill] sm:$0xff] %v7176_v11  ;;  %8105 = vst [vmem:[#allocation22_spill] sm:$0xff] %v7196_v38 }
 0x488   :  { %3060 = vadd.xlane.f32.xlu1 %v3059_v42  ;;  %v2719_v42 = vpop.xlane.xlu1 %2718  ;;  %v3083_v43 = vsel %vm1083_vm3, %v2933_v32, 0.0 }
 0x489   :  { %v2811_v21 = vmul.f32 0.015625, %v2719_v42 }
 0x48a   :  { %3063 = vadd.xlane.f32.xlu0 %v3062_v62  ;;  %v2930_v62 = vmul.f32 %v7163_v13, %v7163_v13 }
 0x48b   :  { %v7220_v42 = vsub.f32 %v8111_v5, %v2811_v21  ;;  %v8114_v21 = vld [vmem:[#allocation15_spill] sm:$0xff] }
 0x48c   :  { %3066 = vadd.xlane.f32.xlu1 %v3065_v30  ;;  %v2734_v30 = vpop.xlane.xlu0 %2733  ;;  %v3074_v56 = vsel %vm1083_vm3, %v2930_v62, 0.0  ;;  %v2737_v63 = vpop.xlane.xlu1 %2736  ;;  %v2810_v62 = vmul.f32 0.015625, %v2716_v8  ;;  %v8109_v8 = vld [vmem:[#allocation12_spill] sm:$0xff]  ;;  %v7232_v5 = vsub.f32 %v8114_v21, %v2813_v41 }
 0x48d   :  { %8112 = vst [vmem:[#allocation21_spill] sm:$0xff] %v7220_v42  ;;  %v2817_v41 = vmul.f32 0.015625, %v2737_v63  ;;  %v8118_v21 = vld [vmem:[#allocation28_spill] sm:$0xff]  ;;  %v8122_v63 = vld [vmem:[#allocation27_spill] sm:$0xff] }
 0x48e   :  { %3069 = vadd.xlane.f32.xlu0 %v3068_v10  ;;  %v2932_v10 = vmul.f32 %v7176_v11, %v7176_v11  ;;  %8115 = vst [vmem:[#allocation5_spill] sm:$0xff] %v7232_v5 }
 0x490   :  { %3072 = vadd.xlane.f32.xlu1 %v3071_v15  ;;  %v7202_v15 = vsub.f32 %v8106_v55, %v2808_v34  ;;  %v3080_v51 = vsel %vm1083_vm3, %v2932_v10, 0.0  ;;  %v2728_v11 = vpop.xlane.xlu0 %2727  ;;  %v2731_v7 = vpop.xlane.xlu1 %2730  ;;  %v2812_v34 = vmul.f32 0.015625, %v2722_v33  ;;  %v7214_v55 = vsub.f32 %v8109_v8, %v2810_v62  ;;  %v8113_v33 = vld [vmem:[#allocation11_spill] sm:$0xff] }
 0x491   :  { %v2814_v8 = vmul.f32 0.015625, %v2728_v11 }
 0x492   :  { %3075 = vadd.xlane.f32.xlu0 %v3074_v56  ;;  %8107 = vst [vmem:[#allocation24_spill] sm:$0xff] %v7202_v15  ;;  %v2934_v56 = vmul.f32 %v7189_v3, %v7189_v3  ;;  %8110 = vst [vmem:[#allocation6_spill] sm:$0xff] %v7214_v55  ;;  %v7226_v62 = vsub.f32 %v8113_v33, %v2812_v34  ;;  %v2816_v34 = vmul.f32 0.015625, %v2734_v30  ;;  %v8116_v33 = vld [vmem:[#allocation26_spill] sm:$0xff] }
 0x493   :  { %v7238_v11 = vsub.f32 %v8116_v33, %v2814_v8  ;;  %v8120_v8 = vld [vmem:[#allocation25_spill] sm:$0xff] }
 0x494   :  { %3078 = vadd.xlane.f32.xlu1 %v3077_v24  ;;  %v2935_v24 = vmul.f32 %v7196_v38, %v7196_v38  ;;  %v3086_v10 = vsel %vm1083_vm3, %v2934_v56, 0.0  ;;  %v2937_v38 = vmul.f32 %v7208_v57, %v7208_v57  ;;  %v2749_v45 = vpop.xlane.xlu1 %2748  ;;  %v7250_v33 = vsub.f32 %v8120_v8, %v2816_v34  ;;  %v8124_v34 = vld [vmem:[#allocation30_spill] sm:$0xff] }
 0x495   :  { %8117 = vst [vmem:[#allocation4_spill] sm:$0xff] %v7238_v11 }
 0x496   :  { %3081 = vadd.xlane.f32.xlu0 %v3080_v51  ;;  %v2936_v51 = vmul.f32 %v7202_v15, %v7202_v15  ;;  %v3089_v32 = vsel %vm1083_vm3, %v2935_v24, 0.0  ;;  %v2815_v24 = vmul.f32 0.015625, %v2731_v7  ;;  %v3095_v15 = vsel %vm1083_vm3, %v2937_v38, 0.0  ;;  %8121 = vst [vmem:[#allocation3_spill] sm:$0xff] %v7250_v33 }
 0x498   :  { %3084 = vadd.xlane.f32.xlu1 %v3083_v43  ;;  %v2746_v43 = vpop.xlane.xlu0 %2745  ;;  %v3092_v56 = vsel %vm1083_vm3, %v2936_v51, 0.0  ;;  %v7244_v7 = vsub.f32 %v8118_v21, %v2815_v24  ;;  %v2743_v30 = vpop.xlane.xlu1 %2742  ;;  %v7256_v24 = vsub.f32 %v8122_v63, %v2817_v41  ;;  %v8126_v41 = vld [vmem:[#allocation32_spill] sm:$0xff] }
 0x499   :  { %v2819_v21 = vmul.f32 0.015625, %v2743_v30 }
 0x49a   :  { %3087 = vadd.xlane.f32.xlu0 %v3086_v10  ;;  %v2938_v10 = vmul.f32 %v7214_v55, %v7214_v55  ;;  %v2940_v55 = vmul.f32 %v7226_v62, %v7226_v62  ;;  %8119 = vst [vmem:[#allocation10_spill] sm:$0xff] %v7244_v7  ;;  %8123 = vst [vmem:[#allocation9_spill] sm:$0xff] %v7256_v24  ;;  %v2945_v30 = vmul.f32 %v7256_v24, %v7256_v24 }
 0x49b   :  { %v7268_v63 = vsub.f32 %v8126_v41, %v2819_v21 }
 0x49c   :  { %3090 = vadd.xlane.f32.xlu1 %v3089_v32  ;;  %v2939_v32 = vmul.f32 %v7220_v42, %v7220_v42  ;;  %v3098_v51 = vsel %vm1083_vm3, %v2938_v10, 0.0  ;;  %v3104_v42 = vsel %vm1083_vm3, %v2940_v55, 0.0  ;;  %v3119_v21 = vsel %vm1083_vm3, %v2945_v30, 0.0 }
 0x49d   :  { %8127 = vst [vmem:[#allocation14_spill] sm:$0xff] %v7268_v63 }
 0x49e   :  { %3093 = vadd.xlane.f32.xlu0 %v3092_v56  ;;  %v2740_v56 = vpop.xlane.xlu0 %2739  ;;  %v3101_v38 = vsel %vm1083_vm3, %v2939_v32, 0.0 }
 0x49f   :  { %v2818_v10 = vmul.f32 0.015625, %v2740_v56  ;;  %v2944_v56 = vmul.f32 %v7250_v33, %v7250_v33 }
 0x4a0   :  { %3096 = vadd.xlane.f32.xlu1 %v3095_v15  ;;  %v2941_v15 = vmul.f32 %v7232_v5, %v7232_v5  ;;  %v2943_v5 = vmul.f32 %v7244_v7, %v7244_v7 }
 0x4a1   :  { %v7262_v8 = vsub.f32 %v8124_v34, %v2818_v10  ;;  %v3116_v10 = vsel %vm1083_vm3, %v2944_v56, 0.0  ;;  %v8130_v34 = vld [vmem:[#allocation31_spill] sm:$0xff] }
 0x4a2   :  { %3099 = vadd.xlane.f32.xlu0 %v3098_v51  ;;  %v2942_v51 = vmul.f32 %v7238_v11, %v7238_v11  ;;  %v3107_v32 = vsel %vm1083_vm3, %v2941_v15, 0.0  ;;  %v3113_v15 = vsel %vm1083_vm3, %v2943_v5, 0.0  ;;  %v2947_v5 = vmul.f32 %v7268_v63, %v7268_v63 }
 0x4a3   :  { %8125 = vst [vmem:[#allocation8_spill] sm:$0xff] %v7262_v8 }
 0x4a4   :  { %3102 = vadd.xlane.f32.xlu1 %v3101_v38  ;;  %v2820_v38 = vmul.f32 0.015625, %v2746_v43  ;;  %v3110_v55 = vsel %vm1083_vm3, %v2942_v51, 0.0  ;;  %v8128_v43 = vld [vmem:[#allocation29_spill] sm:$0xff]  ;;  %v2946_v51 = vmul.f32 %v7262_v8, %v7262_v8  ;;  %v3125_v56 = vsel %vm1083_vm3, %v2947_v5, 0.0 }
 0x4a6   :  { %3105 = vadd.xlane.f32.xlu0 %v3104_v42  ;;  %v2821_v42 = vmul.f32 0.015625, %v2749_v45 }
 0x4a8   :  { %3108 = vadd.xlane.f32.xlu1 %v3107_v32  ;;  %v7274_v32 = vsub.f32 %v8128_v43, %v2820_v38  ;;  %v7280_v45 = vsub.f32 %v8130_v34, %v2821_v42 }
 0x4aa   :  { %3111 = vadd.xlane.f32.xlu0 %v3110_v55  ;;  %8129 = vst [vmem:[#allocation7_spill] sm:$0xff] %v7274_v32  ;;  %8131 = vst [vmem:[#allocation13_spill] sm:$0xff] %v7280_v45  ;;  %v3122_v55 = vsel %vm1083_vm3, %v2946_v51, 0.0  ;;  %v2948_v38 = vmul.f32 %v7274_v32, %v7274_v32  ;;  %v2949_v41 = vmul.f32 %v7280_v45, %v7280_v45  ;;  %v8132_v51 = vld [vmem:[#allocation35_spill] sm:$0xff] }
 0x4ac   :  { %3114 = vadd.xlane.f32.xlu1 %v3113_v15  ;;  %v3128_v42 = vsel %vm1083_vm3, %v2948_v38, 0.0  ;;  %v3131_v15 = vsel %vm1083_vm3, %v2949_v41, 0.0 }
 0x4ae   :  { %3117 = vadd.xlane.f32.xlu0 %v3116_v10 }
 0x4b0   :  { %3120 = vadd.xlane.f32.xlu1 %v3119_v21 }
 0x4b2   :  { %3123 = vadd.xlane.f32.xlu0 %v3122_v55 }
 0x4b4   :  { %3126 = vadd.xlane.f32.xlu1 %v3125_v56 }
 0x4b6   :  { %3129 = vadd.xlane.f32.xlu0 %v3128_v42 }
 0x4b8   :  { %3132 = vadd.xlane.f32.xlu1 %v3131_v15 }
 0x4c7   :  { %v2752_v30 = vpop.xlane.xlu0 %2751 }
 0x4c8   :  { %v2822_v43 = vmul.f32 0.015625, %v2752_v30 }
 0x4c9   :  { %v2755_v10 = vpop.xlane.xlu1 %2754 }
 0x4ca   :  { %v7294_v34 = vsub.f32 %v8132_v51, %v2822_v43  ;;  %v2823_v21 = vmul.f32 0.015625, %v2755_v10 }
 0x4cb   :  { %v2962_v55 = vpop.xlane.xlu0 %2961 }
 0x4cc   :  { %8133 = vst [vmem:[#allocation12_spill] sm:$0xff] %v7294_v34  ;;  %v7297_v5 = vsub.f32 %v6841_v19, %v2823_v21  ;;  %v3148_v32 = vmul.f32 0.015625, %v2962_v55  ;;  %v2950_v56 = vmul.f32 %v7294_v34, %v7294_v34 }
 0x4cd   :  { %v2965_v38 = vpop.xlane.xlu1 %2964 }
 0x4ce   :  { %8134 = vst [vmem:[#allocation16_spill] sm:$0xff] %v7297_v5  ;;  %v3212_v42 = vadd.f32 1e-05, %v3148_v32  ;;  %v3149_v45 = vmul.f32 0.015625, %v2965_v38  ;;  %v3134_v41 = vsel %vm1083_vm3, %v2950_v56, 0.0  ;;  %v2951_v15 = vmul.f32 %v7297_v5, %v7297_v5  ;;  %v8135_v56 = vld [vmem:[#allocation2_spill] sm:$0xff] }
 0x4cf   :  { %3135 = vadd.xlane.f32.xlu0 %v3134_v41  ;;  %v2956_v30 = vpop.xlane.xlu0 %2955  ;;  %v3404_v63 = vsub.s32 4, %v8135_v56 }
 0x4d0   :  { %4887 = vrsqrt.f32 %v3212_v42  ;;  %v3213_v43 = vadd.f32 1e-05, %v3149_v45  ;;  %v3146_v10 = vmul.f32 0.015625, %v2956_v30  ;;  %v3137_v19 = vsel %vm1083_vm3, %v2951_v15, 0.0  ;;  %v5017_v15 = vld [vmem:[%s7879_s6] sm:$0x3f] }
 0x4d1   :  { %3138 = vadd.xlane.f32.xlu1 %v3137_v19  ;;  %v2959_v51 = vpop.xlane.xlu1 %2958 }
 0x4d2   :  { %4889 = vrsqrt.f32 %v3213_v43  ;;  %v3210_v21 = vadd.f32 1e-05, %v3146_v10  ;;  %v3147_v55 = vmul.f32 0.015625, %v2959_v51  ;;  %v7309_v43 = vrot.slane %v5017_v15, %v3404_v63  ;;  %v8137_v63 = vld [vmem:[#allocation34_spill] sm:$0xff] }
 0x4d3   :  { %v2974_v34 = vpop.xlane.xlu0 %2973  ;;  %v3472_v10 = vsub.s32 5, %v8135_v56 }
 0x4d4   :  { %4891 = vrsqrt.f32 %v3210_v21  ;;  %v3211_v32 = vadd.f32 1e-05, %v3147_v55  ;;  %v3152_v38 = vmul.f32 0.015625, %v2974_v34  ;;  %v8136_v55 = vld [vmem:[#allocation33_spill] sm:$0xff] }
 0x4d5   :  { %v2977_v8 = vpop.xlane.xlu1 %2976 }
 0x4d6   :  { %4893 = vrsqrt.f32 %v3211_v32  ;;  %v3216_v41 = vadd.f32 1e-05, %v3152_v38  ;;  %v3153_v5 = vmul.f32 0.015625, %v2977_v8 }
 0x4d7   :  { %v2968_v42 = vpop.xlane.xlu0 %2967 }
 0x4d8   :  { %4895 = vrsqrt.f32 %v3216_v41  ;;  %v3217_v45 = vadd.f32 1e-05, %v3153_v5  ;;  %v3150_v30 = vmul.f32 0.015625, %v2968_v42  ;;  %v7313_v42 = vrot.slane %v5017_v15, %v3472_v10 }
 0x4d9   :  { %v2971_v19 = vpop.xlane.xlu1 %2970 }
 0x4da   :  { %v4888_v34 = vpop.eup %4887  ;;  %4897 = vrsqrt.f32 %v3217_v45  ;;  %v3214_v51 = vadd.f32 1e-05, %v3150_v30  ;;  %v3151_v21 = vmul.f32 0.015625, %v2971_v19 }
 0x4db   :  { %v3340_v32 = vmul.f32 %v4888_v34, %v8136_v55  ;;  %v2986_v8 = vpop.xlane.xlu0 %2985 }
 0x4dc   :  { %v4890_v38 = vpop.eup %4889  ;;  %4899 = vrsqrt.f32 %v3214_v51  ;;  %v3215_v5 = vadd.f32 1e-05, %v3151_v21  ;;  %v3156_v41 = vmul.f32 0.015625, %v2986_v8 }
 0x4dd   :  { %v3408_v24 = vmul.f32 %v7309_v43, %v3340_v32  ;;  %v3341_v33 = vmul.f32 %v4890_v38, %v8137_v63  ;;  %v2989_v7 = vpop.xlane.xlu1 %2988 }
 0x4de   :  { %v4892_v56 = vpop.eup %4891  ;;  %4901 = vrsqrt.f32 %v3215_v5  ;;  %v3220_v11 = vadd.f32 1e-05, %v3156_v41  ;;  %v3157_v45 = vmul.f32 0.015625, %v2989_v7 }
 0x4df   :  { %v3409_v30 = vmul.f32 %v7309_v43, %v3341_v33  ;;  %v3338_v19 = vmul.f32 %v4892_v56, %v6838_v28  ;;  %v2980_v34 = vpop.xlane.xlu0 %2979  ;;  %v3476_v15 = vadd.f32 %v7313_v42, %v3408_v24 }
 0x4e0   :  { %v4894_v55 = vpop.eup %4893  ;;  %4903 = vrsqrt.f32 %v3220_v11  ;;  %v3221_v51 = vadd.f32 1e-05, %v3157_v45  ;;  %v3154_v21 = vmul.f32 0.015625, %v2980_v34 }
 0x4e1   :  { %v3477_v10 = vadd.f32 %v7313_v42, %v3409_v30  ;;  %v3339_v32 = vmul.f32 %v4894_v55, %v6848_v35  ;;  %v2983_v8 = vpop.xlane.xlu1 %2982  ;;  %v3406_v38 = vmul.f32 %v7309_v43, %v3338_v19  ;;  %v3540_v30 = vmax.f32 %v3476_v15, 0.0 }
 0x4e2   :  { %v4896_v5 = vpop.eup %4895  ;;  %4905 = vrsqrt.f32 %v3221_v51  ;;  %v3218_v7 = vadd.f32 1e-05, %v3154_v21  ;;  %v3155_v33 = vmul.f32 0.015625, %v2983_v8 }
 0x4e3   :  { %v3344_v28 = vmul.f32 %v4896_v5, %v6857_v49  ;;  %v2998_v41 = vpop.xlane.xlu0 %2997  ;;  %v3407_v11 = vmul.f32 %v7309_v43, %v3339_v32  ;;  %v3474_v63 = vadd.f32 %v7313_v42, %v3406_v38  ;;  %v3541_v35 = vmax.f32 %v3477_v10, 0.0 }
 0x4e4   :  { %v4898_v56 = vpop.eup %4897  ;;  %4907 = vrsqrt.f32 %v3218_v7  ;;  %v3219_v24 = vadd.f32 1e-05, %v3155_v33  ;;  %v3160_v45 = vmul.f32 0.015625, %v2998_v41 }
 0x4e5   :  { %v3345_v34 = vmul.f32 %v4898_v56, %v6865_v16  ;;  %v3001_v19 = vpop.xlane.xlu1 %3000  ;;  %v3475_v55 = vadd.f32 %v7313_v42, %v3407_v11  ;;  %v3412_v8 = vmul.f32 %v7309_v43, %v3344_v28  ;;  %v3538_v5 = vmax.f32 %v3474_v63, 0.0 }
 0x4e6   :  { %v4900_v51 = vpop.eup %4899  ;;  %4909 = vrsqrt.f32 %v3219_v24  ;;  %v3224_v21 = vadd.f32 1e-05, %v3160_v45  ;;  %v3161_v49 = vmul.f32 0.015625, %v3001_v19 }
 0x4e7   :  { %v3342_v32 = vmul.f32 %v4900_v51, %v6871_v31  ;;  %v2992_v38 = vpop.xlane.xlu0 %2991  ;;  %v3539_v7 = vmax.f32 %v3475_v55, 0.0  ;;  %v3413_v33 = vmul.f32 %v7309_v43, %v3345_v34  ;;  %v3480_v41 = vadd.f32 %v7313_v42, %v3412_v8 }
 0x4e8   :  { %v4902_v15 = vpop.eup %4901  ;;  %4911 = vrsqrt.f32 %v3224_v21  ;;  %v3225_v10 = vadd.f32 1e-05, %v3161_v49  ;;  %v3158_v16 = vmul.f32 0.015625, %v2992_v38  ;;  %v3603_v55 = vpack.c.bf16 %v3541_v35, %v3540_v30 }
 0x4e9   :  { %v3343_v11 = vmul.f32 %v4902_v15, %v6879_v50  ;;  %v2995_v56 = vpop.xlane.xlu1 %2994  ;;  %v3602_v24 = vpack.c.bf16 %v3539_v7, %v3538_v5  ;;  %v3410_v45 = vmul.f32 %v7309_v43, %v3342_v32  ;;  %v3481_v28 = vadd.f32 %v7313_v42, %v3413_v33 }
 0x4ea   :  { %v4904_v31 = vpop.eup %4903  ;;  %4913 = vrsqrt.f32 %v3225_v10  ;;  %v3222_v63 = vadd.f32 1e-05, %v3158_v16  ;;  %v3159_v19 = vmul.f32 0.015625, %v2995_v56  ;;  %v3544_v35 = vmax.f32 %v3480_v41, 0.0 }
 0x4eb   :  { %v3348_v34 = vmul.f32 %v4904_v31, %v6887_v20  ;;  %v3010_v51 = vpop.xlane.xlu0 %3009  ;;  %4619 = vmatprep.mubr.msk.bf16.mxu1 %vm1083_vm3, %v3602_v24  ;;  %v3411_v21 = vmul.f32 %v7309_v43, %v3343_v11  ;;  %v3478_v50 = vadd.f32 %v7313_v42, %v3410_v45  ;;  %v3545_v20 = vmax.f32 %v3481_v28, 0.0 }
 0x4ec   :  { %v4906_v49 = vpop.eup %4905  ;;  %4915 = vrsqrt.f32 %v3222_v63  ;;  %v3223_v8 = vadd.f32 1e-05, %v3159_v19  ;;  %v3164_v32 = vmul.f32 0.015625, %v3010_v51  ;;  %4620 = vmatmul.mubr.msk.bf16.vlgmr.msra.gmra.mrb[64].mxu1 %vm1083_vm3, %v3603_v55 }
 0x4ed   :  { %v3349_v38 = vmul.f32 %v4906_v49, %v6894_v37  ;;  %v3013_v5 = vpop.xlane.xlu1 %3012  ;;  %v3479_v30 = vadd.f32 %v7313_v42, %v3411_v21  ;;  %v3416_v10 = vmul.f32 %v7309_v43, %v3348_v34  ;;  %v3542_v56 = vmax.f32 %v3478_v50, 0.0 }
 0x4ee   :  { %v4908_v7 = vpop.eup %4907  ;;  %4917 = vrsqrt.f32 %v3223_v8  ;;  %v3228_v33 = vadd.f32 1e-05, %v3164_v32  ;;  %v3165_v15 = vmul.f32 0.015625, %v3013_v5  ;;  %v3605_v49 = vpack.c.bf16 %v3545_v20, %v3544_v35 }
 0x4ef   :  { %v3346_v16 = vmul.f32 %v4908_v7, %v6903_v4  ;;  %v3004_v11 = vpop.xlane.xlu0 %3003  ;;  %v3543_v24 = vmax.f32 %v3479_v30, 0.0  ;;  %v3417_v45 = vmul.f32 %v7309_v43, %v3349_v38  ;;  %v3484_v41 = vadd.f32 %v7313_v42, %v3416_v10 }
 0x4f0   :  { %v4910_v31 = vpop.eup %4909  ;;  %4919 = vrsqrt.f32 %v3228_v33  ;;  %v3229_v37 = vadd.f32 1e-05, %v3165_v15  ;;  %v3162_v63 = vmul.f32 0.015625, %v3004_v11 }
 0x4f1   :  { %v3347_v28 = vmul.f32 %v4910_v31, %v6912_v60  ;;  %v3007_v19 = vpop.xlane.xlu1 %3006  ;;  %v3604_v55 = vpack.c.bf16 %v3543_v24, %v3542_v56  ;;  %v3414_v51 = vmul.f32 %v7309_v43, %v3346_v16  ;;  %v3485_v34 = vadd.f32 %v7313_v42, %v3417_v45 }
 0x4f2   :  { %v4912_v4 = vpop.eup %4911  ;;  %4921 = vrsqrt.f32 %v3229_v37  ;;  %v3226_v21 = vadd.f32 1e-05, %v3162_v63  ;;  %v3163_v50 = vmul.f32 0.015625, %v3007_v19  ;;  %v3548_v20 = vmax.f32 %v3484_v41, 0.0 }
 0x4f3   :  { %v3352_v8 = vmul.f32 %v4912_v4, %v6919_v0  ;;  %v3022_v32 = vpop.xlane.xlu0 %3021  ;;  %4623 = vmatprep.mubr.msk.bf16.mxu1 %vm1083_vm3, %v3604_v55  ;;  %v3415_v38 = vmul.f32 %v7309_v43, %v3347_v28  ;;  %v3482_v60 = vadd.f32 %v7313_v42, %v3414_v51  ;;  %v3549_v0 = vmax.f32 %v3485_v34, 0.0 }
 0x4f4   :  { %v4914_v5 = vpop.eup %4913  ;;  %4923 = vrsqrt.f32 %v3226_v21  ;;  %v3227_v30 = vadd.f32 1e-05, %v3163_v50  ;;  %v3168_v7 = vmul.f32 0.015625, %v3022_v32  ;;  %4624 = vmatmul.mubr.msk.bf16.gmra.mrb[68].mxu1 %vm1083_vm3, %v3605_v49 }
 0x4f5   :  { %v3353_v33 = vmul.f32 %v4914_v5, %v6928_v17  ;;  %v3025_v15 = vpop.xlane.xlu1 %3024  ;;  %v3483_v35 = vadd.f32 %v7313_v42, %v3415_v38  ;;  %v3420_v56 = vmul.f32 %v7309_v43, %v3352_v8  ;;  %v3546_v31 = vmax.f32 %v3482_v60, 0.0 }
 0x4f6   :  { %v4916_v10 = vpop.eup %4915  ;;  %4925 = vrsqrt.f32 %v3227_v30  ;;  %v3232_v16 = vadd.f32 1e-05, %v3168_v7  ;;  %v3169_v11 = vmul.f32 0.015625, %v3025_v15  ;;  %v3607_v8 = vpack.c.bf16 %v3549_v0, %v3548_v20 }
 0x4f7   :  { %v3350_v24 = vmul.f32 %v4916_v10, %v6937_v40  ;;  %v3016_v45 = vpop.xlane.xlu0 %3015  ;;  %v3547_v37 = vmax.f32 %v3483_v35, 0.0  ;;  %v3421_v63 = vmul.f32 %v7309_v43, %v3353_v33  ;;  %v3488_v41 = vadd.f32 %v7313_v42, %v3420_v56 }
 0x4f8   :  { %v4918_v28 = vpop.eup %4917  ;;  %4927 = vrsqrt.f32 %v3232_v16  ;;  %v3233_v17 = vadd.f32 1e-05, %v3169_v11  ;;  %v3166_v19 = vmul.f32 0.015625, %v3016_v45 }
 0x4f9   :  { %v3351_v55 = vmul.f32 %v4918_v28, %v6944_v61  ;;  %v3019_v51 = vpop.xlane.xlu1 %3018  ;;  %v3606_v34 = vpack.c.bf16 %v3547_v37, %v3546_v31  ;;  %v3418_v4 = vmul.f32 %v7309_v43, %v3350_v24  ;;  %v3489_v21 = vadd.f32 %v7313_v42, %v3421_v63 }
 0x4fa   :  { %v4920_v40 = vpop.eup %4919  ;;  %4929 = vrsqrt.f32 %v3233_v17  ;;  %v3230_v50 = vadd.f32 1e-05, %v3166_v19  ;;  %v3167_v49 = vmul.f32 0.015625, %v3019_v51  ;;  %v3552_v0 = vmax.f32 %v3488_v41, 0.0 }
 0x4fb   :  { %v3356_v32 = vmul.f32 %v4920_v40, %v6953_v27  ;;  %v2758_v38 = vpop.xlane.xlu0 %2757  ;;  %4627 = vmatprep.mubr.msk.bf16.mxu1 %vm1083_vm3, %v3606_v34  ;;  %v3419_v60 = vmul.f32 %v7309_v43, %v3351_v55  ;;  %v3486_v61 = vadd.f32 %v7313_v42, %v3418_v4  ;;  %v3553_v5 = vmax.f32 %v3489_v21, 0.0 }
 0x4fc   :  { %v4922_v30 = vpop.eup %4921  ;;  %4931 = vrsqrt.f32 %v3230_v50  ;;  %v3231_v7 = vadd.f32 1e-05, %v3167_v49  ;;  %v2824_v33 = vmul.f32 0.015625, %v2758_v38  ;;  %4628 = vmatmul.mubr.msk.bf16.gmra.mrb[72].mxu1 %vm1083_vm3, %v3607_v8 }
 0x4fd   :  { %v3357_v15 = vmul.f32 %v4922_v30, %v6962_v47  ;;  %v2761_v35 = vpop.xlane.xlu1 %2760  ;;  %v3487_v20 = vadd.f32 %v7313_v42, %v3419_v60  ;;  %v3550_v27 = vmax.f32 %v3486_v61, 0.0  ;;  %v3424_v56 = vmul.f32 %v7309_v43, %v3356_v32 }
 0x4fe   :  { %v4924_v10 = vpop.eup %4923  ;;  %4933 = vrsqrt.f32 %v3231_v7  ;;  %v7371_v16 = vsub.f32 %v7036_v54, %v2824_v33  ;;  %v2825_v11 = vmul.f32 0.015625, %v2761_v35  ;;  %v3609_v37 = vpack.c.bf16 %v3553_v5, %v3552_v0 }
 0x4ff   :  { %v3354_v24 = vmul.f32 %v4924_v10, %v6969_v6  ;;  %v3028_v45 = vpop.xlane.xlu0 %3027  ;;  %v3551_v31 = vmax.f32 %v3487_v20, 0.0  ;;  %v3425_v47 = vmul.f32 %v7309_v43, %v3357_v15  ;;  %v3492_v54 = vadd.f32 %v7313_v42, %v3424_v56 }
 0x500   :  { %v4926_v63 = vpop.eup %4925  ;;  %v7377_v28 = vsub.f32 %v7048_v29, %v2825_v11  ;;  %v3170_v17 = vmul.f32 0.015625, %v3028_v45  ;;  %v2952_v19 = vmul.f32 %v7371_v16, %v7371_v16 }
 0x501   :  { %v3355_v41 = vmul.f32 %v4926_v63, %v6978_v22  ;;  %v3031_v55 = vpop.xlane.xlu1 %3030  ;;  %v3608_v51 = vpack.c.bf16 %v3551_v31, %v3550_v27  ;;  %v3422_v6 = vmul.f32 %v7309_v43, %v3354_v24  ;;  %v3493_v34 = vadd.f32 %v7313_v42, %v3425_v47 }
 0x502   :  { %v4928_v4 = vpop.eup %4927  ;;  %v3234_v21 = vadd.f32 1e-05, %v3170_v17  ;;  %v3171_v40 = vmul.f32 0.015625, %v3031_v55  ;;  %v3140_v29 = vsel %vm1083_vm3, %v2952_v19, 0.0  ;;  %v2953_v50 = vmul.f32 %v7377_v28, %v7377_v28 }
 0x503   :  { %v3360_v49 = vmul.f32 %v4928_v4, %v6987_v39  ;;  %3141 = vadd.xlane.f32.xlu0 %v3140_v29  ;;  %v3034_v8 = vpop.xlane.xlu0 %3033  ;;  %4631 = vmatprep.mubr.msk.bf16.mxu1 %vm1083_vm3, %v3608_v51  ;;  %v3423_v22 = vmul.f32 %v7309_v43, %v3355_v41  ;;  %v3490_v32 = vadd.f32 %v7313_v42, %v3422_v6  ;;  %v3557_v33 = vmax.f32 %v3493_v34, 0.0 }
 0x504   :  { %v4930_v38 = vpop.eup %4929  ;;  %4935 = vrsqrt.f32 %v3234_v21  ;;  %v3235_v60 = vadd.f32 1e-05, %v3171_v40  ;;  %v3172_v61 = vmul.f32 0.015625, %v3034_v8  ;;  %4632 = vmatmul.mubr.msk.bf16.gmra.mrb[76].mxu1 %vm1083_vm3, %v3609_v37  ;;  %v3143_v5 = vsel %vm1083_vm3, %v2953_v50, 0.0 }
 0x505   :  { %v3361_v30 = vmul.f32 %v4930_v38, %v6994_v53  ;;  %3144 = vadd.xlane.f32.xlu1 %v3143_v5  ;;  %v3037_v39 = vpop.xlane.xlu1 %3036  ;;  %v3491_v7 = vadd.f32 %v7313_v42, %v3423_v22  ;;  %v3556_v27 = vmax.f32 %v3492_v54, 0.0  ;;  %v3554_v11 = vmax.f32 %v3490_v32, 0.0 }
 0x506   :  { %v4932_v15 = vpop.eup %4931  ;;  %4937 = vrsqrt.f32 %v3235_v60  ;;  %v3236_v35 = vadd.f32 1e-05, %v3172_v61  ;;  %v3173_v20 = vmul.f32 0.015625, %v3037_v39  ;;  %v3428_v37 = vmul.f32 %v7309_v43, %v3360_v49 }
 0x507   :  { %v3358_v0 = vmul.f32 %v4932_v15, %v7003_v9  ;;  %v3040_v10 = vpop.xlane.xlu0 %3039  ;;  %v3555_v56 = vmax.f32 %v3491_v7, 0.0  ;;  %v3429_v24 = vmul.f32 %v7309_v43, %v3361_v30  ;;  %v3611_v19 = vpack.c.bf16 %v3557_v33, %v3556_v27 }
 0x508   :  { %v4934_v45 = vpop.eup %4933  ;;  %4939 = vrsqrt.f32 %v3236_v35  ;;  %v3237_v53 = vadd.f32 1e-05, %v3173_v20  ;;  %v3174_v31 = vmul.f32 0.015625, %v3040_v10  ;;  %v3496_v21 = vadd.f32 %v7313_v42, %v3428_v37 }
 0x509   :  { %v3359_v47 = vmul.f32 %v4934_v45, %v7014_v2  ;;  %v3043_v63 = vpop.xlane.xlu1 %3042  ;;  %v3610_v17 = vpack.c.bf16 %v3555_v56, %v3554_v11  ;;  %v3426_v54 = vmul.f32 %v7309_v43, %v3358_v0  ;;  %v3497_v55 = vadd.f32 %v7313_v42, %v3429_v24 }
 0x50a   :  { %4941 = vrsqrt.f32 %v3237_v53  ;;  %v3238_v9 = vadd.f32 1e-05, %v3174_v31  ;;  %v3175_v41 = vmul.f32 0.015625, %v3043_v63  ;;  %v3560_v7 = vmax.f32 %v3496_v21, 0.0 }
 0x50b   :  { %v3046_v51 = vpop.xlane.xlu0 %3045  ;;  %4635 = vmatprep.mubr.msk.bf16.mxu1 %vm1083_vm3, %v3610_v17  ;;  %v3427_v6 = vmul.f32 %v7309_v43, %v3359_v47  ;;  %v3494_v34 = vadd.f32 %v7313_v42, %v3426_v54  ;;  %v3561_v22 = vmax.f32 %v3497_v55, 0.0 }
 0x50c   :  { %4943 = vrsqrt.f32 %v3238_v9  ;;  %v3239_v4 = vadd.f32 1e-05, %v3175_v41  ;;  %v3176_v2 = vmul.f32 0.015625, %v3046_v51  ;;  %4636 = vmatmul.mubr.msk.bf16.gmra.mrb[80].mxu1 %vm1083_vm3, %v3611_v19 }
 0x50d   :  { %v3049_v40 = vpop.xlane.xlu1 %3048  ;;  %v3495_v29 = vadd.f32 %v7313_v42, %v3427_v6  ;;  %v3558_v60 = vmax.f32 %v3494_v34, 0.0  ;;  %v3613_v11 = vpack.c.bf16 %v3561_v22, %v3560_v7 }
 0x50e   :  { %v4936_v50 = vpop.eup %4935  ;;  %4945 = vrsqrt.f32 %v3239_v4  ;;  %v3240_v49 = vadd.f32 1e-05, %v3176_v2  ;;  %v3177_v8 = vmul.f32 0.015625, %v3049_v40 }
 0x50f   :  { %v3362_v32 = vmul.f32 %v4936_v50, %v7040_v48  ;;  %v3052_v38 = vpop.xlane.xlu0 %3051  ;;  %v3559_v61 = vmax.f32 %v3495_v29, 0.0 }
 0x510   :  { %v4938_v5 = vpop.eup %4937  ;;  %4947 = vrsqrt.f32 %v3240_v49  ;;  %v3241_v30 = vadd.f32 1e-05, %v3177_v8  ;;  %v3178_v39 = vmul.f32 0.015625, %v3052_v38 }
 0x511   :  { %v3363_v33 = vmul.f32 %v4938_v5, %v7052_v44  ;;  %v3055_v15 = vpop.xlane.xlu1 %3054  ;;  %v3612_v35 = vpack.c.bf16 %v3559_v61, %v3558_v60  ;;  %v3430_v20 = vmul.f32 %v7309_v43, %v3362_v32 }
 0x512   :  { %v4940_v27 = vpop.eup %4939  ;;  %4949 = vrsqrt.f32 %v3241_v30  ;;  %v3242_v0 = vadd.f32 1e-05, %v3178_v39  ;;  %v3179_v10 = vmul.f32 0.015625, %v3055_v15 }
 0x513   :  { %v3364_v48 = vmul.f32 %v4940_v27, %v7058_v59  ;;  %v3058_v56 = vpop.xlane.xlu0 %3057  ;;  %4639 = vmatprep.mubr.msk.bf16.mxu1 %vm1083_vm3, %v3612_v35  ;;  %v3431_v24 = vmul.f32 %v7309_v43, %v3363_v33  ;;  %v3498_v45 = vadd.f32 %v7313_v42, %v3430_v20 }
 0x514   :  { %v4942_v53 = vpop.eup %4941  ;;  %4951 = vrsqrt.f32 %v3242_v0  ;;  %v3243_v44 = vadd.f32 1e-05, %v3179_v10  ;;  %v3180_v31 = vmul.f32 0.015625, %v3058_v56  ;;  %4640 = vmatmul.mubr.msk.bf16.gmra.mrb[84].mxu1 %vm1083_vm3, %v3613_v11 }
 0x515   :  { %v3365_v37 = vmul.f32 %v4942_v53, %v7068_v52  ;;  %v3061_v47 = vpop.xlane.xlu1 %3060  ;;  %v3499_v63 = vadd.f32 %v7313_v42, %v3431_v24  ;;  %v3432_v59 = vmul.f32 %v7309_v43, %v3364_v48  ;;  %v3562_v9 = vmax.f32 %v3498_v45, 0.0 }
 0x516   :  { %v4944_v17 = vpop.eup %4943  ;;  %4953 = vrsqrt.f32 %v3243_v44  ;;  %v3244_v19 = vadd.f32 1e-05, %v3180_v31  ;;  %v3181_v54 = vmul.f32 0.015625, %v3061_v47 }
 0x517   :  { %v3366_v41 = vmul.f32 %v4944_v17, %v7077_v12  ;;  %v3064_v55 = vpop.xlane.xlu0 %3063  ;;  %v3563_v51 = vmax.f32 %v3499_v63, 0.0  ;;  %v3433_v6 = vmul.f32 %v7309_v43, %v3365_v37  ;;  %v3500_v34 = vadd.f32 %v7313_v42, %v3432_v59 }
 0x518   :  { %v4946_v4 = vpop.eup %4945  ;;  %4955 = vrsqrt.f32 %v3244_v19  ;;  %v3245_v52 = vadd.f32 1e-05, %v3181_v54  ;;  %v3182_v2 = vmul.f32 0.015625, %v3064_v55 }
 0x519   :  { %v3367_v21 = vmul.f32 %v4946_v4, %v7084_v25  ;;  %v3067_v40 = vpop.xlane.xlu1 %3066  ;;  %v3614_v29 = vpack.c.bf16 %v3563_v51, %v3562_v9  ;;  %v3501_v50 = vadd.f32 %v7313_v42, %v3433_v6  ;;  %v3434_v22 = vmul.f32 %v7309_v43, %v3366_v41 }
 0x51a   :  { %v4948_v49 = vpop.eup %4947  ;;  %4957 = vrsqrt.f32 %v3245_v52  ;;  %v3246_v8 = vadd.f32 1e-05, %v3182_v2  ;;  %v3183_v12 = vmul.f32 0.015625, %v3067_v40  ;;  %v3564_v60 = vmax.f32 %v3500_v34, 0.0 }
 0x51b   :  { %v3368_v32 = vmul.f32 %v4948_v49, %v7090_v58  ;;  %v3070_v38 = vpop.xlane.xlu0 %3069  ;;  %4643 = vmatprep.mubr.msk.bf16.mxu1 %vm1083_vm3, %v3614_v29  ;;  %v3565_v61 = vmax.f32 %v3501_v50, 0.0  ;;  %v3435_v5 = vmul.f32 %v7309_v43, %v3367_v21  ;;  %v3502_v7 = vadd.f32 %v7313_v42, %v3434_v22 }
 0x51c   :  { %v4950_v25 = vpop.eup %4949  ;;  %4959 = vrsqrt.f32 %v3246_v8  ;;  %v3247_v30 = vadd.f32 1e-05, %v3183_v12  ;;  %v3184_v39 = vmul.f32 0.015625, %v3070_v38 }
 0x51d   :  { %v3369_v33 = vmul.f32 %v4950_v25, %v7097_v26  ;;  %v3073_v15 = vpop.xlane.xlu1 %3072  ;;  %v3615_v35 = vpack.c.bf16 %v3565_v61, %v3564_v60  ;;  %v3503_v20 = vadd.f32 %v7313_v42, %v3435_v5  ;;  %v3436_v58 = vmul.f32 %v7309_v43, %v3368_v32 }
 0x51e   :  { %v4952_v27 = vpop.eup %4951  ;;  %4961 = vrsqrt.f32 %v3247_v30  ;;  %v3248_v0 = vadd.f32 1e-05, %v3184_v39  ;;  %v3185_v10 = vmul.f32 0.015625, %v3073_v15  ;;  %v3566_v11 = vmax.f32 %v3502_v7, 0.0 }
 0x51f   :  { %v3370_v48 = vmul.f32 %v4952_v27, %v7107_v1  ;;  %v3076_v56 = vpop.xlane.xlu0 %3075  ;;  %4644 = vmatmul.mubr.msk.bf16.gmra.mrb[88].mxu1 %vm1083_vm3, %v3615_v35  ;;  %v3567_v24 = vmax.f32 %v3503_v20, 0.0  ;;  %v3437_v45 = vmul.f32 %v7309_v43, %v3369_v33  ;;  %v3504_v26 = vadd.f32 %v7313_v42, %v3436_v58  ;;  %v8138_v58 = vld [vmem:[#allocation17_spill] sm:$0xff] }
 0x520   :  { %v4954_v53 = vpop.eup %4953  ;;  %4963 = vrsqrt.f32 %v3248_v0  ;;  %v3249_v44 = vadd.f32 1e-05, %v3185_v10  ;;  %v3186_v31 = vmul.f32 0.015625, %v3076_v56 }
 0x521   :  { %v3371_v37 = vmul.f32 %v4954_v53, %v7116_v46  ;;  %v3079_v47 = vpop.xlane.xlu1 %3078  ;;  %v3616_v63 = vpack.c.bf16 %v3567_v24, %v3566_v11  ;;  %v3505_v59 = vadd.f32 %v7313_v42, %v3437_v45  ;;  %v3438_v54 = vmul.f32 %v7309_v43, %v3370_v48 }
 0x522   :  { %v4956_v17 = vpop.eup %4955  ;;  %4965 = vrsqrt.f32 %v3249_v44  ;;  %v3250_v1 = vadd.f32 1e-05, %v3186_v31  ;;  %v3187_v19 = vmul.f32 0.015625, %v3079_v47  ;;  %v3568_v55 = vmax.f32 %v3504_v26, 0.0  ;;  %v8139_v26 = vld [vmem:[#allocation18_spill] sm:$0xff] }
 0x523   :  { %v3372_v9 = vmul.f32 %v4956_v17, %v7122_v23  ;;  %v3082_v41 = vpop.xlane.xlu0 %3081  ;;  %4647 = vmatprep.mubr.msk.bf16.mxu1 %vm1083_vm3, %v3616_v63  ;;  %v3569_v51 = vmax.f32 %v3505_v59, 0.0  ;;  %v3439_v6 = vmul.f32 %v7309_v43, %v3371_v37  ;;  %v3506_v52 = vadd.f32 %v7313_v42, %v3438_v54 }
 0x524   :  { %v4958_v46 = vpop.eup %4957  ;;  %4967 = vrsqrt.f32 %v3250_v1  ;;  %v3251_v34 = vadd.f32 1e-05, %v3187_v19  ;;  %v3188_v4 = vmul.f32 0.015625, %v3082_v41 }
 0x525   :  { %v3373_v2 = vmul.f32 %v4958_v46, %v7129_v36  ;;  %v3085_v21 = vpop.xlane.xlu1 %3084  ;;  %v3617_v40 = vpack.c.bf16 %v3569_v51, %v3568_v55  ;;  %v3507_v29 = vadd.f32 %v7313_v42, %v3439_v6  ;;  %v3440_v23 = vmul.f32 %v7309_v43, %v3372_v9 }
 0x526   :  { %v4960_v50 = vpop.eup %4959  ;;  %4969 = vrsqrt.f32 %v3251_v34  ;;  %v3252_v49 = vadd.f32 1e-05, %v3188_v4  ;;  %v3189_v8 = vmul.f32 0.015625, %v3085_v21  ;;  %v3570_v12 = vmax.f32 %v3506_v52, 0.0  ;;  %v8140_v34 = vld [vmem:[#allocation20_spill] sm:$0xff] }
 0x527   :  { %v3374_v22 = vmul.f32 %v4960_v50, %v7137_v18  ;;  %v3088_v32 = vpop.xlane.xlu0 %3087  ;;  %4648 = vmatmul.mubr.msk.bf16.gmra.mrb[92].mxu1 %vm1083_vm3, %v3617_v40  ;;  %v3571_v38 = vmax.f32 %v3507_v29, 0.0  ;;  %v3441_v60 = vmul.f32 %v7309_v43, %v3373_v2  ;;  %v3508_v36 = vadd.f32 %v7313_v42, %v3440_v23  ;;  %v8141_v50 = vld [vmem:[#allocation23_spill] sm:$0xff] }
 0x528   :  { %v4962_v61 = vpop.eup %4961  ;;  %4971 = vrsqrt.f32 %v3252_v49  ;;  %v3253_v5 = vadd.f32 1e-05, %v3189_v8  ;;  %v3190_v25 = vmul.f32 0.015625, %v3088_v32 }
 0x529   :  { %v3375_v30 = vmul.f32 %v4962_v61, %v7144_v14  ;;  %v3091_v39 = vpop.xlane.xlu1 %3090  ;;  %v3618_v7 = vpack.c.bf16 %v3571_v38, %v3570_v12  ;;  %v3509_v33 = vadd.f32 %v7313_v42, %v3441_v60  ;;  %v3442_v20 = vmul.f32 %v7309_v43, %v3374_v22 }
 0x52a   :  { %v4964_v15 = vpop.eup %4963  ;;  %4973 = vrsqrt.f32 %v3253_v5  ;;  %v3254_v18 = vadd.f32 1e-05, %v3190_v25  ;;  %v3191_v35 = vmul.f32 0.015625, %v3091_v39  ;;  %v3572_v10 = vmax.f32 %v3508_v36, 0.0  ;;  %v8142_v5 = vld [vmem:[#allocation19_spill] sm:$0xff] }
 0x52b   :  { %v3376_v27 = vmul.f32 %v4964_v15, %v8138_v58  ;;  %v3094_v0 = vpop.xlane.xlu0 %3093  ;;  %4651 = vmatprep.mubr.msk.bf16.mxu1 %vm1083_vm3, %v3618_v7  ;;  %v3573_v11 = vmax.f32 %v3509_v33, 0.0  ;;  %v3443_v48 = vmul.f32 %v7309_v43, %v3375_v30  ;;  %v3510_v45 = vadd.f32 %v7313_v42, %v3442_v20 }
 0x52c   :  { %v4966_v14 = vpop.eup %4965  ;;  %4975 = vrsqrt.f32 %v3254_v18  ;;  %v3255_v56 = vadd.f32 1e-05, %v3191_v35  ;;  %v3192_v24 = vmul.f32 0.015625, %v3094_v0 }
 0x52d   :  { %v3377_v53 = vmul.f32 %v4966_v14, %v8139_v26  ;;  %v3097_v44 = vpop.xlane.xlu1 %3096  ;;  %v3619_v31 = vpack.c.bf16 %v3573_v11, %v3572_v10  ;;  %v3511_v37 = vadd.f32 %v7313_v42, %v3443_v48  ;;  %v3444_v47 = vmul.f32 %v7309_v43, %v3376_v27 }
 0x52e   :  { %v4968_v63 = vpop.eup %4967  ;;  %4977 = vrsqrt.f32 %v3255_v56  ;;  %v3256_v59 = vadd.f32 1e-05, %v3192_v24  ;;  %v3193_v17 = vmul.f32 0.015625, %v3097_v44  ;;  %v3574_v1 = vmax.f32 %v3510_v45, 0.0  ;;  %v8143_v24 = vld [vmem:[#allocation22_spill] sm:$0xff] }
 0x52f   :  { %v3378_v19 = vmul.f32 %v4968_v63, %v7163_v13  ;;  %v3100_v54 = vpop.xlane.xlu0 %3099  ;;  %4652 = vmatmul.mubr.msk.bf16.gmra.mrb[96].mxu1 %vm1083_vm3, %v3619_v31  ;;  %v3575_v9 = vmax.f32 %v3511_v37, 0.0  ;;  %v3445_v41 = vmul.f32 %v7309_v43, %v3377_v53  ;;  %v3512_v55 = vadd.f32 %v7313_v42, %v3444_v47  ;;  %v8144_v63 = vld [vmem:[#allocation24_spill] sm:$0xff] }
 0x530   :  { %v4970_v51 = vpop.eup %4969  ;;  %4979 = vrsqrt.f32 %v3256_v59  ;;  %v3257_v6 = vadd.f32 1e-05, %v3193_v17  ;;  %v3194_v46 = vmul.f32 0.015625, %v3100_v54 }
 0x531   :  { %v3379_v4 = vmul.f32 %v4970_v51, %v8140_v34  ;;  %v3103_v52 = vpop.xlane.xlu1 %3102  ;;  %v3620_v2 = vpack.c.bf16 %v3575_v9, %v3574_v1  ;;  %v3513_v21 = vadd.f32 %v7313_v42, %v3445_v41  ;;  %v3446_v23 = vmul.f32 %v7309_v43, %v3378_v19 }
 0x532   :  { %v4972_v40 = vpop.eup %4971  ;;  %4981 = vrsqrt.f32 %v3257_v6  ;;  %v3258_v13 = vadd.f32 1e-05, %v3194_v46  ;;  %v3195_v29 = vmul.f32 0.015625, %v3103_v52  ;;  %v3576_v12 = vmax.f32 %v3512_v55, 0.0 }
 0x533   :  { %v3380_v49 = vmul.f32 %v4972_v40, %v8141_v50  ;;  %v3106_v8 = vpop.xlane.xlu0 %3105  ;;  %4655 = vmatprep.mubr.msk.bf16.mxu1 %vm1083_vm3, %v3620_v2  ;;  %v3577_v22 = vmax.f32 %v3513_v21, 0.0  ;;  %v3447_v32 = vmul.f32 %v7309_v43, %v3379_v4  ;;  %v3514_v61 = vadd.f32 %v7313_v42, %v3446_v23 }
 0x534   :  { %v4974_v38 = vpop.eup %4973  ;;  %4983 = vrsqrt.f32 %v3258_v13  ;;  %v3259_v60 = vadd.f32 1e-05, %v3195_v29  ;;  %v3196_v36 = vmul.f32 0.015625, %v3106_v8  ;;  %v8145_v29 = vld [vmem:[#allocation6_spill] sm:$0xff] }
 0x535   :  { %v3381_v25 = vmul.f32 %v4974_v38, %v8142_v5  ;;  %v3109_v30 = vpop.xlane.xlu1 %3108  ;;  %v3621_v39 = vpack.c.bf16 %v3577_v22, %v3576_v12  ;;  %v3515_v7 = vadd.f32 %v7313_v42, %v3447_v32  ;;  %v3448_v33 = vmul.f32 %v7309_v43, %v3380_v49  ;;  %v8146_v38 = vld [vmem:[#allocation21_spill] sm:$0xff] }
 0x536   :  { %v4976_v15 = vpop.eup %4975  ;;  %4985 = vrsqrt.f32 %v3259_v60  ;;  %v3260_v18 = vadd.f32 1e-05, %v3196_v36  ;;  %v3197_v35 = vmul.f32 0.015625, %v3109_v30  ;;  %v3578_v20 = vmax.f32 %v3514_v61, 0.0 }
 0x537   :  { %v3382_v58 = vmul.f32 %v4976_v15, %v7189_v3  ;;  %v3112_v27 = vpop.xlane.xlu0 %3111  ;;  %4656 = vmatmul.mubr.msk.bf16.gmra.mrb[100].mxu1 %vm1083_vm3, %v3621_v39  ;;  %v3579_v0 = vmax.f32 %v3515_v7, 0.0  ;;  %v3449_v10 = vmul.f32 %v7309_v43, %v3381_v25  ;;  %v3516_v11 = vadd.f32 %v7313_v42, %v3448_v33 }
 0x538   :  { %v4978_v48 = vpop.eup %4977  ;;  %4987 = vrsqrt.f32 %v3260_v18  ;;  %v3261_v14 = vadd.f32 1e-05, %v3197_v35  ;;  %v3198_v56 = vmul.f32 0.015625, %v3112_v27 }
 0x539   :  { %v3383_v45 = vmul.f32 %v4978_v48, %v8143_v24  ;;  %v3115_v26 = vpop.xlane.xlu1 %3114  ;;  %v3622_v53 = vpack.c.bf16 %v3579_v0, %v3578_v20  ;;  %v3517_v44 = vadd.f32 %v7313_v42, %v3449_v10  ;;  %v3450_v47 = vmul.f32 %v7309_v43, %v3382_v58 }
 0x53a   :  { %v4980_v31 = vpop.eup %4979  ;;  %4989 = vrsqrt.f32 %v3261_v14  ;;  %v3262_v3 = vadd.f32 1e-05, %v3198_v56  ;;  %v3199_v37 = vmul.f32 0.015625, %v3115_v26  ;;  %v3580_v1 = vmax.f32 %v3516_v11, 0.0  ;;  %v8147_v11 = vld [vmem:[#allocation5_spill] sm:$0xff] }
 0x53b   :  { %v3384_v59 = vmul.f32 %v4980_v31, %v8144_v63  ;;  %v3118_v17 = vpop.xlane.xlu0 %3117  ;;  %4659 = vmatprep.mubr.msk.bf16.mxu1 %vm1083_vm3, %v3622_v53  ;;  %v3581_v19 = vmax.f32 %v3517_v44, 0.0  ;;  %v3451_v54 = vmul.f32 %v7309_v43, %v3383_v45  ;;  %v3518_v51 = vadd.f32 %v7313_v42, %v3450_v47  ;;  %v8148_v31 = vld [vmem:[#allocation4_spill] sm:$0xff] }
 0x53c   :  { %v4982_v9 = vpop.eup %4981  ;;  %4991 = vrsqrt.f32 %v3262_v3  ;;  %v3263_v41 = vadd.f32 1e-05, %v3199_v37  ;;  %v3200_v55 = vmul.f32 0.015625, %v3118_v17 }
 0x53d   :  { %v3385_v6 = vmul.f32 %v4982_v9, %v7208_v57  ;;  %v3121_v46 = vpop.xlane.xlu1 %3120  ;;  %v3623_v34 = vpack.c.bf16 %v3581_v19, %v3580_v1  ;;  %v3519_v4 = vadd.f32 %v7313_v42, %v3451_v54  ;;  %v3452_v52 = vmul.f32 %v7309_v43, %v3384_v59  ;;  %v8149_v1 = vld [vmem:[#allocation10_spill] sm:$0xff] }
 0x53e   :  { %v4984_v2 = vpop.eup %4983  ;;  %4993 = vrsqrt.f32 %v3263_v41  ;;  %v3264_v21 = vadd.f32 1e-05, %v3200_v55  ;;  %v3201_v40 = vmul.f32 0.015625, %v3121_v46  ;;  %v3582_v13 = vmax.f32 %v3518_v51, 0.0  ;;  %v8150_v51 = vld [vmem:[#allocation3_spill] sm:$0xff] }
 0x53f   :  { %v3386_v23 = vmul.f32 %v4984_v2, %v8145_v29  ;;  %v3124_v50 = vpop.xlane.xlu0 %3123  ;;  %4660 = vmatmul.mubr.msk.bf16.gmra.mrb[104].mxu1 %vm1083_vm3, %v3623_v34  ;;  %v3583_v49 = vmax.f32 %v3519_v4, 0.0  ;;  %v3453_v8 = vmul.f32 %v7309_v43, %v3385_v6  ;;  %v3520_v57 = vadd.f32 %v7313_v42, %v3452_v52 }
 0x540   :  { %v4986_v12 = vpop.eup %4985  ;;  %4995 = vrsqrt.f32 %v3264_v21  ;;  %v3265_v22 = vadd.f32 1e-05, %v3201_v40  ;;  %v3202_v32 = vmul.f32 0.015625, %v3124_v50  ;;  %v8151_v21 = vld [vmem:[#allocation9_spill] sm:$0xff] }
 0x541   :  { %v3387_v60 = vmul.f32 %v4986_v12, %v8146_v38  ;;  %v3127_v36 = vpop.xlane.xlu1 %3126  ;;  %v3624_v61 = vpack.c.bf16 %v3583_v49, %v3582_v13  ;;  %v3521_v5 = vadd.f32 %v7313_v42, %v3453_v8  ;;  %v3454_v7 = vmul.f32 %v7309_v43, %v3386_v23  ;;  %v8152_v8 = vld [vmem:[#allocation8_spill] sm:$0xff] }
 0x542   :  { %v4988_v25 = vpop.eup %4987  ;;  %4997 = vrsqrt.f32 %v3265_v22  ;;  %v3266_v30 = vadd.f32 1e-05, %v3202_v32  ;;  %v3203_v39 = vmul.f32 0.015625, %v3127_v36  ;;  %v3584_v18 = vmax.f32 %v3520_v57, 0.0 }
 0x543   :  { %v3388_v33 = vmul.f32 %v4988_v25, %v7226_v62  ;;  %v3130_v15 = vpop.xlane.xlu0 %3129  ;;  %4663 = vmatprep.mubr.msk.bf16.mxu1 %vm1083_vm3, %v3624_v61  ;;  %v3585_v35 = vmax.f32 %v3521_v5, 0.0  ;;  %v3455_v20 = vmul.f32 %v7309_v43, %v3387_v60  ;;  %v3522_v10 = vadd.f32 %v7313_v42, %v3454_v7  ;;  %v8153_v60 = vld [vmem:[#allocation14_spill] sm:$0xff] }
 0x544   :  { %v4990_v58 = vpop.eup %4989  ;;  %4999 = vrsqrt.f32 %v3266_v30  ;;  %v3267_v27 = vadd.f32 1e-05, %v3203_v39  ;;  %v3204_v0 = vmul.f32 0.015625, %v3130_v15  ;;  %v8154_v39 = vld [vmem:[#allocation7_spill] sm:$0xff] }
 0x545   :  { %v3389_v48 = vmul.f32 %v4990_v58, %v8147_v11  ;;  %v3133_v14 = vpop.xlane.xlu1 %3132  ;;  %v3625_v56 = vpack.c.bf16 %v3585_v35, %v3584_v18  ;;  %v3523_v24 = vadd.f32 %v7313_v42, %v3455_v20  ;;  %v3456_v62 = vmul.f32 %v7309_v43, %v3388_v33  ;;  %v8155_v58 = vld [vmem:[#allocation13_spill] sm:$0xff] }
 0x546   :  { %v4992_v45 = vpop.eup %4991  ;;  %5001 = vrsqrt.f32 %v3267_v27  ;;  %v3268_v26 = vadd.f32 1e-05, %v3204_v0  ;;  %v3205_v53 = vmul.f32 0.015625, %v3133_v14  ;;  %v3586_v44 = vmax.f32 %v3522_v10, 0.0 }
 0x547   :  { %v3390_v3 = vmul.f32 %v4992_v45, %v8148_v31  ;;  %4664 = vmatmul.mubr.msk.bf16.gmra.mrb[108].mxu1 %vm1083_vm3, %v3625_v56  ;;  %v3587_v37 = vmax.f32 %v3523_v24, 0.0  ;;  %v3457_v47 = vmul.f32 %v7309_v43, %v3389_v48  ;;  %v3524_v63 = vadd.f32 %v7313_v42, %v3456_v62 }
 0x548   :  { %v4994_v59 = vpop.eup %4993  ;;  %5003 = vrsqrt.f32 %v3268_v26  ;;  %v3269_v17 = vadd.f32 1e-05, %v3205_v53 }
 0x549   :  { %v3391_v19 = vmul.f32 %v4994_v59, %v8149_v1  ;;  %v3626_v54 = vpack.c.bf16 %v3587_v37, %v3586_v44  ;;  %v3525_v9 = vadd.f32 %v7313_v42, %v3457_v47  ;;  %v3458_v55 = vmul.f32 %v7309_v43, %v3390_v3  ;;  %v8156_v1 = vld [vmem:[#allocation12_spill] sm:$0xff] }
 0x54a   :  { %v4996_v41 = vpop.eup %4995  ;;  %5005 = vrsqrt.f32 %v3269_v17  ;;  %v3588_v46 = vmax.f32 %v3524_v63, 0.0 }
 0x54b   :  { %v3392_v6 = vmul.f32 %v4996_v41, %v8150_v51  ;;  %4667 = vmatprep.mubr.msk.bf16.mxu1 %vm1083_vm3, %v3626_v54  ;;  %v3589_v34 = vmax.f32 %v3525_v9, 0.0  ;;  %v3459_v4 = vmul.f32 %v7309_v43, %v3391_v19  ;;  %v3526_v2 = vadd.f32 %v7313_v42, %v3458_v55  ;;  %v8157_v9 = vld [vmem:[#allocation16_spill] sm:$0xff] }
 0x54c   :  { %v4998_v52 = vpop.eup %4997 }
 0x54d   :  { %v3393_v40 = vmul.f32 %v4998_v52, %v8151_v21  ;;  %v3627_v13 = vpack.c.bf16 %v3589_v34, %v3588_v46  ;;  %v3527_v29 = vadd.f32 %v7313_v42, %v3459_v4  ;;  %v3460_v23 = vmul.f32 %v7309_v43, %v3392_v6 }
 0x54e   :  { %v5000_v50 = vpop.eup %4999  ;;  %v3590_v49 = vmax.f32 %v3526_v2, 0.0 }
 0x54f   :  { %v3394_v57 = vmul.f32 %v5000_v50, %v8152_v8  ;;  %4668 = vmatmul.mubr.msk.bf16.gmra.mrb[112].mxu1 %vm1083_vm3, %v3627_v13  ;;  %v3591_v12 = vmax.f32 %v3527_v29, 0.0  ;;  %v3461_v22 = vmul.f32 %v7309_v43, %v3393_v40  ;;  %v3528_v32 = vadd.f32 %v7313_v42, %v3460_v23 }
 0x550   :  { %v5002_v38 = vpop.eup %5001 }
 0x551   :  { %v3395_v36 = vmul.f32 %v5002_v38, %v8153_v60  ;;  %v3628_v61 = vpack.c.bf16 %v3591_v12, %v3590_v49  ;;  %v3529_v5 = vadd.f32 %v7313_v42, %v3461_v22  ;;  %v3462_v30 = vmul.f32 %v7309_v43, %v3394_v57 }
 0x552   :  { %v5004_v25 = vpop.eup %5003  ;;  %v3592_v33 = vmax.f32 %v3528_v32, 0.0 }
 0x553   :  { %v3396_v7 = vmul.f32 %v5004_v25, %v8154_v39  ;;  %4671 = vmatprep.mubr.msk.bf16.mxu1 %vm1083_vm3, %v3628_v61  ;;  %v3593_v15 = vmax.f32 %v3529_v5, 0.0  ;;  %v3463_v18 = vmul.f32 %v7309_v43, %v3395_v36  ;;  %v3530_v20 = vadd.f32 %v7313_v42, %v3462_v30 }
 0x554   :  { %v5006_v35 = vpop.eup %5005 }
 0x555   :  { %v3397_v27 = vmul.f32 %v5006_v35, %v8155_v58  ;;  %v3629_v0 = vpack.c.bf16 %v3593_v15, %v3592_v33  ;;  %v3531_v10 = vadd.f32 %v7313_v42, %v3463_v18  ;;  %v3464_v11 = vmul.f32 %v7309_v43, %v3396_v7 }
 0x556   :  { %v3594_v48 = vmax.f32 %v3530_v20, 0.0 }
 0x557   :  { %4672 = vmatmul.mubr.msk.bf16.gmra.mrb[116].mxu1 %vm1083_vm3, %v3629_v0  ;;  %v3595_v14 = vmax.f32 %v3531_v10, 0.0  ;;  %v3465_v56 = vmul.f32 %v7309_v43, %v3397_v27  ;;  %v3532_v24 = vadd.f32 %v7313_v42, %v3464_v11 }
 0x559   :  { %v3630_v62 = vpack.c.bf16 %v3595_v14, %v3594_v48  ;;  %v3533_v45 = vadd.f32 %v7313_v42, %v3465_v56  ;;  %v3596_v26 = vmax.f32 %v3532_v24, 0.0 }
 0x55b   :  { %4675 = vmatprep.mubr.msk.bf16.mxu1 %vm1083_vm3, %v3630_v62  ;;  %v3597_v53 = vmax.f32 %v3533_v45, 0.0 }
 0x55c   :  { %v3136_v44 = vpop.xlane.xlu0 %3135 }
 0x55d   :  { %v3206_v31 = vmul.f32 0.015625, %v3136_v44  ;;  %v3631_v3 = vpack.c.bf16 %v3597_v53, %v3596_v26 }
 0x55e   :  { %v3139_v37 = vpop.xlane.xlu1 %3138 }
 0x55f   :  { %v3270_v47 = vadd.f32 1e-05, %v3206_v31  ;;  %v3207_v63 = vmul.f32 0.015625, %v3139_v37  ;;  %4676 = vmatmul.mubr.msk.bf16.gmra.mrb[120].mxu1 %vm1083_vm3, %v3631_v3 }
 0x561   :  { %5007 = vrsqrt.f32 %v3270_v47  ;;  %v3271_v59 = vadd.f32 1e-05, %v3207_v63 }
 0x563   :  { %5009 = vrsqrt.f32 %v3271_v59 }
 0x56b   :  { %v5008_v17 = vpop.eup %5007 }
 0x56c   :  { %v3398_v19 = vmul.f32 %v5008_v17, %v8156_v1 }
 0x56d   :  { %v5010_v54 = vpop.eup %5009 }
 0x56e   :  { %v3399_v41 = vmul.f32 %v5010_v54, %v8157_v9  ;;  %v3466_v55 = vmul.f32 %v7309_v43, %v3398_v19 }
 0x570   :  { %v3467_v51 = vmul.f32 %v7309_v43, %v3399_v41  ;;  %v3534_v6 = vadd.f32 %v7313_v42, %v3466_v55 }
 0x572   :  { %v3535_v46 = vadd.f32 %v7313_v42, %v3467_v51  ;;  %v3598_v34 = vmax.f32 %v3534_v6, 0.0 }
 0x574   :  { %v3599_v4 = vmax.f32 %v3535_v46, 0.0 }
 0x576   :  { %v3632_v52 = vpack.c.bf16 %v3599_v4, %v3598_v34 }
 0x578   :  { %4679 = vmatprep.mubr.msk.bf16.mxu1 %vm1083_vm3, %v3632_v52 }
 0x590   :  { %v3142_v2 = vpop.xlane.xlu0 %3141 }
 0x591   :  { %v3208_v21 = vmul.f32 0.015625, %v3142_v2 }
 0x592   :  { %v3145_v40 = vpop.xlane.xlu1 %3144 }
 0x593   :  { %v3272_v13 = vadd.f32 1e-05, %v3208_v21  ;;  %v3209_v29 = vmul.f32 0.015625, %v3145_v40 }
 0x595   :  { %5011 = vrsqrt.f32 %v3272_v13  ;;  %v3273_v23 = vadd.f32 1e-05, %v3209_v29 }
 0x597   :  { %5013 = vrsqrt.f32 %v3273_v23 }
 0x59f   :  { %v5012_v50 = vpop.eup %5011 }
 0x5a0   :  { %v3400_v49 = vmul.f32 %v5012_v50, %v7371_v16  ;;  %v7553_v16 = vld [vmem:[%s7882_s7] ss:$0 sm:$0xff] }
 0x5a1   :  { %v5014_v8 = vpop.eup %5013 }
 0x5a2   :  { %v3401_v57 = vmul.f32 %v5014_v8, %v7377_v28  ;;  %v3468_v12 = vmul.f32 %v7309_v43, %v3400_v49 }
 0x5a4   :  { %v3469_v22 = vmul.f32 %v7309_v43, %v3401_v57  ;;  %v3536_v32 = vadd.f32 %v7313_v42, %v3468_v12 }
 0x5a6   :  { %v3537_v38 = vadd.f32 %v7313_v42, %v3469_v22  ;;  %v3600_v60 = vmax.f32 %v3536_v32, 0.0 }
 0x5a8   :  { %v3601_v36 = vmax.f32 %v3537_v38, 0.0 }
 0x5aa   :  { %v3633_v61 = vpack.c.bf16 %v3601_v36, %v3600_v60 }
 0x5ac   :  { %4680 = vmatmul.mubr.msk.bf16.gmra.mrb[124].mxu1 %vm1083_vm3, %v3633_v61 }
 0x5bf   :  { %v4621_v5 = vpop.f32.mrb[64].mxu1 }
 0x5c0   :  { %v3812_v28 = vadd.f32 %v4621_v5, %v7553_v16  ;;  %v3803_v25 = vpop.f32.mrb[65].mxu1 }
 0x5c1   :  { %v3804_v43 = vadd.f32 %v7553_v16, %v3803_v25  ;;  %v4622_v30 = vpop.f32.mrb[66].mxu1 }
 0x5c2   :  { %4061 = vst.msk [vmem:[%s7883_s8 + $0x10] sm:$0xff] %vm4058_vm4, %v3812_v28  ;;  %v3815_v42 = vadd.f32 %v4622_v30, %v7553_v16  ;;  %v3806_v39 = vpop.f32.mrb[67].mxu1 }
 0x5c3   :  { %4059 = vst.msk [vmem:[%s7883_s8] sm:$0xff] %vm4058_vm4, %v3804_v43  ;;  %v3807_v7 = vadd.f32 %v7553_v16, %v3806_v39 }
 0x5c4   :  { %4062 = vst.msk [vmem:[%s7883_s8 + $0x18] sm:$0xff] %vm4058_vm4, %v3815_v42 }
 0x5c5   :  { %4060 = vst.msk [vmem:[%s7883_s8 + $0x8] sm:$0xff] %vm4058_vm4, %v3807_v7 }
 0x5c7   :  { %v4625_v33 = vpop.f32.mrb[68].mxu1 }
 0x5c8   :  { %v3828_v15 = vadd.f32 %v4625_v33, %v7553_v16  ;;  %v3819_v18 = vpop.f32.mrb[69].mxu1 }
 0x5c9   :  { %v3820_v35 = vadd.f32 %v7553_v16, %v3819_v18  ;;  %v4626_v20 = vpop.f32.mrb[70].mxu1 }
 0x5ca   :  { %4065 = vst.msk [vmem:[%s7883_s8 + $0x30] sm:$0xff] %vm4058_vm4, %v3828_v15  ;;  %v3831_v58 = vadd.f32 %v4626_v20, %v7553_v16  ;;  %v3822_v27 = vpop.f32.mrb[71].mxu1 }
 0x5cb   :  { %4063 = vst.msk [vmem:[%s7883_s8 + $0x20] sm:$0xff] %vm4058_vm4, %v3820_v35  ;;  %v3823_v0 = vadd.f32 %v7553_v16, %v3822_v27 }
 0x5cc   :  { %4066 = vst.msk [vmem:[%s7883_s8 + $0x38] sm:$0xff] %vm4058_vm4, %v3831_v58 }
 0x5cd   :  { %4064 = vst.msk [vmem:[%s7883_s8 + $0x28] sm:$0xff] %vm4058_vm4, %v3823_v0 }
 0x5cf   :  { %v4629_v10 = vpop.f32.mrb[72].mxu1 }
 0x5d0   :  { %v3844_v11 = vadd.f32 %v4629_v10, %v7553_v16  ;;  %v3835_v48 = vpop.f32.mrb[73].mxu1 }
 0x5d1   :  { %v3836_v14 = vadd.f32 %v7553_v16, %v3835_v48  ;;  %v4630_v56 = vpop.f32.mrb[74].mxu1 }
 0x5d2   :  { %4069 = vst.msk [vmem:[%s7883_s8 + $0x50] sm:$0xff] %vm4058_vm4, %v3844_v11  ;;  %v3847_v24 = vadd.f32 %v4630_v56, %v7553_v16  ;;  %v3838_v62 = vpop.f32.mrb[75].mxu1 }
 0x5d3   :  { %4067 = vst.msk [vmem:[%s7883_s8 + $0x40] sm:$0xff] %vm4058_vm4, %v3836_v14  ;;  %v3839_v45 = vadd.f32 %v7553_v16, %v3838_v62 }
 0x5d4   :  { %4070 = vst.msk [vmem:[%s7883_s8 + $0x58] sm:$0xff] %vm4058_vm4, %v3847_v24 }
 0x5d5   :  { %4068 = vst.msk [vmem:[%s7883_s8 + $0x48] sm:$0xff] %vm4058_vm4, %v3839_v45 }
 0x5d7   :  { %v4633_v26 = vpop.f32.mrb[76].mxu1 }
 0x5d8   :  { %v3860_v53 = vadd.f32 %v4633_v26, %v7553_v16  ;;  %v3851_v44 = vpop.f32.mrb[77].mxu1 }
 0x5d9   :  { %v3852_v31 = vadd.f32 %v7553_v16, %v3851_v44  ;;  %v4634_v3 = vpop.f32.mrb[78].mxu1 }
 0x5da   :  { %4073 = vst.msk [vmem:[%s7883_s8 + $0x70] sm:$0xff] %vm4058_vm4, %v3860_v53  ;;  %v3863_v37 = vadd.f32 %v4634_v3, %v7553_v16  ;;  %v3854_v47 = vpop.f32.mrb[79].mxu1 }
 0x5db   :  { %4071 = vst.msk [vmem:[%s7883_s8 + $0x60] sm:$0xff] %vm4058_vm4, %v3852_v31  ;;  %v3855_v63 = vadd.f32 %v7553_v16, %v3854_v47 }
 0x5dc   :  { %4074 = vst.msk [vmem:[%s7883_s8 + $0x78] sm:$0xff] %vm4058_vm4, %v3863_v37 }
 0x5dd   :  { %4072 = vst.msk [vmem:[%s7883_s8 + $0x68] sm:$0xff] %vm4058_vm4, %v3855_v63 }
 0x5df   :  { %v4637_v59 = vpop.f32.mrb[80].mxu1 }
 0x5e0   :  { %v3876_v17 = vadd.f32 %v4637_v59, %v7553_v16  ;;  %v3867_v1 = vpop.f32.mrb[81].mxu1 }
 0x5e1   :  { %v3868_v19 = vadd.f32 %v7553_v16, %v3867_v1  ;;  %v4638_v54 = vpop.f32.mrb[82].mxu1 }
 0x5e2   :  { %4077 = vst.msk [vmem:[%s7883_s8 + $0x90] sm:$0xff] %vm4058_vm4, %v3876_v17  ;;  %v3879_v9 = vadd.f32 %v4638_v54, %v7553_v16  ;;  %v3870_v41 = vpop.f32.mrb[83].mxu1 }
 0x5e3   :  { %4075 = vst.msk [vmem:[%s7883_s8 + $0x80] sm:$0xff] %vm4058_vm4, %v3868_v19  ;;  %v3871_v55 = vadd.f32 %v7553_v16, %v3870_v41 }
 0x5e4   :  { %4078 = vst.msk [vmem:[%s7883_s8 + $0x98] sm:$0xff] %vm4058_vm4, %v3879_v9 }
 0x5e5   :  { %4076 = vst.msk [vmem:[%s7883_s8 + $0x88] sm:$0xff] %vm4058_vm4, %v3871_v55 }
 0x5e7   :  { %v4641_v51 = vpop.f32.mrb[84].mxu1 }
 0x5e8   :  { %v3892_v6 = vadd.f32 %v4641_v51, %v7553_v16  ;;  %v3883_v46 = vpop.f32.mrb[85].mxu1 }
 0x5e9   :  { %v3884_v34 = vadd.f32 %v7553_v16, %v3883_v46  ;;  %v4642_v4 = vpop.f32.mrb[86].mxu1 }
 0x5ea   :  { %4081 = vst.msk [vmem:[%s7883_s8 + $0xb0] sm:$0xff] %vm4058_vm4, %v3892_v6  ;;  %v3895_v52 = vadd.f32 %v4642_v4, %v7553_v16  ;;  %v3886_v2 = vpop.f32.mrb[87].mxu1 }
 0x5eb   :  { %4079 = vst.msk [vmem:[%s7883_s8 + $0xa0] sm:$0xff] %vm4058_vm4, %v3884_v34  ;;  %v3887_v21 = vadd.f32 %v7553_v16, %v3886_v2 }
 0x5ec   :  { %4082 = vst.msk [vmem:[%s7883_s8 + $0xb8] sm:$0xff] %vm4058_vm4, %v3895_v52 }
 0x5ed   :  { %4080 = vst.msk [vmem:[%s7883_s8 + $0xa8] sm:$0xff] %vm4058_vm4, %v3887_v21 }
 0x5f2   :  { %v4645_v40 = vpop.f32.mrb[88].mxu1 }
 0x5f3   :  { %v3908_v13 = vadd.f32 %v4645_v40, %v7553_v16  ;;  %v3899_v29 = vpop.f32.mrb[89].mxu1 }
 0x5f4   :  { %v3900_v23 = vadd.f32 %v7553_v16, %v3899_v29  ;;  %v4646_v50 = vpop.f32.mrb[90].mxu1 }
 0x5f5   :  { %4085 = vst.msk [vmem:[%s7883_s8 + $0xd0] sm:$0xff] %vm4058_vm4, %v3908_v13  ;;  %v3911_v49 = vadd.f32 %v4646_v50, %v7553_v16  ;;  %v3902_v8 = vpop.f32.mrb[91].mxu1 }
 0x5f6   :  { %4083 = vst.msk [vmem:[%s7883_s8 + $0xc0] sm:$0xff] %vm4058_vm4, %v3900_v23  ;;  %v3903_v57 = vadd.f32 %v7553_v16, %v3902_v8 }
 0x5f7   :  { %4086 = vst.msk [vmem:[%s7883_s8 + $0xd8] sm:$0xff] %vm4058_vm4, %v3911_v49 }
 0x5f8   :  { %4084 = vst.msk [vmem:[%s7883_s8 + $0xc8] sm:$0xff] %vm4058_vm4, %v3903_v57 }
 0x5fa   :  { %v4649_v12 = vpop.f32.mrb[92].mxu1 }
 0x5fb   :  { %v3924_v22 = vadd.f32 %v4649_v12, %v7553_v16  ;;  %v3915_v32 = vpop.f32.mrb[93].mxu1 }
 0x5fc   :  { %v3916_v38 = vadd.f32 %v7553_v16, %v3915_v32  ;;  %v4650_v60 = vpop.f32.mrb[94].mxu1 }
 0x5fd   :  { %4089 = vst.msk [vmem:[%s7883_s8 + $0xf0] sm:$0xff] %vm4058_vm4, %v3924_v22  ;;  %v3927_v36 = vadd.f32 %v4650_v60, %v7553_v16  ;;  %v3918_v61 = vpop.f32.mrb[95].mxu1 }
 0x5fe   :  { %4087 = vst.msk [vmem:[%s7883_s8 + $0xe0] sm:$0xff] %vm4058_vm4, %v3916_v38  ;;  %v3919_v5 = vadd.f32 %v7553_v16, %v3918_v61 }
 0x5ff   :  { %4090 = vst.msk [vmem:[%s7883_s8 + $0xf8] sm:$0xff] %vm4058_vm4, %v3927_v36 }
 0x600   :  { %4088 = vst.msk [vmem:[%s7883_s8 + $0xe8] sm:$0xff] %vm4058_vm4, %v3919_v5 }
 0x602   :  { %v4653_v28 = vpop.f32.mrb[96].mxu1 }
 0x603   :  { %v3940_v25 = vadd.f32 %v4653_v28, %v7553_v16  ;;  %v3931_v43 = vpop.f32.mrb[97].mxu1 }
 0x604   :  { %v3932_v30 = vadd.f32 %v7553_v16, %v3931_v43  ;;  %v4654_v42 = vpop.f32.mrb[98].mxu1 }
 0x605   :  { %4093 = vst.msk [vmem:[%s7883_s8 + $0x110] sm:$0xff] %vm4058_vm4, %v3940_v25  ;;  %v3943_v39 = vadd.f32 %v4654_v42, %v7553_v16  ;;  %v3934_v7 = vpop.f32.mrb[99].mxu1 }
 0x606   :  { %4091 = vst.msk [vmem:[%s7883_s8 + $0x100] sm:$0xff] %vm4058_vm4, %v3932_v30  ;;  %v3935_v33 = vadd.f32 %v7553_v16, %v3934_v7 }
 0x607   :  { %4094 = vst.msk [vmem:[%s7883_s8 + $0x118] sm:$0xff] %vm4058_vm4, %v3943_v39 }
 0x608   :  { %4092 = vst.msk [vmem:[%s7883_s8 + $0x108] sm:$0xff] %vm4058_vm4, %v3935_v33 }
 0x60a   :  { %v4657_v15 = vpop.f32.mrb[100].mxu1 }
 0x60b   :  { %v3956_v18 = vadd.f32 %v4657_v15, %v7553_v16  ;;  %v3947_v35 = vpop.f32.mrb[101].mxu1 }
 0x60c   :  { %v3948_v20 = vadd.f32 %v7553_v16, %v3947_v35  ;;  %v4658_v58 = vpop.f32.mrb[102].mxu1 }
 0x60d   :  { %4097 = vst.msk [vmem:[%s7883_s8 + $0x130] sm:$0xff] %vm4058_vm4, %v3956_v18  ;;  %v3959_v27 = vadd.f32 %v4658_v58, %v7553_v16  ;;  %v3950_v0 = vpop.f32.mrb[103].mxu1 }
 0x60e   :  { %4095 = vst.msk [vmem:[%s7883_s8 + $0x120] sm:$0xff] %vm4058_vm4, %v3948_v20  ;;  %v3951_v10 = vadd.f32 %v7553_v16, %v3950_v0 }
 0x60f   :  { %4098 = vst.msk [vmem:[%s7883_s8 + $0x138] sm:$0xff] %vm4058_vm4, %v3959_v27 }
 0x610   :  { %4096 = vst.msk [vmem:[%s7883_s8 + $0x128] sm:$0xff] %vm4058_vm4, %v3951_v10 }
 0x612   :  { %v4661_v11 = vpop.f32.mrb[104].mxu1 }
 0x613   :  { %v3972_v48 = vadd.f32 %v4661_v11, %v7553_v16  ;;  %v3963_v14 = vpop.f32.mrb[105].mxu1 }
 0x614   :  { %v3964_v56 = vadd.f32 %v7553_v16, %v3963_v14  ;;  %v4662_v24 = vpop.f32.mrb[106].mxu1 }
 0x615   :  { %4101 = vst.msk [vmem:[%s7883_s8 + $0x150] sm:$0xff] %vm4058_vm4, %v3972_v48  ;;  %v3975_v62 = vadd.f32 %v4662_v24, %v7553_v16  ;;  %v3966_v45 = vpop.f32.mrb[107].mxu1 }
 0x616   :  { %4099 = vst.msk [vmem:[%s7883_s8 + $0x140] sm:$0xff] %vm4058_vm4, %v3964_v56  ;;  %v3967_v26 = vadd.f32 %v7553_v16, %v3966_v45 }
 0x617   :  { %4102 = vst.msk [vmem:[%s7883_s8 + $0x158] sm:$0xff] %vm4058_vm4, %v3975_v62 }
 0x618   :  { %4100 = vst.msk [vmem:[%s7883_s8 + $0x148] sm:$0xff] %vm4058_vm4, %v3967_v26 }
 0x61a   :  { %v4665_v53 = vpop.f32.mrb[108].mxu1 }
 0x61b   :  { %v3988_v44 = vadd.f32 %v4665_v53, %v7553_v16  ;;  %v3979_v31 = vpop.f32.mrb[109].mxu1 }
 0x61c   :  { %v3980_v3 = vadd.f32 %v7553_v16, %v3979_v31  ;;  %v4666_v37 = vpop.f32.mrb[110].mxu1 }
 0x61d   :  { %4105 = vst.msk [vmem:[%s7883_s8 + $0x170] sm:$0xff] %vm4058_vm4, %v3988_v44  ;;  %v3991_v47 = vadd.f32 %v4666_v37, %v7553_v16  ;;  %v3982_v63 = vpop.f32.mrb[111].mxu1 }
 0x61e   :  { %4103 = vst.msk [vmem:[%s7883_s8 + $0x160] sm:$0xff] %vm4058_vm4, %v3980_v3  ;;  %v3983_v59 = vadd.f32 %v7553_v16, %v3982_v63 }
 0x61f   :  { %4106 = vst.msk [vmem:[%s7883_s8 + $0x178] sm:$0xff] %vm4058_vm4, %v3991_v47 }
 0x620   :  { %4104 = vst.msk [vmem:[%s7883_s8 + $0x168] sm:$0xff] %vm4058_vm4, %v3983_v59 }
 0x622   :  { %v4669_v17 = vpop.f32.mrb[112].mxu1 }
 0x623   :  { %v4004_v1 = vadd.f32 %v4669_v17, %v7553_v16  ;;  %v3995_v19 = vpop.f32.mrb[113].mxu1 }
 0x624   :  { %v3996_v54 = vadd.f32 %v7553_v16, %v3995_v19  ;;  %v4670_v9 = vpop.f32.mrb[114].mxu1 }
 0x625   :  { %4109 = vst.msk [vmem:[%s7883_s8 + $0x190] sm:$0xff] %vm4058_vm4, %v4004_v1  ;;  %v4007_v41 = vadd.f32 %v4670_v9, %v7553_v16  ;;  %v3998_v55 = vpop.f32.mrb[115].mxu1 }
 0x626   :  { %4107 = vst.msk [vmem:[%s7883_s8 + $0x180] sm:$0xff] %vm4058_vm4, %v3996_v54  ;;  %v3999_v51 = vadd.f32 %v7553_v16, %v3998_v55 }
 0x627   :  { %4110 = vst.msk [vmem:[%s7883_s8 + $0x198] sm:$0xff] %vm4058_vm4, %v4007_v41 }
 0x628   :  { %4108 = vst.msk [vmem:[%s7883_s8 + $0x188] sm:$0xff] %vm4058_vm4, %v3999_v51 }
 0x62a   :  { %v4673_v6 = vpop.f32.mrb[116].mxu1 }
 0x62b   :  { %v4020_v46 = vadd.f32 %v4673_v6, %v7553_v16  ;;  %v4011_v34 = vpop.f32.mrb[117].mxu1 }
 0x62c   :  { %v4012_v4 = vadd.f32 %v7553_v16, %v4011_v34  ;;  %v4674_v52 = vpop.f32.mrb[118].mxu1 }
 0x62d   :  { %4113 = vst.msk [vmem:[%s7883_s8 + $0x1b0] sm:$0xff] %vm4058_vm4, %v4020_v46  ;;  %v4023_v2 = vadd.f32 %v4674_v52, %v7553_v16  ;;  %v4014_v21 = vpop.f32.mrb[119].mxu1 }
 0x62e   :  { %4111 = vst.msk [vmem:[%s7883_s8 + $0x1a0] sm:$0xff] %vm4058_vm4, %v4012_v4  ;;  %v4015_v40 = vadd.f32 %v7553_v16, %v4014_v21 }
 0x62f   :  { %4114 = vst.msk [vmem:[%s7883_s8 + $0x1b8] sm:$0xff] %vm4058_vm4, %v4023_v2 }
 0x630   :  { %4112 = vst.msk [vmem:[%s7883_s8 + $0x1a8] sm:$0xff] %vm4058_vm4, %v4015_v40 }
 0x632   :  { %v4677_v13 = vpop.f32.mrb[120].mxu1 }
 0x633   :  { %v4036_v29 = vadd.f32 %v4677_v13, %v7553_v16  ;;  %v4027_v23 = vpop.f32.mrb[121].mxu1 }
 0x634   :  { %v4028_v50 = vadd.f32 %v7553_v16, %v4027_v23  ;;  %v4678_v49 = vpop.f32.mrb[122].mxu1 }
 0x635   :  { %4117 = vst.msk [vmem:[%s7883_s8 + $0x1d0] sm:$0xff] %vm4058_vm4, %v4036_v29  ;;  %v4039_v8 = vadd.f32 %v4678_v49, %v7553_v16  ;;  %v4030_v57 = vpop.f32.mrb[123].mxu1 }
 0x636   :  { %4115 = vst.msk [vmem:[%s7883_s8 + $0x1c0] sm:$0xff] %vm4058_vm4, %v4028_v50  ;;  %v4031_v12 = vadd.f32 %v7553_v16, %v4030_v57 }
 0x637   :  { %4118 = vst.msk [vmem:[%s7883_s8 + $0x1d8] sm:$0xff] %vm4058_vm4, %v4039_v8 }
 0x638   :  { %4116 = vst.msk [vmem:[%s7883_s8 + $0x1c8] sm:$0xff] %vm4058_vm4, %v4031_v12 }
 0x67f   :  { %v4681_v22 = vpop.f32.mrb[124].mxu1 }
 0x680   :  { %v4052_v32 = vadd.f32 %v4681_v22, %v7553_v16  ;;  %v4043_v38 = vpop.f32.mrb[125].mxu1 }
 0x681   :  { %v4044_v60 = vadd.f32 %v7553_v16, %v4043_v38  ;;  %v4682_v36 = vpop.f32.mrb[126].mxu1 }
 0x682   :  { %4121 = vst.msk [vmem:[%s7883_s8 + $0x1f0] sm:$0xff] %vm4058_vm4, %v4052_v32  ;;  %v4055_v61 = vadd.f32 %v4682_v36, %v7553_v16  ;;  %v4046_v5 = vpop.f32.mrb[127].mxu1 }
 0x683   :  { %4119 = vst.msk [vmem:[%s7883_s8 + $0x1e0] sm:$0xff] %vm4058_vm4, %v4044_v60  ;;  %v4047_v28 = vadd.f32 %v7553_v16, %v4046_v5 }
 0x684   :  { %4122 = vst.msk [vmem:[%s7883_s8 + $0x1f8] sm:$0xff] %vm4058_vm4, %v4055_v61 }
 0x685   :  { %4120 = vst.msk [vmem:[%s7883_s8 + $0x1e8] sm:$0xff] %vm4058_vm4, %v4047_v28 }

</bundles_post_ra>
